<compile_context>
chip_gen: v5e
topology: v5e:2x2
jax: 0.10.0
libtpu: 0.0.40
codegen_flags: <defaults>
</compile_context>

<pallas_src>
import numpy as np
import jax
import jax.numpy as jnp
from jax import lax
from jax.experimental import pallas as pl
from jax.experimental.pallas import tpu as pltpu


def _gaussian_1d(window_size: int, sigma: float) -> np.ndarray:
    # Mirrors gaussian() in the PyTorch reference.
    x = np.arange(window_size, dtype=np.float32) - (window_size // 2)
    if window_size % 2 == 0:
        x = x + 0.5
    g = np.exp(-(x ** 2) / (2.0 * sigma ** 2)).astype(np.float32)
    return (g / g.sum()).astype(np.float32)


def _round_up(x: int, m: int) -> int:
    return (x + m - 1) // m * m


def _make_ssim_kernel(TB: int, H8: int, W: int,
                      C1: float, C2: float, eps: float, shift: float):
    """Kernel body: all filtering on the MXU, SSIM combine on the VPU."""
    TBH8 = TB * H8

    def kernel(gw_ref, gh_ref, x_ref, y_ref, o_ref):
        gw = gw_ref[...]            # (W, W)   row filter, reflect pad folded in
        gh = gh_ref[...]            # (H8, H8) col filter, reflect pad folded in
        xs = x_ref[...] - shift     # (TB*H8, W) mean-shifted inputs
        ys = y_ref[...] - shift

        # Fused row pass: one matmul over the 5 stacked statistics
        # (stat bands are TB*H8 rows each -> sublane aligned, concat is copies).
        z = jnp.concatenate([xs, ys, xs * xs, ys * ys, xs * ys], axis=0)
        t = jnp.dot(z, gw, preferred_element_type=jnp.float32,
                    precision=lax.Precision.HIGHEST)        # (5*TB*H8, W)

        # Column pass: shared (H8, H8) filter applied per image -- no TB^2
        # block diagonal.  Static offsets are multiples of 8 -> free slices.
        for i in range(TB):
            r = i * H8

            def colf(s, r=r):
                blk = t[s * TBH8 + r: s * TBH8 + r + H8, :]
                return jnp.dot(gh, blk, preferred_element_type=jnp.float32,
                               precision=lax.Precision.HIGHEST)

            m1, m2 = colf(0), colf(1)
            e11, e22, e12 = colf(2), colf(3), colf(4)
            # Shifted moments: sigma terms are shift-invariant, mu regains it.
            s1 = e11 - m1 * m1
            s2 = e22 - m2 * m2
            s12 = e12 - m1 * m2
            mu1 = m1 + shift
            mu2 = m2 + shift
            mu1mu2 = mu1 * mu2
            num = (2.0 * mu1mu2 + C1) * (2.0 * s12 + C2)
            den = (mu1 * mu1 + mu2 * mu2 + C1) * (s1 + s2 + C2)
            # Exact reciprocal on the EUP path (approx would eat the margin).
            o_ref[r:r + H8, :] = num * pl.reciprocal(den + eps, approx=False)

    return kernel


def ssim_pallas(img1, img2, window_size: int, max_val: float = 1.0,
                eps: float = 1e-12):
    """SSIM index map, same semantics as the PyTorch SSIM module.

    img1, img2: (B, C, H, W) float32. Returns (B, C, H, W) float32.
    """
    assert img1.shape == img2.shape and img1.ndim == 4
    assert window_size % 2 == 1, "only odd window sizes match the reference"
    B, C, H, W = img1.shape
    k = window_size
    pad = k // 2
    assert pad < H and pad < W, "reflect padding requires window//2 < H, W"
    H8 = _round_up(H, 8)
    BC = B * C

    C1 = (0.01 * max_val) ** 2
    C2 = (0.03 * max_val) ** 2
    shift = 0.5 * max_val
    g1d = _gaussian_1d(k, 1.5)

    # --- filter matrices with reflect padding folded in ----------------------
    def refl(i, n):   # PyTorch 'reflect' (edge not repeated)
        if i < 0:
            return -i
        if i >= n:
            return 2 * (n - 1) - i
        return i

    # Row pass: t[r, w] = sum_j g[j] * x[r, refl(w + j - pad)]
    gw_np = np.zeros((W, W), np.float32)
    for w in range(W):
        for j in range(k):
            gw_np[refl(w + j - pad, W), w] += g1d[j]
    # Col pass (per image): out[h, :] = sum_j g[j] * t[refl(h + j - pad), :]
    gh_np = np.zeros((H8, H8), np.float32)
    for h in range(H):
        for j in range(k):
            gh_np[h, refl(h + j - pad, H)] += g1d[j]

    # --- per-generation VMEM budget & TB (images per grid step) --------------
    try:
        vmem_phys = int(pltpu.get_tpu_info().vmem_capacity_bytes)
    except Exception:
        vmem_phys = 64 * 1024 * 1024            # v7x-safe fallback
    vmem_limit = min(int(0.75 * vmem_phys), 100 * 1024 * 1024)

    def step_bytes(tb):
        blk = tb * H8 * W * 4
        io = (2 * 2 + 2) * blk                       # x, y double-buffered + out
        consts = 2 * (W * W + H8 * H8) * 4           # gw, gh (double-buffered)
        live = 10 * blk + 8 * H8 * W * 4             # Z + T + per-image temps
        return int(1.5 * (io + consts + live))       # compiler-temp fudge

    budget = (2 * vmem_limit) // 3
    max_tb = min(max(1, BC // 2), 16)                # >= 2 grid steps, bounded unroll
    TB = 1
    for t in range(1, max_tb + 1):
        if step_bytes(t) <= budget:
            TB = t
    G = -(-BC // TB)                                  # cdiv
    BCpad = G * TB

    # --- wrapper-side layout: raw images, flattened to 8-aligned row slabs ---
    x = img1.astype(jnp.float32).reshape(BC, H, W)
    y = img2.astype(jnp.float32).reshape(BC, H, W)
    if BCpad != BC:
        zb = ((0, BCpad - BC), (0, 0), (0, 0))
        x = jnp.pad(x, zb)
        y = jnp.pad(y, zb)
    if H8 != H:
        zr = ((0, 0), (0, H8 - H), (0, 0))
        x = jnp.pad(x, zr)
        y = jnp.pad(y, zr)
    x2 = x.reshape(BCpad * H8, W)
    y2 = y.reshape(BCpad * H8, W)

    kernel = _make_ssim_kernel(TB, H8, W, C1, C2, eps, shift)

    out2 = pl.pallas_call(
        kernel,
        out_shape=jax.ShapeDtypeStruct((BCpad * H8, W), jnp.float32),
        grid_spec=pltpu.PrefetchScalarGridSpec(
            num_scalar_prefetch=0,
            grid=(G,),
            in_specs=[
                pl.BlockSpec((W, W), lambda i: (0, 0)),          # Gw (invariant)
                pl.BlockSpec((H8, H8), lambda i: (0, 0)),        # Gh (invariant)
                pl.BlockSpec((TB * H8, W), lambda i: (i, 0)),    # x block
                pl.BlockSpec((TB * H8, W), lambda i: (i, 0)),    # y block
            ],
            out_specs=pl.BlockSpec((TB * H8, W), lambda i: (i, 0)),
        ),
        compiler_params=pltpu.CompilerParams(
            dimension_semantics=("parallel",),
            vmem_limit_bytes=vmem_limit),
    )(jnp.asarray(gw_np), jnp.asarray(gh_np), x2, y2)

    out = out2.reshape(BCpad, H8, W)[:BC, :H, :]
    return out.reshape(B, C, H, W)


def _ssim_ref_jax(img1, img2, window_size, max_val=1.0, eps=1e-12):
    """Pure-JAX reference (direct 2D window, mirrors the PyTorch module)."""
    B, C, H, W = img1.shape
    k = window_size
    pad = k // 2
    g1 = jnp.asarray(_gaussian_1d(k, 1.5))
    w2d = jnp.outer(g1, g1)
    C1 = (0.01 * max_val) ** 2
    C2 = (0.03 * max_val) ** 2

    def filt(x):  # x: (B, C, H, W)
        xp = jnp.pad(x, ((0, 0), (0, 0), (pad, pad), (pad, pad)),
                     mode="reflect")
        out = jnp.zeros_like(x)
        for i in range(k):
            for j in range(k):
                out = out + w2d[i, j] * xp[:, :, i:i + H, j:j + W]
        return out

    mu1 = filt(img1)
    mu2 = filt(img2)
    s1 = filt(img1 * img1) - mu1 * mu1
    s2 = filt(img2 * img2) - mu2 * mu2
    s12 = filt(img1 * img2) - mu1 * mu2
    num = (2.0 * mu1 * mu2 + C1) * (2.0 * s12 + C2)
    den = (mu1 * mu1 + mu2 * mu2 + C1) * (s1 + s2 + C2)
    return num / (den + eps)


if __name__ == "__main__":
    key = jax.random.PRNGKey(0)
    k1, k2 = jax.random.split(key)
    B, C, H, W = 2, 4, 16, 16
    window_size = 5

    img1 = jax.random.uniform(k1, (B, C, H, W), dtype=jnp.float32)
    img2 = jax.random.uniform(k2, (B, C, H, W), dtype=jnp.float32)

    out = ssim_pallas(img1, img2, window_size)
    out = jax.block_until_ready(out)

    ref = _ssim_ref_jax(img1, img2, window_size)
    assert out.shape == (B, C, H, W)
    np.testing.assert_allclose(np.asarray(out), np.asarray(ref),
                               rtol=1e-4, atol=1e-4)

    print("KERNEL_OK")
</pallas_src>

<mosaic_0001>
module attributes {stable_mosaic.version = 11 : i64} {
  func.func @kernel(%arg0: i32, %arg1: memref<16x16xf32, #tpu.memory_space<vmem>>, %arg2: memref<16x16xf32, #tpu.memory_space<vmem>>, %arg3: memref<64x16xf32, #tpu.memory_space<vmem>>, %arg4: memref<64x16xf32, #tpu.memory_space<vmem>>, %arg5: memref<64x16xf32, #tpu.memory_space<vmem>>) attributes {dimension_semantics = [#tpu.dimension_semantics<parallel>], iteration_bounds = array<i64: 2>, scalar_prefetch = 0 : i64, scratch_operands = 0 : i64, tpu.core_type = #tpu.core_type<tc>, window_params = [{pipeline_mode = #tpu.pipeline_mode<synchronous>, transform_indices = @transform_0, window_bounds = array<i64: 16, 16>}, {pipeline_mode = #tpu.pipeline_mode<synchronous>, transform_indices = @transform_1, window_bounds = array<i64: 16, 16>}, {transform_indices = @transform_2, window_bounds = array<i64: 64, 16>}, {transform_indices = @transform_3, window_bounds = array<i64: 64, 16>}, {transform_indices = @transform_4, window_bounds = array<i64: 64, 16>}]} {
    %c0 = arith.constant 0 : index
    %c0_0 = arith.constant 0 : index
    %0 = vector.load %arg1[%c0, %c0_0] : memref<16x16xf32, #tpu.memory_space<vmem>>, vector<16x16xf32>
    %c0_1 = arith.constant 0 : index
    %c0_2 = arith.constant 0 : index
    %1 = vector.load %arg2[%c0_1, %c0_2] : memref<16x16xf32, #tpu.memory_space<vmem>>, vector<16x16xf32>
    %c0_3 = arith.constant 0 : index
    %c0_4 = arith.constant 0 : index
    %2 = vector.load %arg3[%c0_3, %c0_4] : memref<64x16xf32, #tpu.memory_space<vmem>>, vector<64x16xf32>
    %cst = arith.constant 5.000000e-01 : f32
    %3 = vector.broadcast %cst : f32 to vector<64x16xf32>
    %4 = arith.subf %2, %3 : vector<64x16xf32>
    %c0_5 = arith.constant 0 : index
    %c0_6 = arith.constant 0 : index
    %5 = vector.load %arg4[%c0_5, %c0_6] : memref<64x16xf32, #tpu.memory_space<vmem>>, vector<64x16xf32>
    %cst_7 = arith.constant 5.000000e-01 : f32
    %6 = vector.broadcast %cst_7 : f32 to vector<64x16xf32>
    %7 = arith.subf %5, %6 : vector<64x16xf32>
    %8 = arith.mulf %4, %4 : vector<64x16xf32>
    %9 = arith.mulf %7, %7 : vector<64x16xf32>
    %10 = arith.mulf %4, %7 : vector<64x16xf32>
    %11 = tpu.concatenate %4, %7, %8, %9, %10 in 0 : vector<64x16xf32>, vector<64x16xf32>, vector<64x16xf32>, vector<64x16xf32>, vector<64x16xf32> -> vector<320x16xf32>
    %cst_8 = arith.constant dense<0.000000e+00> : vector<320x16xf32>
    %12 = tpu.matmul %11, %0, %cst_8 {dimension_numbers = #tpu.dot_dimension_numbers<[1], [0], [0], [1], [0, 0, 1, 1], [], []>, precision = #tpu.contract_precision<fp32>} : vector<320x16xf32>, vector<16x16xf32>, vector<320x16xf32> -> vector<320x16xf32>
    %13 = vector.extract_strided_slice %12 {offsets = [0, 0], sizes = [16, 16], strides = [1, 1]} : vector<320x16xf32> to vector<16x16xf32>
    %cst_9 = arith.constant dense<0.000000e+00> : vector<16x16xf32>
    %14 = tpu.matmul %1, %13, %cst_9 {dimension_numbers = #tpu.dot_dimension_numbers<[1], [0], [0], [1], [0, 0, 1, 1], [], []>, precision = #tpu.contract_precision<fp32>} : vector<16x16xf32>, vector<16x16xf32>, vector<16x16xf32> -> vector<16x16xf32>
    %15 = vector.extract_strided_slice %12 {offsets = [64, 0], sizes = [16, 16], strides = [1, 1]} : vector<320x16xf32> to vector<16x16xf32>
    %cst_10 = arith.constant dense<0.000000e+00> : vector<16x16xf32>
    %16 = tpu.matmul %1, %15, %cst_10 {dimension_numbers = #tpu.dot_dimension_numbers<[1], [0], [0], [1], [0, 0, 1, 1], [], []>, precision = #tpu.contract_precision<fp32>} : vector<16x16xf32>, vector<16x16xf32>, vector<16x16xf32> -> vector<16x16xf32>
    %17 = vector.extract_strided_slice %12 {offsets = [128, 0], sizes = [16, 16], strides = [1, 1]} : vector<320x16xf32> to vector<16x16xf32>
    %cst_11 = arith.constant dense<0.000000e+00> : vector<16x16xf32>
    %18 = tpu.matmul %1, %17, %cst_11 {dimension_numbers = #tpu.dot_dimension_numbers<[1], [0], [0], [1], [0, 0, 1, 1], [], []>, precision = #tpu.contract_precision<fp32>} : vector<16x16xf32>, vector<16x16xf32>, vector<16x16xf32> -> vector<16x16xf32>
    %19 = vector.extract_strided_slice %12 {offsets = [192, 0], sizes = [16, 16], strides = [1, 1]} : vector<320x16xf32> to vector<16x16xf32>
    %cst_12 = arith.constant dense<0.000000e+00> : vector<16x16xf32>
    %20 = tpu.matmul %1, %19, %cst_12 {dimension_numbers = #tpu.dot_dimension_numbers<[1], [0], [0], [1], [0, 0, 1, 1], [], []>, precision = #tpu.contract_precision<fp32>} : vector<16x16xf32>, vector<16x16xf32>, vector<16x16xf32> -> vector<16x16xf32>
    %21 = vector.extract_strided_slice %12 {offsets = [256, 0], sizes = [16, 16], strides = [1, 1]} : vector<320x16xf32> to vector<16x16xf32>
    %cst_13 = arith.constant dense<0.000000e+00> : vector<16x16xf32>
    %22 = tpu.matmul %1, %21, %cst_13 {dimension_numbers = #tpu.dot_dimension_numbers<[1], [0], [0], [1], [0, 0, 1, 1], [], []>, precision = #tpu.contract_precision<fp32>} : vector<16x16xf32>, vector<16x16xf32>, vector<16x16xf32> -> vector<16x16xf32>
    %23 = arith.mulf %14, %14 : vector<16x16xf32>
    %24 = arith.subf %18, %23 : vector<16x16xf32>
    %25 = arith.mulf %16, %16 : vector<16x16xf32>
    %26 = arith.subf %20, %25 : vector<16x16xf32>
    %27 = arith.mulf %14, %16 : vector<16x16xf32>
    %28 = arith.subf %22, %27 : vector<16x16xf32>
    %cst_14 = arith.constant 5.000000e-01 : f32
    %29 = vector.broadcast %cst_14 : f32 to vector<16x16xf32>
    %30 = arith.addf %14, %29 : vector<16x16xf32>
    %cst_15 = arith.constant 5.000000e-01 : f32
    %31 = vector.broadcast %cst_15 : f32 to vector<16x16xf32>
    %32 = arith.addf %16, %31 : vector<16x16xf32>
    %33 = arith.mulf %30, %32 : vector<16x16xf32>
    %cst_16 = arith.constant 2.000000e+00 : f32
    %34 = vector.broadcast %cst_16 : f32 to vector<16x16xf32>
    %35 = arith.mulf %34, %33 : vector<16x16xf32>
    %cst_17 = arith.constant 9.99999974E-5 : f32
    %36 = vector.broadcast %cst_17 : f32 to vector<16x16xf32>
    %37 = arith.addf %35, %36 : vector<16x16xf32>
    %cst_18 = arith.constant 2.000000e+00 : f32
    %38 = vector.broadcast %cst_18 : f32 to vector<16x16xf32>
    %39 = arith.mulf %38, %28 : vector<16x16xf32>
    %cst_19 = arith.constant 8.99999984E-4 : f32
    %40 = vector.broadcast %cst_19 : f32 to vector<16x16xf32>
    %41 = arith.addf %39, %40 : vector<16x16xf32>
    %42 = arith.mulf %37, %41 : vector<16x16xf32>
    %43 = arith.mulf %30, %30 : vector<16x16xf32>
    %44 = arith.mulf %32, %32 : vector<16x16xf32>
    %45 = arith.addf %43, %44 : vector<16x16xf32>
    %cst_20 = arith.constant 9.99999974E-5 : f32
    %46 = vector.broadcast %cst_20 : f32 to vector<16x16xf32>
    %47 = arith.addf %45, %46 : vector<16x16xf32>
    %48 = arith.addf %24, %26 : vector<16x16xf32>
    %cst_21 = arith.constant 8.99999984E-4 : f32
    %49 = vector.broadcast %cst_21 : f32 to vector<16x16xf32>
    %50 = arith.addf %48, %49 : vector<16x16xf32>
    %51 = arith.mulf %47, %50 : vector<16x16xf32>
    %cst_22 = arith.constant 9.99999996E-13 : f32
    %52 = vector.broadcast %cst_22 : f32 to vector<16x16xf32>
    %53 = arith.addf %51, %52 : vector<16x16xf32>
    %54 = tpu.reciprocal %53 : vector<16x16xf32> -> vector<16x16xf32>
    %55 = arith.mulf %42, %54 : vector<16x16xf32>
    %c0_23 = arith.constant 0 : index
    %c0_24 = arith.constant 0 : index
    %56 = vector.load %arg5[%c0_23, %c0_24] : memref<64x16xf32, #tpu.memory_space<vmem>>, vector<16x16xf32>
    tpu.vector_store %arg5[%c0_23, %c0_24], %55 {strides = array<i32>} : memref<64x16xf32, #tpu.memory_space<vmem>>, vector<16x16xf32>,
    %57 = vector.extract_strided_slice %12 {offsets = [16, 0], sizes = [16, 16], strides = [1, 1]} : vector<320x16xf32> to vector<16x16xf32>
    %cst_25 = arith.constant dense<0.000000e+00> : vector<16x16xf32>
    %58 = tpu.matmul %1, %57, %cst_25 {dimension_numbers = #tpu.dot_dimension_numbers<[1], [0], [0], [1], [0, 0, 1, 1], [], []>, precision = #tpu.contract_precision<fp32>} : vector<16x16xf32>, vector<16x16xf32>, vector<16x16xf32> -> vector<16x16xf32>
    %59 = vector.extract_strided_slice %12 {offsets = [80, 0], sizes = [16, 16], strides = [1, 1]} : vector<320x16xf32> to vector<16x16xf32>
    %cst_26 = arith.constant dense<0.000000e+00> : vector<16x16xf32>
    %60 = tpu.matmul %1, %59, %cst_26 {dimension_numbers = #tpu.dot_dimension_numbers<[1], [0], [0], [1], [0, 0, 1, 1], [], []>, precision = #tpu.contract_precision<fp32>} : vector<16x16xf32>, vector<16x16xf32>, vector<16x16xf32> -> vector<16x16xf32>
    %61 = vector.extract_strided_slice %12 {offsets = [144, 0], sizes = [16, 16], strides = [1, 1]} : vector<320x16xf32> to vector<16x16xf32>
    %cst_27 = arith.constant dense<0.000000e+00> : vector<16x16xf32>
    %62 = tpu.matmul %1, %61, %cst_27 {dimension_numbers = #tpu.dot_dimension_numbers<[1], [0], [0], [1], [0, 0, 1, 1], [], []>, precision = #tpu.contract_precision<fp32>} : vector<16x16xf32>, vector<16x16xf32>, vector<16x16xf32> -> vector<16x16xf32>
    %63 = vector.extract_strided_slice %12 {offsets = [208, 0], sizes = [16, 16], strides = [1, 1]} : vector<320x16xf32> to vector<16x16xf32>
    %cst_28 = arith.constant dense<0.000000e+00> : vector<16x16xf32>
    %64 = tpu.matmul %1, %63, %cst_28 {dimension_numbers = #tpu.dot_dimension_numbers<[1], [0], [0], [1], [0, 0, 1, 1], [], []>, precision = #tpu.contract_precision<fp32>} : vector<16x16xf32>, vector<16x16xf32>, vector<16x16xf32> -> vector<16x16xf32>
    %65 = vector.extract_strided_slice %12 {offsets = [272, 0], sizes = [16, 16], strides = [1, 1]} : vector<320x16xf32> to vector<16x16xf32>
    %cst_29 = arith.constant dense<0.000000e+00> : vector<16x16xf32>
    %66 = tpu.matmul %1, %65, %cst_29 {dimension_numbers = #tpu.dot_dimension_numbers<[1], [0], [0], [1], [0, 0, 1, 1], [], []>, precision = #tpu.contract_precision<fp32>} : vector<16x16xf32>, vector<16x16xf32>, vector<16x16xf32> -> vector<16x16xf32>
    %67 = arith.mulf %58, %58 : vector<16x16xf32>
    %68 = arith.subf %62, %67 : vector<16x16xf32>
    %69 = arith.mulf %60, %60 : vector<16x16xf32>
    %70 = arith.subf %64, %69 : vector<16x16xf32>
    %71 = arith.mulf %58, %60 : vector<16x16xf32>
    %72 = arith.subf %66, %71 : vector<16x16xf32>
    %cst_30 = arith.constant 5.000000e-01 : f32
    %73 = vector.broadcast %cst_30 : f32 to vector<16x16xf32>
    %74 = arith.addf %58, %73 : vector<16x16xf32>
    %cst_31 = arith.constant 5.000000e-01 : f32
    %75 = vector.broadcast %cst_31 : f32 to vector<16x16xf32>
    %76 = arith.addf %60, %75 : vector<16x16xf32>
    %77 = arith.mulf %74, %76 : vector<16x16xf32>
    %cst_32 = arith.constant 2.000000e+00 : f32
    %78 = vector.broadcast %cst_32 : f32 to vector<16x16xf32>
    %79 = arith.mulf %78, %77 : vector<16x16xf32>
    %cst_33 = arith.constant 9.99999974E-5 : f32
    %80 = vector.broadcast %cst_33 : f32 to vector<16x16xf32>
    %81 = arith.addf %79, %80 : vector<16x16xf32>
    %cst_34 = arith.constant 2.000000e+00 : f32
    %82 = vector.broadcast %cst_34 : f32 to vector<16x16xf32>
    %83 = arith.mulf %82, %72 : vector<16x16xf32>
    %cst_35 = arith.constant 8.99999984E-4 : f32
    %84 = vector.broadcast %cst_35 : f32 to vector<16x16xf32>
    %85 = arith.addf %83, %84 : vector<16x16xf32>
    %86 = arith.mulf %81, %85 : vector<16x16xf32>
    %87 = arith.mulf %74, %74 : vector<16x16xf32>
    %88 = arith.mulf %76, %76 : vector<16x16xf32>
    %89 = arith.addf %87, %88 : vector<16x16xf32>
    %cst_36 = arith.constant 9.99999974E-5 : f32
    %90 = vector.broadcast %cst_36 : f32 to vector<16x16xf32>
    %91 = arith.addf %89, %90 : vector<16x16xf32>
    %92 = arith.addf %68, %70 : vector<16x16xf32>
    %cst_37 = arith.constant 8.99999984E-4 : f32
    %93 = vector.broadcast %cst_37 : f32 to vector<16x16xf32>
    %94 = arith.addf %92, %93 : vector<16x16xf32>
    %95 = arith.mulf %91, %94 : vector<16x16xf32>
    %cst_38 = arith.constant 9.99999996E-13 : f32
    %96 = vector.broadcast %cst_38 : f32 to vector<16x16xf32>
    %97 = arith.addf %95, %96 : vector<16x16xf32>
    %98 = tpu.reciprocal %97 : vector<16x16xf32> -> vector<16x16xf32>
    %99 = arith.mulf %86, %98 : vector<16x16xf32>
    %c16 = arith.constant 16 : index
    %c0_39 = arith.constant 0 : index
    %100 = vector.load %arg5[%c16, %c0_39] : memref<64x16xf32, #tpu.memory_space<vmem>>, vector<16x16xf32>
    tpu.vector_store %arg5[%c16, %c0_39], %99 {strides = array<i32>} : memref<64x16xf32, #tpu.memory_space<vmem>>, vector<16x16xf32>,
    %101 = vector.extract_strided_slice %12 {offsets = [32, 0], sizes = [16, 16], strides = [1, 1]} : vector<320x16xf32> to vector<16x16xf32>
    %cst_40 = arith.constant dense<0.000000e+00> : vector<16x16xf32>
    %102 = tpu.matmul %1, %101, %cst_40 {dimension_numbers = #tpu.dot_dimension_numbers<[1], [0], [0], [1], [0, 0, 1, 1], [], []>, precision = #tpu.contract_precision<fp32>} : vector<16x16xf32>, vector<16x16xf32>, vector<16x16xf32> -> vector<16x16xf32>
    %103 = vector.extract_strided_slice %12 {offsets = [96, 0], sizes = [16, 16], strides = [1, 1]} : vector<320x16xf32> to vector<16x16xf32>
    %cst_41 = arith.constant dense<0.000000e+00> : vector<16x16xf32>
    %104 = tpu.matmul %1, %103, %cst_41 {dimension_numbers = #tpu.dot_dimension_numbers<[1], [0], [0], [1], [0, 0, 1, 1], [], []>, precision = #tpu.contract_precision<fp32>} : vector<16x16xf32>, vector<16x16xf32>, vector<16x16xf32> -> vector<16x16xf32>
    %105 = vector.extract_strided_slice %12 {offsets = [160, 0], sizes = [16, 16], strides = [1, 1]} : vector<320x16xf32> to vector<16x16xf32>
    %cst_42 = arith.constant dense<0.000000e+00> : vector<16x16xf32>
    %106 = tpu.matmul %1, %105, %cst_42 {dimension_numbers = #tpu.dot_dimension_numbers<[1], [0], [0], [1], [0, 0, 1, 1], [], []>, precision = #tpu.contract_precision<fp32>} : vector<16x16xf32>, vector<16x16xf32>, vector<16x16xf32> -> vector<16x16xf32>
    %107 = vector.extract_strided_slice %12 {offsets = [224, 0], sizes = [16, 16], strides = [1, 1]} : vector<320x16xf32> to vector<16x16xf32>
    %cst_43 = arith.constant dense<0.000000e+00> : vector<16x16xf32>
    %108 = tpu.matmul %1, %107, %cst_43 {dimension_numbers = #tpu.dot_dimension_numbers<[1], [0], [0], [1], [0, 0, 1, 1], [], []>, precision = #tpu.contract_precision<fp32>} : vector<16x16xf32>, vector<16x16xf32>, vector<16x16xf32> -> vector<16x16xf32>
    %109 = vector.extract_strided_slice %12 {offsets = [288, 0], sizes = [16, 16], strides = [1, 1]} : vector<320x16xf32> to vector<16x16xf32>
    %cst_44 = arith.constant dense<0.000000e+00> : vector<16x16xf32>
    %110 = tpu.matmul %1, %109, %cst_44 {dimension_numbers = #tpu.dot_dimension_numbers<[1], [0], [0], [1], [0, 0, 1, 1], [], []>, precision = #tpu.contract_precision<fp32>} : vector<16x16xf32>, vector<16x16xf32>, vector<16x16xf32> -> vector<16x16xf32>
    %111 = arith.mulf %102, %102 : vector<16x16xf32>
    %112 = arith.subf %106, %111 : vector<16x16xf32>
    %113 = arith.mulf %104, %104 : vector<16x16xf32>
    %114 = arith.subf %108, %113 : vector<16x16xf32>
    %115 = arith.mulf %102, %104 : vector<16x16xf32>
    %116 = arith.subf %110, %115 : vector<16x16xf32>
    %cst_45 = arith.constant 5.000000e-01 : f32
    %117 = vector.broadcast %cst_45 : f32 to vector<16x16xf32>
    %118 = arith.addf %102, %117 : vector<16x16xf32>
    %cst_46 = arith.constant 5.000000e-01 : f32
    %119 = vector.broadcast %cst_46 : f32 to vector<16x16xf32>
    %120 = arith.addf %104, %119 : vector<16x16xf32>
    %121 = arith.mulf %118, %120 : vector<16x16xf32>
    %cst_47 = arith.constant 2.000000e+00 : f32
    %122 = vector.broadcast %cst_47 : f32 to vector<16x16xf32>
    %123 = arith.mulf %122, %121 : vector<16x16xf32>
    %cst_48 = arith.constant 9.99999974E-5 : f32
    %124 = vector.broadcast %cst_48 : f32 to vector<16x16xf32>
    %125 = arith.addf %123, %124 : vector<16x16xf32>
    %cst_49 = arith.constant 2.000000e+00 : f32
    %126 = vector.broadcast %cst_49 : f32 to vector<16x16xf32>
    %127 = arith.mulf %126, %116 : vector<16x16xf32>
    %cst_50 = arith.constant 8.99999984E-4 : f32
    %128 = vector.broadcast %cst_50 : f32 to vector<16x16xf32>
    %129 = arith.addf %127, %128 : vector<16x16xf32>
    %130 = arith.mulf %125, %129 : vector<16x16xf32>
    %131 = arith.mulf %118, %118 : vector<16x16xf32>
    %132 = arith.mulf %120, %120 : vector<16x16xf32>
    %133 = arith.addf %131, %132 : vector<16x16xf32>
    %cst_51 = arith.constant 9.99999974E-5 : f32
    %134 = vector.broadcast %cst_51 : f32 to vector<16x16xf32>
    %135 = arith.addf %133, %134 : vector<16x16xf32>
    %136 = arith.addf %112, %114 : vector<16x16xf32>
    %cst_52 = arith.constant 8.99999984E-4 : f32
    %137 = vector.broadcast %cst_52 : f32 to vector<16x16xf32>
    %138 = arith.addf %136, %137 : vector<16x16xf32>
    %139 = arith.mulf %135, %138 : vector<16x16xf32>
    %cst_53 = arith.constant 9.99999996E-13 : f32
    %140 = vector.broadcast %cst_53 : f32 to vector<16x16xf32>
    %141 = arith.addf %139, %140 : vector<16x16xf32>
    %142 = tpu.reciprocal %141 : vector<16x16xf32> -> vector<16x16xf32>
    %143 = arith.mulf %130, %142 : vector<16x16xf32>
    %c32 = arith.constant 32 : index
    %c0_54 = arith.constant 0 : index
    %144 = vector.load %arg5[%c32, %c0_54] : memref<64x16xf32, #tpu.memory_space<vmem>>, vector<16x16xf32>
    tpu.vector_store %arg5[%c32, %c0_54], %143 {strides = array<i32>} : memref<64x16xf32, #tpu.memory_space<vmem>>, vector<16x16xf32>,
    %145 = vector.extract_strided_slice %12 {offsets = [48, 0], sizes = [16, 16], strides = [1, 1]} : vector<320x16xf32> to vector<16x16xf32>
    %cst_55 = arith.constant dense<0.000000e+00> : vector<16x16xf32>
    %146 = tpu.matmul %1, %145, %cst_55 {dimension_numbers = #tpu.dot_dimension_numbers<[1], [0], [0], [1], [0, 0, 1, 1], [], []>, precision = #tpu.contract_precision<fp32>} : vector<16x16xf32>, vector<16x16xf32>, vector<16x16xf32> -> vector<16x16xf32>
    %147 = vector.extract_strided_slice %12 {offsets = [112, 0], sizes = [16, 16], strides = [1, 1]} : vector<320x16xf32> to vector<16x16xf32>
    %cst_56 = arith.constant dense<0.000000e+00> : vector<16x16xf32>
    %148 = tpu.matmul %1, %147, %cst_56 {dimension_numbers = #tpu.dot_dimension_numbers<[1], [0], [0], [1], [0, 0, 1, 1], [], []>, precision = #tpu.contract_precision<fp32>} : vector<16x16xf32>, vector<16x16xf32>, vector<16x16xf32> -> vector<16x16xf32>
    %149 = vector.extract_strided_slice %12 {offsets = [176, 0], sizes = [16, 16], strides = [1, 1]} : vector<320x16xf32> to vector<16x16xf32>
    %cst_57 = arith.constant dense<0.000000e+00> : vector<16x16xf32>
    %150 = tpu.matmul %1, %149, %cst_57 {dimension_numbers = #tpu.dot_dimension_numbers<[1], [0], [0], [1], [0, 0, 1, 1], [], []>, precision = #tpu.contract_precision<fp32>} : vector<16x16xf32>, vector<16x16xf32>, vector<16x16xf32> -> vector<16x16xf32>
    %151 = vector.extract_strided_slice %12 {offsets = [240, 0], sizes = [16, 16], strides = [1, 1]} : vector<320x16xf32> to vector<16x16xf32>
    %cst_58 = arith.constant dense<0.000000e+00> : vector<16x16xf32>
    %152 = tpu.matmul %1, %151, %cst_58 {dimension_numbers = #tpu.dot_dimension_numbers<[1], [0], [0], [1], [0, 0, 1, 1], [], []>, precision = #tpu.contract_precision<fp32>} : vector<16x16xf32>, vector<16x16xf32>, vector<16x16xf32> -> vector<16x16xf32>
    %153 = vector.extract_strided_slice %12 {offsets = [304, 0], sizes = [16, 16], strides = [1, 1]} : vector<320x16xf32> to vector<16x16xf32>
    %cst_59 = arith.constant dense<0.000000e+00> : vector<16x16xf32>
    %154 = tpu.matmul %1, %153, %cst_59 {dimension_numbers = #tpu.dot_dimension_numbers<[1], [0], [0], [1], [0, 0, 1, 1], [], []>, precision = #tpu.contract_precision<fp32>} : vector<16x16xf32>, vector<16x16xf32>, vector<16x16xf32> -> vector<16x16xf32>
    %155 = arith.mulf %146, %146 : vector<16x16xf32>
    %156 = arith.subf %150, %155 : vector<16x16xf32>
    %157 = arith.mulf %148, %148 : vector<16x16xf32>
    %158 = arith.subf %152, %157 : vector<16x16xf32>
    %159 = arith.mulf %146, %148 : vector<16x16xf32>
    %160 = arith.subf %154, %159 : vector<16x16xf32>
    %cst_60 = arith.constant 5.000000e-01 : f32
    %161 = vector.broadcast %cst_60 : f32 to vector<16x16xf32>
    %162 = arith.addf %146, %161 : vector<16x16xf32>
    %cst_61 = arith.constant 5.000000e-01 : f32
    %163 = vector.broadcast %cst_61 : f32 to vector<16x16xf32>
    %164 = arith.addf %148, %163 : vector<16x16xf32>
    %165 = arith.mulf %162, %164 : vector<16x16xf32>
    %cst_62 = arith.constant 2.000000e+00 : f32
    %166 = vector.broadcast %cst_62 : f32 to vector<16x16xf32>
    %167 = arith.mulf %166, %165 : vector<16x16xf32>
    %cst_63 = arith.constant 9.99999974E-5 : f32
    %168 = vector.broadcast %cst_63 : f32 to vector<16x16xf32>
    %169 = arith.addf %167, %168 : vector<16x16xf32>
    %cst_64 = arith.constant 2.000000e+00 : f32
    %170 = vector.broadcast %cst_64 : f32 to vector<16x16xf32>
    %171 = arith.mulf %170, %160 : vector<16x16xf32>
    %cst_65 = arith.constant 8.99999984E-4 : f32
    %172 = vector.broadcast %cst_65 : f32 to vector<16x16xf32>
    %173 = arith.addf %171, %172 : vector<16x16xf32>
    %174 = arith.mulf %169, %173 : vector<16x16xf32>
    %175 = arith.mulf %162, %162 : vector<16x16xf32>
    %176 = arith.mulf %164, %164 : vector<16x16xf32>
    %177 = arith.addf %175, %176 : vector<16x16xf32>
    %cst_66 = arith.constant 9.99999974E-5 : f32
    %178 = vector.broadcast %cst_66 : f32 to vector<16x16xf32>
    %179 = arith.addf %177, %178 : vector<16x16xf32>
    %180 = arith.addf %156, %158 : vector<16x16xf32>
    %cst_67 = arith.constant 8.99999984E-4 : f32
    %181 = vector.broadcast %cst_67 : f32 to vector<16x16xf32>
    %182 = arith.addf %180, %181 : vector<16x16xf32>
    %183 = arith.mulf %179, %182 : vector<16x16xf32>
    %cst_68 = arith.constant 9.99999996E-13 : f32
    %184 = vector.broadcast %cst_68 : f32 to vector<16x16xf32>
    %185 = arith.addf %183, %184 : vector<16x16xf32>
    %186 = tpu.reciprocal %185 : vector<16x16xf32> -> vector<16x16xf32>
    %187 = arith.mulf %174, %186 : vector<16x16xf32>
    %c48 = arith.constant 48 : index
    %c0_69 = arith.constant 0 : index
    %188 = vector.load %arg5[%c48, %c0_69] : memref<64x16xf32, #tpu.memory_space<vmem>>, vector<16x16xf32>
    tpu.vector_store %arg5[%c48, %c0_69], %187 {strides = array<i32>} : memref<64x16xf32, #tpu.memory_space<vmem>>, vector<16x16xf32>,
    return
  }
  func.func @transform_0(%arg0: i32) -> (i32, i32) {
    %c0_i32 = arith.constant 0 : i32
    %c0_i32_0 = arith.constant 0 : i32
    %c0_i32_1 = arith.constant 0 : i32
    return %c0_i32, %c0_i32_0 : i32, i32
  }
  func.func @transform_1(%arg0: i32) -> (i32, i32) {
    %c0_i32 = arith.constant 0 : i32
    %c0_i32_0 = arith.constant 0 : i32
    %c0_i32_1 = arith.constant 0 : i32
    return %c0_i32, %c0_i32_0 : i32, i32
  }
  func.func @transform_2(%arg0: i32) -> (i32, i32) {
    %c0_i32 = arith.constant 0 : i32
    %c0_i32_0 = arith.constant 0 : i32
    return %arg0, %c0_i32 : i32, i32
  }
  func.func @transform_3(%arg0: i32) -> (i32, i32) {
    %c0_i32 = arith.constant 0 : i32
    %c0_i32_0 = arith.constant 0 : i32
    return %arg0, %c0_i32 : i32, i32
  }
  func.func @transform_4(%arg0: i32) -> (i32, i32) {
    %c0_i32 = arith.constant 0 : i32
    %c0_i32_0 = arith.constant 0 : i32
    return %arg0, %c0_i32 : i32, i32
  }
}

</mosaic_0001>

<bundles_post_ra>
// kernel: tpu_custom_call.1
= control target key start
LH: loop header
LB: loop body
LE: loop exit
PB: predicated region body
PF: predicated region fallthrough
CT: control target
= control target key end

     0   :  { %s6036_s15 = smov 0   ;;  %s8074_s0 = inlined_call_operand.vmem [shape: f32[16,16], index: 0, kind: input, shape index: {}]   ;;  %s8075_s1 = inlined_call_operand.vmem [shape: f32[16,16], index: 1, kind: input, shape index: {}]   ;;  %s8076_s2 = inlined_call_operand.vmem [shape: f32[128,16], index: 2, kind: input, shape index: {}]   ;;  %s8077_s3 = inlined_call_operand.vmem [shape: f32[128,16], index: 3, kind: input, shape index: {}]   ;;  %s8078_s4 = inlined_call_operand.vmem [shape: f32[128,16], index: 4, kind: output, shape index: {}]  }
   0x1 LB: > { %s5950_s16 = sadd.s32 4294967295, %s6009_s15   ;;  %p5954_p0 = scmp.ge.s32.totalorder %s6009_s15, 1  ;;  %s6009_s15 = sphi %s6036_s15, %s14_s15  }
   0x2   : > { %p174_p1 = scmp.lt.s32.totalorder %s6009_s15, 3 }
   0x4   : > { %p175_p2 = pnand %p5954_p0, %p174_p1 }
   0x6   : > { %178 = sbr.rel (%p175_p2) target bundleno = 1343 (0x53f), region = 36 }
   0xb   : > { %v224_v0 = vld [vmem:[%s8074_s0 + $0x8] sm:$0xff]  ;;  %v223_v1 = vld [vmem:[%s8074_s0] sm:$0xff]  ;;  %s5955_s21 = sshll.u32 %s5950_s16, 3  ;;  %vm283_vm0 = vcmask 130048  }
   0xc   : > { %v418_v2 = vand.u32 4294901760, %v224_v0  ;;  %v420_v3 = vand.u32 4294901760, %v223_v1  ;;  %p206_p3 = scmp.lt.s32.totalorder %s5955_s21, 15 }
   0xe   : > { %v758_v4 = vsub.f32 %v224_v0, %v418_v2  ;;  %v764_v5 = vsub.f32 %v223_v1, %v420_v3  ;;  %1166 = vmatpush.msra.mxu3 %v418_v2  ;;  %s8486_s21 = smov (!%p206_p3, %s5955_s21), 15  ;;  %419 = vmatpush.msra.mxu0 %v418_v2 }
   0xf   : > { %s6050_s22 = sshll.u32 %s8486_s21, 3 }
  0x10   : > { %946 = vmatpush.msra.mxu2 %v758_v4  ;;  %v759_v6 = vand.u32 4294901760, %v758_v4  ;;  %1168 = vmatpush.msra.mxu3 %v420_v3  ;;  %v765_v7 = vand.u32 4294901760, %v764_v5  ;;  %s6056_s25 = scalar_lea.vmem %s8076_s2, %s6050_s22  ;;  %s6125_s28 = scalar_lea.vmem %s8077_s3, %s6050_s22 }
  0x11   : > { %421 = vmatpush.msra.mxu0 %v420_v3  ;;  %v227_v8 = vld [vmem:[%s6056_s25] sm:$0xff]  ;;  %v228_v11 = vld [vmem:[%s6056_s25 + $0x8] sm:$0xff]  ;;  %v229_v12 = vld [vmem:[%s6056_s25 + $0x10] sm:$0xff]  ;;  %s7569_s9 = scalar_lea.vmem %s8078_s4, %s6050_s22 }
  0x12   : > { %949 = vmatpush.msra.mxu2 %v764_v5  ;;  %v760_v9 = vsub.f32 %v758_v4, %v759_v6  ;;  %v766_v10 = vsub.f32 %v764_v5, %v765_v7  ;;  %v6061_v13 = vadd.f32 -0.5, %v227_v8  ;;  %v6063_v14 = vadd.f32 -0.5, %v228_v11  ;;  %v230_v26 = vld [vmem:[%s6056_s25 + $0x18] sm:$0xff]  ;;  %v231_v35 = vld [vmem:[%s6056_s25 + $0x20] sm:$0xff]  ;;  %v232_v43 = vld [vmem:[%s6056_s25 + $0x28] sm:$0xff] }
  0x13   : > { %1427 = vmatpush.msrb.mxu0 %v759_v6  ;;  %v6069_v19 = vadd.f32 -0.5, %v229_v12  ;;  %v6083_v30 = vadd.f32 -0.5, %v230_v26  ;;  %v6092_v39 = vadd.f32 -0.5, %v231_v35  ;;  %v6101_v47 = vadd.f32 -0.5, %v232_v43  ;;  %v233_v51 = vld [vmem:[%s6056_s25 + $0x30] sm:$0xff]  ;;  %v234_v59 = vld [vmem:[%s6056_s25 + $0x38] sm:$0xff] }
  0x14   : > { %v761_v15 = vand.u32 4294901760, %v760_v9  ;;  %v767_v16 = vand.u32 4294901760, %v766_v10  ;;  %v285_v17 = vsel %vm283_vm0, %v6061_v13, 0  ;;  %v288_v18 = vsel %vm283_vm0, %v6063_v14, 0  ;;  %v244_v11 = vld [vmem:[%s6125_s28 + $0x8] sm:$0xff] }
  0x15   : > { %1431 = vmatpush.msrb.mxu0 %v765_v7  ;;  %v6071_v20 = vand.u32 4294901760, %v285_v17  ;;  %v6073_v21 = vand.u32 4294901760, %v288_v18  ;;  %v291_v24 = vsel %vm283_vm0, %v6069_v19, 0  ;;  %v294_v34 = vsel %vm283_vm0, %v6083_v30, 0 }
  0x16   : > { %762 = vmatpush.msra.mxu1 %v761_v15  ;;  %v6081_v29 = vand.u32 4294901760, %v291_v24  ;;  %v6090_v38 = vand.u32 4294901760, %v294_v34  ;;  %v297_v42 = vsel %vm283_vm0, %v6092_v39, 0  ;;  %v300_v50 = vsel %vm283_vm0, %v6101_v47, 0 }
  0x17   : > { %v423_v22 = vsub.f32 %v285_v17, %v6071_v20  ;;  %v431_v23 = vsub.f32 %v288_v18, %v6073_v21  ;;  %v6099_v46 = vand.u32 4294901760, %v297_v42  ;;  %v6108_v54 = vand.u32 4294901760, %v300_v50 }
  0x18   : > { %768 = vmatpush.msra.mxu1 %v767_v16  ;;  %v439_v33 = vsub.f32 %v291_v24, %v6081_v29  ;;  %v447_v41 = vsub.f32 %v294_v34, %v6090_v38  ;;  %v6110_v55 = vadd.f32 -0.5, %v233_v51  ;;  %v6119_v63 = vadd.f32 -0.5, %v234_v59  ;;  %v245_v24 = vld [vmem:[%s6125_s28 + $0x10] sm:$0xff]  ;;  %v246_v34 = vld [vmem:[%s6125_s28 + $0x18] sm:$0xff] }
  0x19   : > { %770 = vmatmul.f32.vlgmr.msra.gmra.mxu1 %v6071_v20  ;;  %952 = vmatmul.f32.vlgmr.msra.gmra.mxu2 %v423_v22  ;;  %v424_v25 = vand.u32 4294901760, %v423_v22  ;;  %v432_v28 = vand.u32 4294901760, %v431_v23  ;;  %v455_v49 = vsub.f32 %v297_v42, %v6099_v46  ;;  %v463_v57 = vsub.f32 %v300_v50, %v6108_v54 }
  0x1a   : > { %1608 = vmatpush.msrb.mxu1 %v418_v2  ;;  %v440_v37 = vand.u32 4294901760, %v439_v33  ;;  %v448_v45 = vand.u32 4294901760, %v447_v41  ;;  %v303_v58 = vsel %vm283_vm0, %v6110_v55, 0  ;;  %v306_v2 = vsel %vm283_vm0, %v6119_v63, 0 }
  0x1b   : > { %1172 = vmatmul.f32.vlgmr.msra.gmra.mxu3 %v424_v25  ;;  %v425_v27 = vsub.f32 %v423_v22, %v424_v25  ;;  %v433_v32 = vsub.f32 %v431_v23, %v432_v28  ;;  %v456_v53 = vand.u32 4294901760, %v455_v49  ;;  %v464_v61 = vand.u32 4294901760, %v463_v57 }
  0x1c   : > { %1610 = vmatpush.msrb.mxu1 %v420_v3  ;;  %v441_v40 = vsub.f32 %v439_v33, %v440_v37  ;;  %v449_v48 = vsub.f32 %v447_v41, %v448_v45  ;;  %v6117_v62 = vand.u32 4294901760, %v303_v58  ;;  %v243_v3 = vld [vmem:[%s6125_s28] sm:$0xff]  ;;  %v6132_v6 = vand.u32 4294901760, %v306_v2 }
  0x1d   : > { %v426_v31 = vand.u32 4294901760, %v425_v27  ;;  %v434_v36 = vand.u32 4294901760, %v433_v32  ;;  %v457_v56 = vsub.f32 %v455_v49, %v456_v53  ;;  %v465_v0 = vsub.f32 %v463_v57, %v464_v61 }
  0x1e   : > { %v442_v44 = vand.u32 4294901760, %v441_v40  ;;  %v450_v52 = vand.u32 4294901760, %v449_v48  ;;  %v471_v1 = vsub.f32 %v303_v58, %v6117_v62  ;;  %v6134_v7 = vadd.f32 -0.5, %v243_v3 }
  0x1f   : > { %427 = vmatmul.f32.vlgmr.msra.gmra.mxu0 %v426_v31  ;;  %v458_v60 = vand.u32 4294901760, %v457_v56  ;;  %v466_v4 = vand.u32 4294901760, %v465_v0  ;;  %v479_v9 = vsub.f32 %v306_v2, %v6132_v6  ;;  %v6143_v17 = vadd.f32 -0.5, %v244_v11  ;;  %v248_v56 = vld [vmem:[%s6125_s28 + $0x28] sm:$0xff]  ;;  %v249_v2 = vld [vmem:[%s6125_s28 + $0x30] sm:$0xff] }
  0x20   : > { %v472_v5 = vand.u32 4294901760, %v471_v1  ;;  %v309_v10 = vsel %vm283_vm0, %v6134_v7, 0  ;;  %v6161_v40 = vadd.f32 -0.5, %v246_v34  ;;  %v259_v34 = vmul.f32 %v6061_v13, %v6061_v13 }
  0x21   : > { %774 = vmatmul.f32.gmra.mxu1 %v6073_v21  ;;  %957 = vmatmul.f32.gmra.mxu2 %v431_v23  ;;  %v480_v15 = vand.u32 4294901760, %v479_v9  ;;  %v6141_v16 = vand.u32 4294901760, %v309_v10  ;;  %v312_v23 = vsel %vm283_vm0, %v6143_v17, 0 }
  0x22   : > { %v473_v8 = vsub.f32 %v471_v1, %v472_v5  ;;  %v6150_v27 = vand.u32 4294901760, %v312_v23  ;;  %v318_v43 = vsel %vm283_vm0, %v6161_v40, 0 }
  0x23   : > { %1178 = vmatmul.f32.gmra.mxu3 %v432_v28  ;;  %v481_v18 = vsub.f32 %v479_v9, %v480_v15  ;;  %v487_v22 = vsub.f32 %v309_v10, %v6141_v16  ;;  %v6152_v28 = vadd.f32 -0.5, %v245_v24 }
  0x24   : > { %v474_v12 = vand.u32 4294901760, %v473_v8  ;;  %v495_v32 = vsub.f32 %v312_v23, %v6150_v27  ;;  %v6188_v8 = vadd.f32 -0.5, %v249_v2 }
  0x25   : > { %v482_v25 = vand.u32 4294901760, %v481_v18  ;;  %v488_v26 = vand.u32 4294901760, %v487_v22 }
  0x26   : > { %v327_v11 = vsel %vm283_vm0, %v6188_v8, 0 }
  0x27   : > { %435 = vmatmul.f32.gmra.mxu0 %v434_v36  ;;  %v489_v31 = vsub.f32 %v487_v22, %v488_v26  ;;  %v496_v36 = vand.u32 4294901760, %v495_v32 }
  0x29   : > { %778 = vmatmul.f32.gmra.mxu1 %v6081_v29  ;;  %962 = vmatmul.f32.gmra.mxu2 %v439_v33  ;;  %v315_v33 = vsel %vm283_vm0, %v6152_v28, 0  ;;  %v490_v35 = vand.u32 4294901760, %v489_v31 }
  0x2b   : > { %1184 = vmatmul.f32.gmra.mxu3 %v440_v37  ;;  %v6159_v37 = vand.u32 4294901760, %v315_v33 }
  0x2d   : > { %v503_v42 = vsub.f32 %v315_v33, %v6159_v37 }
  0x2f   : > { %443 = vmatmul.f32.gmra.mxu0 %v442_v44  ;;  %v247_v44 = vld [vmem:[%s6125_s28 + $0x20] sm:$0xff]  ;;  %v504_v48 = vand.u32 4294901760, %v503_v42 }
  0x30   : > { %v6170_v50 = vadd.f32 -0.5, %v247_v44 }
  0x31   : > { %782 = vmatmul.f32.gmra.mxu1 %v6090_v38  ;;  %967 = vmatmul.f32.gmra.mxu2 %v447_v41  ;;  %v497_v41 = vsub.f32 %v495_v32, %v496_v36  ;;  %v505_v51 = vsub.f32 %v503_v42, %v504_v48 }
  0x33   : > { %1190 = vmatmul.f32.gmra.mxu3 %v448_v45  ;;  %v498_v45 = vand.u32 4294901760, %v497_v41  ;;  %v333_v41 = vsel %vm283_vm0, %v259_v34, 0 }
  0x34   : > { %v6210_v44 = vand.u32 4294901760, %v333_v41 }
  0x37   : > { %451 = vmatmul.f32.gmra.mxu0 %v450_v52 }
  0x39   : > { %786 = vmatmul.f32.gmra.mxu1 %v6099_v46  ;;  %972 = vmatmul.f32.gmra.mxu2 %v455_v49  ;;  %v6168_v49 = vand.u32 4294901760, %v318_v43 }
  0x3b   : > { %1196 = vmatmul.f32.gmra.mxu3 %v456_v53  ;;  %v511_v52 = vsub.f32 %v318_v43, %v6168_v49  ;;  %v321_v53 = vsel %vm283_vm0, %v6170_v50, 0 }
  0x3c   : > { %v6177_v59 = vand.u32 4294901760, %v321_v53 }
  0x3d   : > { %v512_v58 = vand.u32 4294901760, %v511_v52 }
  0x3e   : > { %v519_v0 = vsub.f32 %v321_v53, %v6177_v59 }
  0x3f   : > { %459 = vmatmul.f32.gmra.mxu0 %v458_v60  ;;  %v6179_v60 = vadd.f32 -0.5, %v248_v56 }
  0x41   : > { %790 = vmatmul.f32.gmra.mxu1 %v6108_v54  ;;  %977 = vmatmul.f32.gmra.mxu2 %v463_v57  ;;  %v506_v57 = vand.u32 4294901760, %v505_v51  ;;  %v551_v51 = vsub.f32 %v333_v41, %v6210_v44 }
  0x43   : > { %1202 = vmatmul.f32.gmra.mxu3 %v464_v61  ;;  %v513_v61 = vsub.f32 %v511_v52, %v512_v58  ;;  %v552_v56 = vand.u32 4294901760, %v551_v51 }
  0x45   : > { %v514_v3 = vand.u32 4294901760, %v513_v61 }
  0x47   : > { %467 = vmatmul.f32.gmra.mxu0 %v466_v4  ;;  %v520_v4 = vand.u32 4294901760, %v519_v0 }
  0x49   : > { %794 = vmatmul.f32.gmra.mxu1 %v6117_v62  ;;  %982 = vmatmul.f32.gmra.mxu2 %v471_v1  ;;  %v324_v1 = vsel %vm283_vm0, %v6179_v60, 0 }
  0x4b   : > { %1208 = vmatmul.f32.gmra.mxu3 %v472_v5  ;;  %v6186_v5 = vand.u32 4294901760, %v324_v1 }
  0x4d   : > { %v527_v10 = vsub.f32 %v324_v1, %v6186_v5 }
  0x4f   : > { %475 = vmatmul.f32.gmra.mxu0 %v474_v12  ;;  %v250_v12 = vld [vmem:[%s6125_s28 + $0x38] sm:$0xff]  ;;  %v528_v18 = vand.u32 4294901760, %v527_v10 }
  0x50   : > { %v6197_v23 = vadd.f32 -0.5, %v250_v12  ;;  %v262_v12 = vmul.f32 %v6083_v30, %v6083_v30 }
  0x51   : > { %798 = vmatmul.f32.gmra.mxu1 %v6132_v6  ;;  %987 = vmatmul.f32.gmra.mxu2 %v479_v9  ;;  %v521_v9 = vsub.f32 %v519_v0, %v520_v4  ;;  %v529_v24 = vsub.f32 %v527_v10, %v528_v18 }
  0x53   : > { %1214 = vmatmul.f32.gmra.mxu3 %v480_v15  ;;  %v522_v15 = vand.u32 4294901760, %v521_v9  ;;  %v530_v31 = vand.u32 4294901760, %v529_v24 }
  0x57   : > { %483 = vmatmul.f32.gmra.mxu0 %v482_v25 }
  0x59   : > { %802 = vmatmul.f32.gmra.mxu1 %v6141_v16  ;;  %992 = vmatmul.f32.gmra.mxu2 %v487_v22  ;;  %v6195_v22 = vand.u32 4294901760, %v327_v11 }
  0x5b   : > { %1220 = vmatmul.f32.gmra.mxu3 %v488_v26  ;;  %v535_v25 = vsub.f32 %v327_v11, %v6195_v22  ;;  %v330_v26 = vsel %vm283_vm0, %v6197_v23, 0 }
  0x5c   : > { %v6203_v33 = vand.u32 4294901760, %v330_v26 }
  0x5f   : > { %491 = vmatmul.f32.gmra.mxu0 %v490_v35 }
  0x61   : > { %806 = vmatmul.f32.gmra.mxu1 %v6150_v27  ;;  %997 = vmatmul.f32.gmra.mxu2 %v495_v32  ;;  %v536_v32 = vand.u32 4294901760, %v535_v25 }
  0x63   : > { %1226 = vmatmul.f32.gmra.mxu3 %v496_v36  ;;  %v537_v35 = vsub.f32 %v535_v25, %v536_v32  ;;  %v543_v36 = vsub.f32 %v330_v26, %v6203_v33 }
  0x65   : > { %v544_v43 = vand.u32 4294901760, %v543_v36 }
  0x67   : > { %499 = vmatmul.f32.gmra.mxu0 %v498_v45  ;;  %v260_v45 = vmul.f32 %v6063_v14, %v6063_v14 }
  0x69   : > { %810 = vmatmul.f32.gmra.mxu1 %v6159_v37  ;;  %1002 = vmatmul.f32.gmra.mxu2 %v503_v42  ;;  %v538_v42 = vand.u32 4294901760, %v537_v35 }
  0x6b   : > { %1232 = vmatmul.f32.gmra.mxu3 %v504_v48  ;;  %v545_v48 = vsub.f32 %v543_v36, %v544_v43 }
  0x6d   : > { %v546_v53 = vand.u32 4294901760, %v545_v48 }
  0x6f   : > { %507 = vmatmul.f32.gmra.mxu0 %v506_v57 }
  0x71   : > { %814 = vmatmul.f32.gmra.mxu1 %v6168_v49  ;;  %1007 = vmatmul.f32.gmra.mxu2 %v511_v52  ;;  %v336_v52 = vsel %vm283_vm0, %v260_v45, 0  ;;  %v263_v45 = vmul.f32 %v6092_v39, %v6092_v39 }
  0x72   : > { %v6217_v57 = vand.u32 4294901760, %v336_v52 }
  0x73   : > { %1238 = vmatmul.f32.gmra.mxu3 %v512_v58  ;;  %v261_v58 = vmul.f32 %v6069_v19, %v6069_v19 }
  0x74   : > { %v559_v1 = vsub.f32 %v336_v52, %v6217_v57 }
  0x75   : > { %v339_v2 = vsel %vm283_vm0, %v261_v58, 0 }
  0x76   : > { %v6224_v9 = vand.u32 4294901760, %v339_v2 }
  0x77   : > { %515 = vmatmul.f32.gmra.mxu0 %v514_v3 }
  0x79   : > { %818 = vmatmul.f32.gmra.mxu1 %v6177_v59  ;;  %1012 = vmatmul.f32.gmra.mxu2 %v519_v0  ;;  %v553_v0 = vsub.f32 %v551_v51, %v552_v56 }
  0x7b   : > { %1244 = vmatmul.f32.gmra.mxu3 %v520_v4  ;;  %v554_v3 = vand.u32 4294901760, %v553_v0  ;;  %v560_v4 = vand.u32 4294901760, %v559_v1 }
  0x7d   : > { %v561_v26 = vsub.f32 %v559_v1, %v560_v4 }
  0x7f   : > { %523 = vmatmul.f32.gmra.mxu0 %v522_v15  ;;  %v562_v35 = vand.u32 4294901760, %v561_v26 }
  0x81   : > { %822 = vmatmul.f32.gmra.mxu1 %v6186_v5  ;;  %1017 = vmatmul.f32.gmra.mxu2 %v527_v10 }
  0x83   : > { %1250 = vmatmul.f32.gmra.mxu3 %v528_v18 }
  0x87   : > { %531 = vmatmul.f32.gmra.mxu0 %v530_v31  ;;  %v567_v31 = vsub.f32 %v339_v2, %v6224_v9 }
  0x89   : > { %826 = vmatmul.f32.gmra.mxu1 %v6195_v22  ;;  %1022 = vmatmul.f32.gmra.mxu2 %v535_v25 }
  0x8b   : > { %1256 = vmatmul.f32.gmra.mxu3 %v536_v32  ;;  %v342_v32 = vsel %vm283_vm0, %v262_v12, 0 }
  0x8c   : > { %v6233_v41 = vand.u32 4294901760, %v342_v32 }
  0x8e   : > { %v575_v58 = vsub.f32 %v342_v32, %v6233_v41 }
  0x8f   : > { %539 = vmatmul.f32.gmra.mxu0 %v538_v42 }
  0x90   : > { %v576_v2 = vand.u32 4294901760, %v575_v58 }
  0x91   : > { %830 = vmatmul.f32.gmra.mxu1 %v6203_v33  ;;  %1027 = vmatmul.f32.gmra.mxu2 %v543_v36  ;;  %v568_v36 = vand.u32 4294901760, %v567_v31 }
  0x93   : > { %1262 = vmatmul.f32.gmra.mxu3 %v544_v43 }
  0x96   : > { %v771_v61 = vpop.f32.mrf.mxu1 }
  0x97   : > { %547 = vmatmul.f32.gmra.mxu0 %v546_v53 }
  0x99   : > { %834 = vmatmul.f32.gmra.mxu1 %v6210_v44  ;;  %1032 = vmatmul.f32.gmra.mxu2 %v551_v51 }
  0x9b   : > { %1268 = vmatmul.f32.gmra.mxu3 %v552_v56  ;;  %v569_v56 = vsub.f32 %v567_v31, %v568_v36 }
  0x9c   : > { %v428_v10 = vpop.f32.mrf.mxu0  ;;  %v953_v11 = vpop.f32.mrf.mxu2 }
  0x9d   : > { %v772_v15 = vadd.f32 %v771_v61, %v428_v10  ;;  %v345_v61 = vsel %vm283_vm0, %v263_v45, 0 }
  0x9e   : > { %v775_v18 = vpop.f32.mrf.mxu1  ;;  %v1173_v24 = vpop.f32.mrf.mxu3 }
  0x9f   : > { %v954_v25 = vadd.f32 %v953_v11, %v772_v15  ;;  %555 = vmatmul.f32.gmra.mxu0 %v554_v3  ;;  %v6242_v3 = vand.u32 4294901760, %v345_v61  ;;  %v264_v11 = vmul.f32 %v6101_v47, %v6101_v47 }
  0xa1   : > { %838 = vmatmul.f32.gmra.mxu1 %v6217_v57  ;;  %v6231_v34 = vadd.f32 %v1173_v24, %v954_v25  ;;  %1037 = vmatmul.f32.gmra.mxu2 %v559_v1  ;;  %v570_v1 = vand.u32 4294901760, %v569_v56  ;;  %v577_v25 = vsub.f32 %v575_v58, %v576_v2  ;;  %v583_v26 = vsub.f32 %v345_v61, %v6242_v3 }
  0xa3   : > { %1274 = vmatmul.f32.gmra.mxu3 %v560_v4 }
  0xa4   : > { %v436_v42 = vpop.f32.mrf.mxu0  ;;  %v958_v43 = vpop.f32.mrf.mxu2 }
  0xa5   : > { %v776_v48 = vadd.f32 %v775_v18, %v436_v42 }
  0xa6   : > { %v779_v51 = vpop.f32.mrf.mxu1  ;;  %v1179_v52 = vpop.f32.mrf.mxu3 }
  0xa7   : > { %v959_v53 = vadd.f32 %v958_v43, %v776_v48  ;;  %563 = vmatmul.f32.gmra.mxu0 %v562_v35  ;;  %v578_v35 = vand.u32 4294901760, %v577_v25  ;;  %v265_v48 = vmul.f32 %v6110_v55, %v6110_v55 }
  0xa9   : > { %842 = vmatmul.f32.gmra.mxu1 %v6224_v9  ;;  %v6240_v0 = vadd.f32 %v1179_v52, %v959_v53  ;;  %1042 = vmatmul.f32.gmra.mxu2 %v567_v31  ;;  %v348_v31 = vsel %vm283_vm0, %v264_v11, 0 }
  0xaa   : > { %v6251_v42 = vand.u32 4294901760, %v348_v31 }
  0xab   : > { %1280 = vmatmul.f32.gmra.mxu3 %v568_v36  ;;  %v584_v36 = vand.u32 4294901760, %v583_v26 }
  0xac   : > { %v444_v4 = vpop.f32.mrf.mxu0  ;;  %v963_v10 = vpop.f32.mrf.mxu2  ;;  %8162 = vst [vmem:[#allocation2_spill] sm:$0xff] %v6251_v42 }
  0xad   : > { %v780_v12 = vadd.f32 %v779_v51, %v444_v4  ;;  %v585_v61 = vsub.f32 %v583_v26, %v584_v36 }
  0xae   : > { %v783_v15 = vpop.f32.mrf.mxu1  ;;  %v1185_v18 = vpop.f32.mrf.mxu3 }
  0xaf   : > { %v964_v24 = vadd.f32 %v963_v10, %v780_v12  ;;  %571 = vmatmul.f32.gmra.mxu0 %v570_v1  ;;  %v591_v1 = vsub.f32 %v348_v31, %v6251_v42  ;;  %v586_v4 = vand.u32 4294901760, %v585_v61  ;;  %v267_v61 = vmul.f32 %v6134_v7, %v6134_v7 }
  0xb1   : > { %846 = vmatmul.f32.gmra.mxu1 %v6233_v41  ;;  %v6249_v32 = vadd.f32 %v1185_v18, %v964_v24  ;;  %1047 = vmatmul.f32.gmra.mxu2 %v575_v58  ;;  %v351_v58 = vsel %vm283_vm0, %v265_v48, 0  ;;  %v592_v10 = vand.u32 4294901760, %v591_v1  ;;  %v266_v18 = vmul.f32 %v6119_v63, %v6119_v63 }
  0xb2   : > { %v6260_v11 = vand.u32 4294901760, %v351_v58 }
  0xb3   : > { %1286 = vmatmul.f32.gmra.mxu3 %v576_v2 }
  0xb4   : > { %v452_v43 = vpop.f32.mrf.mxu0  ;;  %v968_v45 = vpop.f32.mrf.mxu2  ;;  %8163 = vst [vmem:[#allocation3_spill] sm:$0xff] %v6260_v11 }
  0xb5   : > { %v784_v51 = vadd.f32 %v783_v15, %v452_v43  ;;  %v593_v43 = vsub.f32 %v591_v1, %v592_v10 }
  0xb6   : > { %v787_v52 = vpop.f32.mrf.mxu1  ;;  %v1191_v53 = vpop.f32.mrf.mxu3 }
  0xb7   : > { %v969_v56 = vadd.f32 %v968_v45, %v784_v51  ;;  %579 = vmatmul.f32.gmra.mxu0 %v578_v35  ;;  %v599_v45 = vsub.f32 %v351_v58, %v6260_v11  ;;  %v594_v48 = vand.u32 4294901760, %v593_v43 }
  0xb9   : > { %850 = vmatmul.f32.gmra.mxu1 %v6242_v3  ;;  %v6258_v2 = vadd.f32 %v1191_v53, %v969_v56  ;;  %1052 = vmatmul.f32.gmra.mxu2 %v583_v26  ;;  %v354_v26 = vsel %vm283_vm0, %v266_v18, 0  ;;  %v600_v51 = vand.u32 4294901760, %v599_v45 }
  0xba   : > { %v6269_v53 = vand.u32 4294901760, %v354_v26 }
  0xbb   : > { %1292 = vmatmul.f32.gmra.mxu3 %v584_v36 }
  0xbc   : > { %v460_v12 = vpop.f32.mrf.mxu0  ;;  %v973_v15 = vpop.f32.mrf.mxu2  ;;  %8164 = vst [vmem:[#allocation4_spill] sm:$0xff] %v6269_v53  ;;  %v607_v18 = vsub.f32 %v354_v26, %v6269_v53 }
  0xbd   : > { %v788_v24 = vadd.f32 %v787_v52, %v460_v12 }
  0xbe   : > { %v791_v25 = vpop.f32.mrf.mxu1  ;;  %v1197_v31 = vpop.f32.mrf.mxu3 }
  0xbf   : > { %v974_v35 = vadd.f32 %v973_v15, %v788_v24  ;;  %587 = vmatmul.f32.gmra.mxu0 %v586_v4  ;;  %v601_v24 = vsub.f32 %v599_v45, %v600_v51 }
  0xc1   : > { %854 = vmatmul.f32.gmra.mxu1 %v6251_v42  ;;  %v6267_v36 = vadd.f32 %v1197_v31, %v974_v35  ;;  %1057 = vmatmul.f32.gmra.mxu2 %v591_v1  ;;  %v357_v1 = vsel %vm283_vm0, %v267_v61, 0  ;;  %v602_v31 = vand.u32 4294901760, %v601_v24  ;;  %v608_v35 = vand.u32 4294901760, %v607_v18 }
  0xc2   : > { %v6278_v43 = vand.u32 4294901760, %v357_v1 }
  0xc3   : > { %1298 = vmatmul.f32.gmra.mxu3 %v592_v10 }
  0xc4   : > { %v468_v52 = vpop.f32.mrf.mxu0  ;;  %v978_v56 = vpop.f32.mrf.mxu2  ;;  %8166 = vst [vmem:[#allocation6_spill] sm:$0xff] %v6278_v43  ;;  %v615_v61 = vsub.f32 %v357_v1, %v6278_v43 }
  0xc5   : > { %v792_v4 = vadd.f32 %v791_v25, %v468_v52 }
  0xc6   : > { %v795_v12 = vpop.f32.mrf.mxu1  ;;  %v1203_v58 = vpop.f32.mrf.mxu3 }
  0xc7   : > { %v979_v15 = vadd.f32 %v978_v56, %v792_v4  ;;  %595 = vmatmul.f32.gmra.mxu0 %v594_v48  ;;  %v268_v48 = vmul.f32 %v6143_v17, %v6143_v17 }
  0xc9   : > { %858 = vmatmul.f32.gmra.mxu1 %v6260_v11  ;;  %v6276_v10 = vadd.f32 %v1203_v58, %v979_v15  ;;  %1062 = vmatmul.f32.gmra.mxu2 %v599_v45  ;;  %v609_v11 = vsub.f32 %v607_v18, %v608_v35  ;;  %v360_v45 = vsel %vm283_vm0, %v268_v48, 0  ;;  %v616_v15 = vand.u32 4294901760, %v615_v61 }
  0xca   : > { %v6287_v24 = vand.u32 4294901760, %v360_v45 }
  0xcb   : > { %8165 = vst [vmem:[#allocation5_spill] sm:$0xff] %v6276_v10  ;;  %1304 = vmatmul.f32.gmra.mxu3 %v600_v51  ;;  %v610_v58 = vand.u32 4294901760, %v609_v11 }
  0xcc   : > { %v476_v25 = vpop.f32.mrf.mxu0  ;;  %v983_v52 = vpop.f32.mrf.mxu2  ;;  %8168 = vst [vmem:[#allocation8_spill] sm:$0xff] %v6287_v24 }
  0xcd   : > { %v796_v56 = vadd.f32 %v795_v12, %v476_v25 }
  0xce   : > { %v799_v4 = vpop.f32.mrf.mxu1  ;;  %v1209_v26 = vpop.f32.mrf.mxu3 }
  0xcf   : > { %v984_v42 = vadd.f32 %v983_v52, %v796_v56  ;;  %603 = vmatmul.f32.gmra.mxu0 %v602_v31  ;;  %v269_v31 = vmul.f32 %v6152_v28, %v6152_v28 }
  0xd1   : > { %862 = vmatmul.f32.gmra.mxu1 %v6269_v53  ;;  %v6285_v51 = vadd.f32 %v1209_v26, %v984_v42  ;;  %1067 = vmatmul.f32.gmra.mxu2 %v607_v18  ;;  %v617_v53 = vsub.f32 %v615_v61, %v616_v15  ;;  %v623_v42 = vsub.f32 %v360_v45, %v6287_v24  ;;  %v363_v11 = vsel %vm283_vm0, %v269_v31, 0 }
  0xd2   : > { %v6296_v26 = vand.u32 4294901760, %v363_v11 }
  0xd3   : > { %8167 = vst [vmem:[#allocation7_spill] sm:$0xff] %v6285_v51  ;;  %1310 = vmatmul.f32.gmra.mxu3 %v608_v35  ;;  %v618_v35 = vand.u32 4294901760, %v617_v53  ;;  %v624_v48 = vand.u32 4294901760, %v623_v42 }
  0xd4   : > { %v484_v12 = vpop.f32.mrf.mxu0  ;;  %v988_v25 = vpop.f32.mrf.mxu2  ;;  %8170 = vst [vmem:[#allocation10_spill] sm:$0xff] %v6296_v26 }
  0xd5   : > { %v800_v52 = vadd.f32 %v799_v4, %v484_v12 }
  0xd6   : > { %v803_v56 = vpop.f32.mrf.mxu1  ;;  %v1215_v1 = vpop.f32.mrf.mxu3 }
  0xd7   : > { %v989_v10 = vadd.f32 %v988_v25, %v800_v52  ;;  %611 = vmatmul.f32.gmra.mxu0 %v610_v58  ;;  %v270_v58 = vmul.f32 %v6161_v40, %v6161_v40 }
  0xd9   : > { %866 = vmatmul.f32.gmra.mxu1 %v6278_v43  ;;  %v6294_v18 = vadd.f32 %v1215_v1, %v989_v10  ;;  %1072 = vmatmul.f32.gmra.mxu2 %v615_v61  ;;  %v625_v43 = vsub.f32 %v623_v42, %v624_v48  ;;  %v631_v10 = vsub.f32 %v363_v11, %v6296_v26  ;;  %v366_v53 = vsel %vm283_vm0, %v270_v58, 0 }
  0xda   : > { %v6305_v1 = vand.u32 4294901760, %v366_v53 }
  0xdb   : > { %8169 = vst [vmem:[#allocation9_spill] sm:$0xff] %v6294_v18  ;;  %1316 = vmatmul.f32.gmra.mxu3 %v616_v15  ;;  %v626_v15 = vand.u32 4294901760, %v625_v43  ;;  %v632_v31 = vand.u32 4294901760, %v631_v10 }
  0xdc   : > { %v492_v4 = vpop.f32.mrf.mxu0  ;;  %v993_v12 = vpop.f32.mrf.mxu2  ;;  %8172 = vst [vmem:[#allocation12_spill] sm:$0xff] %v6305_v1 }
  0xdd   : > { %v804_v25 = vadd.f32 %v803_v56, %v492_v4 }
  0xde   : > { %v807_v52 = vpop.f32.mrf.mxu1  ;;  %v1221_v45 = vpop.f32.mrf.mxu3 }
  0xdf   : > { %v994_v51 = vadd.f32 %v993_v12, %v804_v25  ;;  %619 = vmatmul.f32.gmra.mxu0 %v618_v35  ;;  %v271_v35 = vmul.f32 %v6170_v50, %v6170_v50 }
  0xe1   : > { %870 = vmatmul.f32.gmra.mxu1 %v6287_v24  ;;  %v6303_v61 = vadd.f32 %v1221_v45, %v994_v51  ;;  %1077 = vmatmul.f32.gmra.mxu2 %v623_v42  ;;  %v633_v24 = vsub.f32 %v631_v10, %v632_v31  ;;  %v639_v51 = vsub.f32 %v366_v53, %v6305_v1  ;;  %v369_v43 = vsel %vm283_vm0, %v271_v35, 0 }
  0xe2   : > { %v6314_v45 = vand.u32 4294901760, %v369_v43 }
  0xe3   : > { %8171 = vst [vmem:[#allocation11_spill] sm:$0xff] %v6303_v61  ;;  %1322 = vmatmul.f32.gmra.mxu3 %v624_v48  ;;  %v634_v48 = vand.u32 4294901760, %v633_v24  ;;  %v640_v58 = vand.u32 4294901760, %v639_v51 }
  0xe4   : > { %v500_v56 = vpop.f32.mrf.mxu0  ;;  %v998_v4 = vpop.f32.mrf.mxu2  ;;  %8174 = vst [vmem:[#allocation14_spill] sm:$0xff] %v6314_v45 }
  0xe5   : > { %v808_v12 = vadd.f32 %v807_v52, %v500_v56 }
  0xe6   : > { %v811_v25 = vpop.f32.mrf.mxu1  ;;  %v1227_v11 = vpop.f32.mrf.mxu3 }
  0xe7   : > { %v999_v18 = vadd.f32 %v998_v4, %v808_v12  ;;  %627 = vmatmul.f32.gmra.mxu0 %v626_v15  ;;  %v272_v15 = vmul.f32 %v6179_v60, %v6179_v60 }
  0xe9   : > { %874 = vmatmul.f32.gmra.mxu1 %v6296_v26  ;;  %v6312_v42 = vadd.f32 %v1227_v11, %v999_v18  ;;  %1082 = vmatmul.f32.gmra.mxu2 %v631_v10  ;;  %v641_v26 = vsub.f32 %v639_v51, %v640_v58  ;;  %v647_v18 = vsub.f32 %v369_v43, %v6314_v45  ;;  %v372_v24 = vsel %vm283_vm0, %v272_v15, 0 }
  0xea   : > { %v6323_v11 = vand.u32 4294901760, %v372_v24 }
  0xeb   : > { %8173 = vst [vmem:[#allocation13_spill] sm:$0xff] %v6312_v42  ;;  %1328 = vmatmul.f32.gmra.mxu3 %v632_v31  ;;  %v642_v31 = vand.u32 4294901760, %v641_v26  ;;  %v648_v35 = vand.u32 4294901760, %v647_v18 }
  0xec   : > { %v508_v52 = vpop.f32.mrf.mxu0  ;;  %v1003_v56 = vpop.f32.mrf.mxu2  ;;  %8176 = vst [vmem:[#allocation16_spill] sm:$0xff] %v6323_v11 }
  0xed   : > { %v812_v4 = vadd.f32 %v811_v25, %v508_v52 }
  0xee   : > { %v815_v12 = vpop.f32.mrf.mxu1  ;;  %v1233_v53 = vpop.f32.mrf.mxu3 }
  0xef   : > { %v1004_v61 = vadd.f32 %v1003_v56, %v812_v4  ;;  %635 = vmatmul.f32.gmra.mxu0 %v634_v48  ;;  %v273_v48 = vmul.f32 %v6188_v8, %v6188_v8 }
  0xf1   : > { %878 = vmatmul.f32.gmra.mxu1 %v6305_v1  ;;  %v6321_v10 = vadd.f32 %v1233_v53, %v1004_v61  ;;  %1087 = vmatmul.f32.gmra.mxu2 %v639_v51  ;;  %v649_v1 = vsub.f32 %v647_v18, %v648_v35  ;;  %v655_v61 = vsub.f32 %v372_v24, %v6323_v11  ;;  %v375_v26 = vsel %vm283_vm0, %v273_v48, 0 }
  0xf2   : > { %v6332_v53 = vand.u32 4294901760, %v375_v26 }
  0xf3   : > { %8175 = vst [vmem:[#allocation15_spill] sm:$0xff] %v6321_v10  ;;  %1334 = vmatmul.f32.gmra.mxu3 %v640_v58  ;;  %v650_v58 = vand.u32 4294901760, %v649_v1  ;;  %v656_v15 = vand.u32 4294901760, %v655_v61 }
  0xf4   : > { %v516_v25 = vpop.f32.mrf.mxu0  ;;  %v1008_v52 = vpop.f32.mrf.mxu2 }
  0xf5   : > { %v816_v56 = vadd.f32 %v815_v12, %v516_v25 }
  0xf6   : > { %v819_v4 = vpop.f32.mrf.mxu1  ;;  %v1239_v43 = vpop.f32.mrf.mxu3 }
  0xf7   : > { %v1009_v42 = vadd.f32 %v1008_v52, %v816_v56  ;;  %643 = vmatmul.f32.gmra.mxu0 %v642_v31  ;;  %v274_v31 = vmul.f32 %v6197_v23, %v6197_v23 }
  0xf9   : > { %882 = vmatmul.f32.gmra.mxu1 %v6314_v45  ;;  %v6330_v51 = vadd.f32 %v1239_v43, %v1009_v42  ;;  %1092 = vmatmul.f32.gmra.mxu2 %v647_v18  ;;  %v657_v45 = vsub.f32 %v655_v61, %v656_v15  ;;  %v663_v42 = vsub.f32 %v375_v26, %v6332_v53  ;;  %v378_v1 = vsel %vm283_vm0, %v274_v31, 0 }
  0xfa   : > { %v6341_v43 = vand.u32 4294901760, %v378_v1 }
  0xfb   : > { %8177 = vst [vmem:[#allocation17_spill] sm:$0xff] %v6330_v51  ;;  %1340 = vmatmul.f32.gmra.mxu3 %v648_v35  ;;  %v658_v35 = vand.u32 4294901760, %v657_v45  ;;  %v664_v48 = vand.u32 4294901760, %v663_v42 }
  0xfc   : > { %v524_v12 = vpop.f32.mrf.mxu0  ;;  %v1013_v25 = vpop.f32.mrf.mxu2 }
  0xfd   : > { %v820_v52 = vadd.f32 %v819_v4, %v524_v12 }
  0xfe   : > { %v823_v56 = vpop.f32.mrf.mxu1  ;;  %v1245_v24 = vpop.f32.mrf.mxu3 }
  0xff   : > { %v1014_v10 = vadd.f32 %v1013_v25, %v820_v52  ;;  %651 = vmatmul.f32.gmra.mxu0 %v650_v58  ;;  %v275_v58 = vmul.f32 %v6134_v7, %v6061_v13 }
 0x101   : > { %886 = vmatmul.f32.gmra.mxu1 %v6323_v11  ;;  %v6339_v18 = vadd.f32 %v1245_v24, %v1014_v10  ;;  %1097 = vmatmul.f32.gmra.mxu2 %v655_v61  ;;  %v665_v11 = vsub.f32 %v663_v42, %v664_v48  ;;  %v671_v10 = vsub.f32 %v378_v1, %v6341_v43  ;;  %v381_v45 = vsel %vm283_vm0, %v275_v58, 0 }
 0x102   : > { %v6350_v24 = vand.u32 4294901760, %v381_v45 }
 0x103   : > { %1346 = vmatmul.f32.gmra.mxu3 %v656_v15  ;;  %v666_v15 = vand.u32 4294901760, %v665_v11  ;;  %v672_v31 = vand.u32 4294901760, %v671_v10 }
 0x104   : > { %v532_v4 = vpop.f32.mrf.mxu0  ;;  %v1018_v12 = vpop.f32.mrf.mxu2 }
 0x105   : > { %v824_v25 = vadd.f32 %v823_v56, %v532_v4  ;;  %v276_v56 = vmul.f32 %v6143_v17, %v6063_v14 }
 0x106   : > { %v827_v52 = vpop.f32.mrf.mxu1  ;;  %v1251_v26 = vpop.f32.mrf.mxu3 }
 0x107   : > { %v1019_v51 = vadd.f32 %v1018_v12, %v824_v25  ;;  %659 = vmatmul.f32.gmra.mxu0 %v658_v35  ;;  %v673_v25 = vsub.f32 %v671_v10, %v672_v31  ;;  %v384_v11 = vsel %vm283_vm0, %v276_v56, 0 }
 0x109   : > { %890 = vmatmul.f32.gmra.mxu1 %v6332_v53  ;;  %v6348_v61 = vadd.f32 %v1251_v26, %v1019_v51  ;;  %1102 = vmatmul.f32.gmra.mxu2 %v663_v42  ;;  %v679_v51 = vsub.f32 %v381_v45, %v6350_v24  ;;  %v6359_v26 = vand.u32 4294901760, %v384_v11 }
 0x10b   : > { %1352 = vmatmul.f32.gmra.mxu3 %v664_v48  ;;  %v674_v48 = vand.u32 4294901760, %v673_v25  ;;  %v680_v58 = vand.u32 4294901760, %v679_v51 }
 0x10c   : > { %v540_v13 = vpop.f32.mrf.mxu0  ;;  %v1023_v7 = vpop.f32.mrf.mxu2 }
 0x10d   : > { %v828_v35 = vadd.f32 %v827_v52, %v540_v13  ;;  %v277_v52 = vmul.f32 %v6152_v28, %v6069_v19  ;;  %v681_v56 = vsub.f32 %v679_v51, %v680_v58 }
 0x10e   : > { %v831_v4 = vpop.f32.mrf.mxu1  ;;  %v1257_v1 = vpop.f32.mrf.mxu3 }
 0x10f   : > { %v1024_v12 = vadd.f32 %v1023_v7, %v828_v35  ;;  %667 = vmatmul.f32.gmra.mxu0 %v666_v15  ;;  %v687_v35 = vsub.f32 %v384_v11, %v6359_v26 }
 0x111   : > { %894 = vmatmul.f32.gmra.mxu1 %v6341_v43  ;;  %v6357_v42 = vadd.f32 %v1257_v1, %v1024_v12  ;;  %1107 = vmatmul.f32.gmra.mxu2 %v671_v10  ;;  %v387_v10 = vsel %vm283_vm0, %v277_v52, 0  ;;  %v682_v1 = vand.u32 4294901760, %v681_v56  ;;  %v688_v12 = vand.u32 4294901760, %v687_v35 }
 0x112   : > { %v6370_v19 = vand.u32 4294901760, %v387_v10 }
 0x113   : > { %1358 = vmatmul.f32.gmra.mxu3 %v672_v31  ;;  %v689_v11 = vsub.f32 %v687_v35, %v688_v12 }
 0x114   : > { %v548_v14 = vpop.f32.mrf.mxu0  ;;  %v1028_v17 = vpop.f32.mrf.mxu2 }
 0x115   : > { %v832_v15 = vadd.f32 %v831_v4, %v548_v14  ;;  %v278_v4 = vmul.f32 %v6161_v40, %v6083_v30  ;;  %v279_v30 = vmul.f32 %v6170_v50, %v6092_v39  ;;  %v280_v39 = vmul.f32 %v6179_v60, %v6101_v47 }
 0x116   : > { %v6363_v13 = vpop.f32.mrf.mxu1  ;;  %v1263_v45 = vpop.f32.mrf.mxu3  ;;  %v281_v47 = vmul.f32 %v6188_v8, %v6110_v55  ;;  %v282_v55 = vmul.f32 %v6197_v23, %v6119_v63 }
 0x117   : > { %v1029_v7 = vadd.f32 %v1028_v17, %v832_v15  ;;  %675 = vmatmul.f32.gmra.mxu0 %v674_v48  ;;  %v695_v48 = vsub.f32 %v387_v10, %v6370_v19 }
 0x119   : > { %898 = vmatmul.f32.gmra.mxu1 %v6350_v24  ;;  %v6368_v31 = vadd.f32 %v1263_v45, %v1029_v7  ;;  %1112 = vmatmul.f32.gmra.mxu2 %v679_v51  ;;  %v390_v51 = vsel %vm283_vm0, %v278_v4, 0  ;;  %v696_v14 = vand.u32 4294901760, %v695_v48  ;;  %v393_v7 = vsel %vm283_vm0, %v279_v30, 0 }
 0x11a   : > { %v6381_v17 = vand.u32 4294901760, %v390_v51  ;;  %v6392_v10 = vand.u32 4294901760, %v393_v7 }
 0x11b   : > { %1364 = vmatmul.f32.gmra.mxu3 %v680_v58  ;;  %v690_v58 = vand.u32 4294901760, %v689_v11  ;;  %v697_v15 = vsub.f32 %v695_v48, %v696_v14  ;;  %v396_v11 = vsel %vm283_vm0, %v280_v39, 0 }
 0x11c   : > { %v6372_v28 = vpop.f32.mrf.mxu0  ;;  %v703_v45 = vsub.f32 %v390_v51, %v6381_v17  ;;  %v711_v4 = vsub.f32 %v393_v7, %v6392_v10 }
 0x11d   : > { %v698_v56 = vand.u32 4294901760, %v697_v15 }
 0x11e   : > { %v6376_v25 = vpop.f32.mrf.mxu1  ;;  %v712_v51 = vand.u32 4294901760, %v711_v4 }
 0x11f   : > { %683 = vmatmul.f32.gmra.mxu0 %v682_v1 }
 0x120   : > { %v713_v30 = vsub.f32 %v711_v4, %v712_v51 }
 0x121   : > { %902 = vmatmul.f32.gmra.mxu1 %v6359_v26  ;;  %1117 = vmatmul.f32.gmra.mxu2 %v687_v35  ;;  %v704_v35 = vand.u32 4294901760, %v703_v45 }
 0x122   : > { %v714_v7 = vand.u32 4294901760, %v713_v30 }
 0x123   : > { %1370 = vmatmul.f32.gmra.mxu3 %v688_v12  ;;  %v705_v12 = vsub.f32 %v703_v45, %v704_v35 }
 0x124   : > { %v6383_v52 = vpop.f32.mrf.mxu0 }
 0x126   : > { %v6387_v40 = vpop.f32.mrf.mxu1 }
 0x127   : > { %691 = vmatmul.f32.gmra.mxu0 %v690_v58  ;;  %v6403_v58 = vand.u32 4294901760, %v396_v11 }
 0x129   : > { %906 = vmatmul.f32.gmra.mxu1 %v6370_v19  ;;  %1122 = vmatmul.f32.gmra.mxu2 %v695_v48  ;;  %v706_v48 = vand.u32 4294901760, %v705_v12  ;;  %v719_v15 = vsub.f32 %v396_v11, %v6403_v58 }
 0x12b   : > { %1376 = vmatmul.f32.gmra.mxu3 %v696_v14 }
 0x12c   : > { %v6394_v1 = vpop.f32.mrf.mxu0 }
 0x12e   : > { %v6398_v50 = vpop.f32.mrf.mxu1 }
 0x12f   : > { %699 = vmatmul.f32.gmra.mxu0 %v698_v56  ;;  %v720_v56 = vand.u32 4294901760, %v719_v15 }
 0x131   : > { %910 = vmatmul.f32.gmra.mxu1 %v6381_v17  ;;  %1127 = vmatmul.f32.gmra.mxu2 %v703_v45  ;;  %v399_v45 = vsel %vm283_vm0, %v281_v47, 0  ;;  %v721_v12 = vsub.f32 %v719_v15, %v720_v56 }
 0x133   : > { %1382 = vmatmul.f32.gmra.mxu3 %v704_v35  ;;  %v6414_v35 = vand.u32 4294901760, %v399_v45 }
 0x134   : > { %v6405_v14 = vpop.f32.mrf.mxu0 }
 0x135   : > { %v727_v11 = vsub.f32 %v399_v45, %v6414_v35 }
 0x136   : > { %v6409_v60 = vpop.f32.mrf.mxu1 }
 0x137   : > { %8178 = vst [vmem:[#allocation18_spill] sm:$0xff] %v6409_v60  ;;  %707 = vmatmul.f32.gmra.mxu0 %v706_v48  ;;  %v722_v48 = vand.u32 4294901760, %v721_v12 }
 0x139   : > { %914 = vmatmul.f32.gmra.mxu1 %v6392_v10  ;;  %1132 = vmatmul.f32.gmra.mxu2 %v711_v4  ;;  %v402_v4 = vsel %vm283_vm0, %v282_v55, 0 }
 0x13a   : > { %v6425_v47 = vand.u32 4294901760, %v402_v4 }
 0x13b   : > { %1388 = vmatmul.f32.gmra.mxu3 %v712_v51  ;;  %v728_v51 = vand.u32 4294901760, %v727_v11 }
 0x13c   : > { %v6416_v39 = vpop.f32.mrf.mxu0  ;;  %v735_v23 = vsub.f32 %v402_v4, %v6425_v47 }
 0x13d   : > { %8179 = vst [vmem:[#allocation19_spill] sm:$0xff] %v6416_v39  ;;  %v729_v63 = vsub.f32 %v727_v11, %v728_v51 }
 0x13e   : > { %v6420_v8 = vpop.f32.mrf.mxu1 }
 0x13f   : > { %8180 = vst [vmem:[#allocation20_spill] sm:$0xff] %v6420_v8  ;;  %715 = vmatmul.f32.gmra.mxu0 %v714_v7  ;;  %v730_v45 = vand.u32 4294901760, %v729_v63  ;;  %v736_v7 = vand.u32 4294901760, %v735_v23 }
 0x141   : > { %918 = vmatmul.f32.gmra.mxu1 %v6403_v58  ;;  %1137 = vmatmul.f32.gmra.mxu2 %v719_v15  ;;  %v737_v55 = vsub.f32 %v735_v23, %v736_v7 }
 0x143   : > { %1394 = vmatmul.f32.gmra.mxu3 %v720_v56  ;;  %v738_v12 = vand.u32 4294901760, %v737_v55 }
 0x144   : > { %v6427_v30 = vpop.f32.mrf.mxu0 }
 0x145   : > { %8181 = vst [vmem:[#allocation21_spill] sm:$0xff] %v6427_v30 }
 0x146   : > { %v6429_v60 = vpop.f32.mrf.mxu1 }
 0x147   : > { %8182 = vst [vmem:[#allocation22_spill] sm:$0xff] %v6429_v60  ;;  %723 = vmatmul.f32.gmra.mxu0 %v722_v48 }
 0x149   : > { %922 = vmatmul.f32.gmra.mxu1 %v6414_v35  ;;  %1142 = vmatmul.f32.gmra.mxu2 %v727_v11 }
 0x14b   : > { %1400 = vmatmul.f32.gmra.mxu3 %v728_v51 }
 0x14c   : > { %v6433_v15 = vpop.f32.mrf.mxu0 }
 0x14d   : > { %8183 = vst [vmem:[#allocation23_spill] sm:$0xff] %v6433_v15 }
 0x14e   : > { %v6435_v56 = vpop.f32.mrf.mxu1 }
 0x14f   : > { %8184 = vst [vmem:[#allocation24_spill] sm:$0xff] %v6435_v56  ;;  %731 = vmatmul.f32.gmra.mxu0 %v730_v45 }
 0x151   : > { %926 = vmatmul.f32.gmra.mxu1 %v6425_v47  ;;  %1147 = vmatmul.f32.gmra.mxu2 %v735_v23 }
 0x153   : > { %1406 = vmatmul.f32.gmra.mxu3 %v736_v7 }
 0x154   : > { %v6438_v48 = vpop.f32.mrf.mxu0 }
 0x155   : > { %8185 = vst [vmem:[#allocation25_spill] sm:$0xff] %v6438_v48 }
 0x156   : > { %v6440_v4 = vpop.f32.mrf.mxu1 }
 0x157   : > { %739 = vmatmul.f32.gmra.mxu0 %v738_v12 }
 0x159   : > { %1612 = vmatmul.f32.vlgmr.msrb.gmra.mxu1 %v6071_v20 }
 0x15c   : > { %v6443_v11 = vpop.f32.mrf.mxu0 }
 0x15e   : > { %v6445_v51 = vpop.f32.mrf.mxu1 }
 0x15f   : > { %8186 = vst [vmem:[#allocation26_spill] sm:$0xff] %v6445_v51  ;;  %1433 = vmatmul.f32.vlgmr.msrb.gmra.mxu0 %v6071_v20  ;;  %v8256_v51 = vld [vmem:[#allocation17_spill] sm:$0xff] }
 0x161   : > { %1616 = vmatmul.f32.gmra.mxu1 %v6073_v21 }
 0x164   : > { %v6449_v63 = vpop.f32.mrf.mxu0 }
 0x165   : > { %8187 = vst [vmem:[#allocation27_spill] sm:$0xff] %v6449_v63 }
 0x166   : > { %v6451_v23 = vpop.f32.mrf.mxu1 }
 0x167   : > { %8188 = vst [vmem:[#allocation28_spill] sm:$0xff] %v6451_v23  ;;  %1437 = vmatmul.f32.gmra.mxu0 %v6073_v21 }
 0x169   : > { %1620 = vmatmul.f32.gmra.mxu1 %v6081_v29 }
 0x16c   : > { %v6455_v45 = vpop.f32.mrf.mxu0 }
 0x16d   : > { %8189 = vst [vmem:[#allocation29_spill] sm:$0xff] %v6455_v45 }
 0x16e   : > { %v6457_v7 = vpop.f32.mrf.mxu1 }
 0x16f   : > { %8190 = vst [vmem:[#allocation30_spill] sm:$0xff] %v6457_v7  ;;  %1441 = vmatmul.f32.gmra.mxu0 %v6081_v29 }
 0x171   : > { %1624 = vmatmul.f32.gmra.mxu1 %v6090_v38 }
 0x174   : > { %v6461_v55 = vpop.f32.mrf.mxu0 }
 0x175   : > { %8191 = vst [vmem:[#allocation31_spill] sm:$0xff] %v6461_v55 }
 0x176   : > { %v6463_v20 = vpop.f32.mrf.mxu1 }
 0x177   : > { %8192 = vst [vmem:[#allocation32_spill] sm:$0xff] %v6463_v20  ;;  %1445 = vmatmul.f32.gmra.mxu0 %v6090_v38 }
 0x179   : > { %1628 = vmatmul.f32.gmra.mxu1 %v6099_v46 }
 0x17c   : > { %v6467_v12 = vpop.f32.mrf.mxu0 }
 0x17d   : > { %8193 = vst [vmem:[#allocation33_spill] sm:$0xff] %v6467_v12 }
 0x17e   : > { %v6469_v21 = vpop.f32.mrf.mxu1 }
 0x17f   : > { %8194 = vst [vmem:[#allocation34_spill] sm:$0xff] %v6469_v21  ;;  %1449 = vmatmul.f32.gmra.mxu0 %v6099_v46 }
 0x181   : > { %1632 = vmatmul.f32.gmra.mxu1 %v6108_v54 }
 0x184   : > { %v6473_v60 = vpop.f32.mrf.mxu0 }
 0x185   : > { %8195 = vst [vmem:[#allocation35_spill] sm:$0xff] %v6473_v60 }
 0x186   : > { %v6475_v29 = vpop.f32.mrf.mxu1 }
 0x187   : > { %8196 = vst [vmem:[#allocation36_spill] sm:$0xff] %v6475_v29  ;;  %1453 = vmatmul.f32.gmra.mxu0 %v6108_v54  ;;  %v6491_v29 = vpop.f32.mrf.mxu2 }
 0x189   : > { %1636 = vmatmul.f32.gmra.mxu1 %v6117_v62 }
 0x18c   : > { %v6479_v15 = vpop.f32.mrf.mxu0 }
 0x18d   : > { %8197 = vst [vmem:[#allocation37_spill] sm:$0xff] %v6479_v15  ;;  %v6498_v15 = vpop.f32.mrf.mxu3 }
 0x18e   : > { %v6481_v38 = vpop.f32.mrf.mxu1 }
 0x18f   : > { %8198 = vst [vmem:[#allocation38_spill] sm:$0xff] %v6481_v38  ;;  %1457 = vmatmul.f32.gmra.mxu0 %v6117_v62  ;;  %v6501_v62 = vpop.f32.mrf.mxu2 }
 0x191   : > { %1640 = vmatmul.f32.gmra.mxu1 %v6132_v6 }
 0x194   : > { %v6485_v56 = vpop.f32.mrf.mxu0 }
 0x195   : > { %8199 = vst [vmem:[#allocation39_spill] sm:$0xff] %v6485_v56 }
 0x196   : > { %v6487_v46 = vpop.f32.mrf.mxu1 }
 0x197   : > { %8200 = vst [vmem:[#allocation40_spill] sm:$0xff] %v6487_v46  ;;  %1461 = vmatmul.f32.gmra.mxu0 %v6132_v6  ;;  %v6509_v6 = vpop.f32.mrf.mxu3  ;;  %v6513_v12 = vpop.f32.mrf.mxu2 }
 0x199   : > { %1644 = vmatmul.f32.gmra.mxu1 %v6141_v16 }
 0x19c   : > { %v6493_v54 = vpop.f32.mrf.mxu0 }
 0x19d   : > { %8201 = vst [vmem:[#allocation41_spill] sm:$0xff] %v6493_v54 }
 0x19e   : > { %v6495_v48 = vpop.f32.mrf.mxu1 }
 0x19f   : > { %8202 = vst [vmem:[#allocation42_spill] sm:$0xff] %v6495_v48  ;;  %1465 = vmatmul.f32.gmra.mxu0 %v6141_v16  ;;  %v6519_v21 = vpop.f32.mrf.mxu3 }
 0x1a1   : > { %1648 = vmatmul.f32.gmra.mxu1 %v6150_v27 }
 0x1a4   : > { %v6503_v38 = vpop.f32.mrf.mxu0 }
 0x1a5   : > { %8203 = vst [vmem:[#allocation43_spill] sm:$0xff] %v6503_v38 }
 0x1a6   : > { %v6505_v56 = vpop.f32.mrf.mxu1 }
 0x1a7   : > { %8204 = vst [vmem:[#allocation44_spill] sm:$0xff] %v6505_v56  ;;  %1469 = vmatmul.f32.gmra.mxu0 %v6150_v27  ;;  %v6525_v27 = vpop.f32.mrf.mxu2 }
 0x1a9   : > { %1652 = vmatmul.f32.gmra.mxu1 %v6159_v37 }
 0x1ac   : > { %v6511_v20 = vpop.f32.mrf.mxu0 }
 0x1ad   : > { %8205 = vst [vmem:[#allocation45_spill] sm:$0xff] %v6511_v20 }
 0x1ae   : > { %v6515_v16 = vpop.f32.mrf.mxu1 }
 0x1af   : > { %8206 = vst [vmem:[#allocation46_spill] sm:$0xff] %v6515_v16  ;;  %1473 = vmatmul.f32.gmra.mxu0 %v6159_v37  ;;  %v6533_v16 = vpop.f32.mrf.mxu3  ;;  %v6537_v37 = vpop.f32.mrf.mxu2 }
 0x1b0   : > { %8211 = vst [vmem:[#allocation51_spill] sm:$0xff] %v6537_v37 }
 0x1b1   : > { %1656 = vmatmul.f32.gmra.mxu1 %v6168_v49 }
 0x1b4   : > { %v6521_v60 = vpop.f32.mrf.mxu0 }
 0x1b5   : > { %8207 = vst [vmem:[#allocation47_spill] sm:$0xff] %v6521_v60 }
 0x1b6   : > { %v6523_v39 = vpop.f32.mrf.mxu1 }
 0x1b7   : > { %8208 = vst [vmem:[#allocation48_spill] sm:$0xff] %v6523_v39  ;;  %1477 = vmatmul.f32.gmra.mxu0 %v6168_v49  ;;  %v6544_v49 = vpop.f32.mrf.mxu3 }
 0x1b8   : > { %8214 = vst [vmem:[#allocation54_spill] sm:$0xff] %v6544_v49  ;;  %v225_v49 = vld [vmem:[%s8075_s1] sm:$0xff] }
 0x1b9   : > { %1660 = vmatmul.f32.gmra.mxu1 %v6177_v59 }
 0x1bc   : > { %v6529_v8 = vpop.f32.mrf.mxu0 }
 0x1bd   : > { %8209 = vst [vmem:[#allocation49_spill] sm:$0xff] %v6529_v8  ;;  %v6547_v8 = vpop.f32.mrf.mxu2 }
 0x1be   : > { %v6531_v30 = vpop.f32.mrf.mxu1  ;;  %8215 = vst [vmem:[#allocation55_spill] sm:$0xff] %v6547_v8 }
 0x1bf   : > { %8210 = vst [vmem:[#allocation50_spill] sm:$0xff] %v6531_v30  ;;  %1481 = vmatmul.f32.gmra.mxu0 %v6177_v59  ;;  %v6555_v59 = vpop.f32.mrf.mxu3 }
 0x1c0   : > { %8218 = vst [vmem:[#allocation58_spill] sm:$0xff] %v6555_v59 }
 0x1c1   : > { %1664 = vmatmul.f32.gmra.mxu1 %v6186_v5 }
 0x1c4   : > { %v6539_v60 = vpop.f32.mrf.mxu0 }
 0x1c5   : > { %8212 = vst [vmem:[#allocation52_spill] sm:$0xff] %v6539_v60 }
 0x1c6   : > { %v6541_v39 = vpop.f32.mrf.mxu1 }
 0x1c7   : > { %8213 = vst [vmem:[#allocation53_spill] sm:$0xff] %v6541_v39  ;;  %1485 = vmatmul.f32.gmra.mxu0 %v6186_v5  ;;  %v6559_v39 = vpop.f32.mrf.mxu2 }
 0x1c8   : > { %8220 = vst [vmem:[#allocation60_spill] sm:$0xff] %v6559_v39 }
 0x1c9   : > { %1668 = vmatmul.f32.gmra.mxu1 %v6195_v22 }
 0x1cc   : > { %v6549_v30 = vpop.f32.mrf.mxu0 }
 0x1cd   : > { %8216 = vst [vmem:[#allocation56_spill] sm:$0xff] %v6549_v30  ;;  %v1773_v30 = vsel %vm283_vm0, %v225_v49, 0 }
 0x1ce   : > { %v6551_v56 = vpop.f32.mrf.mxu1 }
 0x1cf   : > { %8217 = vst [vmem:[#allocation57_spill] sm:$0xff] %v6551_v56  ;;  %1489 = vmatmul.f32.gmra.mxu0 %v6195_v22  ;;  %v6567_v22 = vand.u32 4294901760, %v1773_v30  ;;  %v6569_v56 = vpop.f32.mrf.mxu3  ;;  %v6572_v39 = vpop.f32.mrf.mxu2 }
 0x1d0   : > { %8221 = vst [vmem:[#allocation61_spill] sm:$0xff] %v6569_v56 }
 0x1d1   : > { %1672 = vmatmul.f32.gmra.mxu1 %v6203_v33  ;;  %8222 = vst [vmem:[#allocation62_spill] sm:$0xff] %v6572_v39  ;;  %v6576_v20 = vsub.f32 %v1773_v30, %v6567_v22 }
 0x1d4   : > { %v6557_v60 = vpop.f32.mrf.mxu0 }
 0x1d5   : > { %8219 = vst [vmem:[#allocation59_spill] sm:$0xff] %v6557_v60 }
 0x1d6   : > { %v1613_v5 = vpop.f32.mrf.mxu1 }
 0x1d7   : > { %1493 = vmatmul.f32.gmra.mxu0 %v6203_v33  ;;  %v226_v33 = vld [vmem:[%s8075_s1 + $0x8] sm:$0xff]  ;;  %v6589_v30 = vpop.f32.mrf.mxu3 }
 0x1d8   : > { %v1776_v49 = vsel %vm283_vm0, %v226_v33, 0  ;;  %8223 = vst [vmem:[#allocation63_spill] sm:$0xff] %v6589_v30  ;;  %v6595_v33 = vpop.f32.mrf.mxu2 }
 0x1d9   : > { %1676 = vmatmul.f32.gmra.mxu1 %v6210_v44 }
 0x1dc   : > { %v1434_v59 = vpop.f32.mrf.mxu0 }
 0x1dd   : > { %v1435_v60 = vadd.f32 %v1434_v59, %v6231_v34  ;;  %v6584_v34 = vand.u32 4294901760, %v6576_v20 }
 0x1de   : > { %v1617_v37 = vpop.f32.mrf.mxu1 }
 0x1df   : > { %v1614_v8 = vadd.f32 %v1613_v5, %v1435_v60  ;;  %1497 = vmatmul.f32.gmra.mxu0 %v6210_v44  ;;  %v6587_v44 = vand.u32 4294901760, %v1776_v49  ;;  %v1799_v38 = vsub.f32 %v6576_v20, %v6584_v34 }
 0x1e0   : > { %v6615_v23 = vpop.f32.mrf.mxu2 }
 0x1e1   : > { %1680 = vmatmul.f32.gmra.mxu1 %v6217_v57  ;;  %v1794_v56 = vand.u32 4294901760, %v1614_v8  ;;  %v6598_v54 = vsub.f32 %v1776_v49, %v6587_v44  ;;  %v6610_v49 = vpop.f32.mrf.mxu3  ;;  %8225 = vst [vmem:[#allocation65_spill] sm:$0xff] %v6615_v23 }
 0x1e3   : > { %v1834_v39 = vsub.f32 %v1614_v8, %v1794_v56  ;;  %v6604_v7 = vand.u32 4294901760, %v6598_v54 }
 0x1e4   : > { %v1438_v59 = vpop.f32.mrf.mxu0 }
 0x1e5   : > { %v1439_v60 = vadd.f32 %v1438_v59, %v6240_v0  ;;  %v6600_v59 = vand.u32 4294901760, %v1799_v38  ;;  %v1835_v30 = vand.u32 4294901760, %v1834_v39 }
 0x1e6   : > { %v1621_v5 = vpop.f32.mrf.mxu1 }
 0x1e7   : > { %v1618_v48 = vadd.f32 %v1617_v37, %v1439_v60  ;;  %1501 = vmatmul.f32.gmra.mxu0 %v6217_v57  ;;  %v1836_v38 = vsub.f32 %v1834_v39, %v1835_v30 }
 0x1e9   : > { %1684 = vmatmul.f32.gmra.mxu1 %v6224_v9  ;;  %v1792_v46 = vand.u32 4294901760, %v1618_v48 }
 0x1eb   : > { %v1828_v0 = vsub.f32 %v1618_v48, %v1792_v46  ;;  %1793 = vmatpush.msrb.mxu2 %v1792_v46 }
 0x1ec   : > { %v1442_v8 = vpop.f32.mrf.mxu0 }
 0x1ed   : > { %v1443_v37 = vadd.f32 %v1442_v8, %v6249_v32  ;;  %1795 = vmatpush.msrb.mxu2 %v1794_v56  ;;  %v1829_v57 = vand.u32 4294901760, %v1828_v0  ;;  %v1807_v8 = vsub.f32 %v6598_v54, %v6604_v7 }
 0x1ee   : > { %v1625_v60 = vpop.f32.mrf.mxu1  ;;  %1801 = vmatmul.f32.vlgmr.msrb.gmra.mxu2 %v6600_v59 }
 0x1ef   : > { %1864 = vmatpush.msra.mxu2 %v1828_v0  ;;  %v6606_v55 = vadd.f32 %v1621_v5, %v1443_v37  ;;  %1505 = vmatmul.f32.gmra.mxu0 %v6224_v9  ;;  %v1830_v48 = vsub.f32 %v1828_v0, %v1829_v57  ;;  %v1837_v5 = vand.u32 4294901760, %v1836_v38 }
 0x1f1   : > { %8224 = vst [vmem:[#allocation64_spill] sm:$0xff] %v6606_v55  ;;  %1867 = vmatpush.msra.mxu2 %v1834_v39  ;;  %1688 = vmatmul.f32.gmra.mxu1 %v6233_v41  ;;  %v1831_v32 = vand.u32 4294901760, %v1830_v48  ;;  %v6618_v55 = vand.u32 4294901760, %v1807_v8 }
 0x1f3   : > { %1927 = vmatpush.msrb.mxu2 %v1829_v57  ;;  %1832 = vmatpush.msrb.mxu3 %v1831_v32  ;;  %v6628_v57 = vpop.f32.mrf.mxu2 }
 0x1f4   : > { %v1446_v9 = vpop.f32.mrf.mxu0  ;;  %8228 = vst [vmem:[#allocation68_spill] sm:$0xff] %v6628_v57 }
 0x1f5   : > { %1931 = vmatpush.msrb.mxu2 %v1835_v30  ;;  %v1447_v37 = vadd.f32 %v1446_v9, %v6258_v2  ;;  %1838 = vmatpush.msrb.mxu3 %v1837_v5  ;;  %v6626_v30 = vpop.f32.mrf.mxu3 }
 0x1f6   : > { %v1629_v0 = vpop.f32.mrf.mxu1  ;;  %1840 = vmatmul.f32.vlgmr.msrb.gmra.mxu3 %v6567_v22  ;;  %1809 = vmatmul.f32.gmra.mxu2 %v6618_v55  ;;  %8227 = vst [vmem:[#allocation67_spill] sm:$0xff] %v6626_v30 }
 0x1f7   : > { %1894 = vmatpush.msra.mxu3 %v1792_v46  ;;  %v6620_v39 = vadd.f32 %v1625_v60, %v1447_v37  ;;  %1509 = vmatmul.f32.gmra.mxu0 %v6233_v41  ;;  %v8230_v41 = vld [vmem:[#allocation2_spill] sm:$0xff] }
 0x1f9   : > { %8226 = vst [vmem:[#allocation66_spill] sm:$0xff] %v6620_v39  ;;  %1896 = vmatpush.msra.mxu3 %v1794_v56  ;;  %1692 = vmatmul.f32.gmra.mxu1 %v6242_v3 }
 0x1fb   : > { %1956 = vmatpush.msrb.mxu3 %v1792_v46  ;;  %v6640_v9 = vpop.f32.mrf.mxu2 }
 0x1fc   : > { %v1450_v2 = vpop.f32.mrf.mxu0 }
 0x1fd   : > { %1958 = vmatpush.msrb.mxu3 %v1794_v56  ;;  %v1451_v48 = vadd.f32 %v1450_v2, %v6267_v36  ;;  %v6637_v46 = vpop.f32.mrf.mxu3  ;;  %v8232_v56 = vld [vmem:[#allocation5_spill] sm:$0xff] }
 0x1fe   : > { %v1633_v60 = vpop.f32.mrf.mxu1  ;;  %1844 = vmatmul.f32.gmra.mxu3 %v6587_v44  ;;  %1870 = vmatmul.f32.vlgmr.msra.gmra.mxu2 %v6576_v20  ;;  %8231 = vst [vmem:[#allocation2_spill] sm:$0xff] %v6637_v46 }
 0x1ff   : > { %v6631_v38 = vadd.f32 %v1629_v0, %v1451_v48  ;;  %1513 = vmatmul.f32.gmra.mxu0 %v6242_v3  ;;  %8233 = vst [vmem:[#allocation5_spill] sm:$0xff] %v6640_v9  ;;  %v8235_v3 = vld [vmem:[#allocation3_spill] sm:$0xff] }
 0x200   : > { %v8236_v0 = vld [vmem:[#allocation7_spill] sm:$0xff] }
 0x201   : > { %8229 = vst [vmem:[#allocation69_spill] sm:$0xff] %v6631_v38  ;;  %1696 = vmatmul.f32.gmra.mxu1 %v8230_v41 }
 0x204   : > { %v1454_v32 = vpop.f32.mrf.mxu0 }
 0x205   : > { %v1455_v8 = vadd.f32 %v1454_v32, %v8232_v56  ;;  %v6649_v39 = vpop.f32.mrf.mxu3 }
 0x206   : > { %v1637_v5 = vpop.f32.mrf.mxu1  ;;  %1900 = vmatmul.f32.vlgmr.msra.gmra.mxu3 %v6584_v34  ;;  %1875 = vmatmul.f32.gmra.mxu2 %v6598_v54  ;;  %8237 = vst [vmem:[#allocation3_spill] sm:$0xff] %v6649_v39 }
 0x207   : > { %v6642_v36 = vadd.f32 %v1633_v60, %v1455_v8  ;;  %1517 = vmatmul.f32.gmra.mxu0 %v8230_v41  ;;  %v8239_v60 = vld [vmem:[#allocation4_spill] sm:$0xff]  ;;  %v6656_v41 = vpop.f32.mrf.mxu2  ;;  %v8241_v8 = vld [vmem:[#allocation9_spill] sm:$0xff] }
 0x208   : > { %8240 = vst [vmem:[#allocation4_spill] sm:$0xff] %v6656_v41 }
 0x209   : > { %8234 = vst [vmem:[#allocation70_spill] sm:$0xff] %v6642_v36  ;;  %1700 = vmatmul.f32.gmra.mxu1 %v8235_v3 }
 0x20c   : > { %v1458_v37 = vpop.f32.mrf.mxu0 }
 0x20d   : > { %v1459_v2 = vadd.f32 %v1458_v37, %v8236_v0 }
 0x20e   : > { %v1641_v48 = vpop.f32.mrf.mxu1  ;;  %1906 = vmatmul.f32.gmra.mxu3 %v6604_v7  ;;  %1933 = vmatmul.f32.vlgmr.msrb.gmra.mxu2 %v6567_v22 }
 0x20f   : > { %v6651_v32 = vadd.f32 %v1637_v5, %v1459_v2  ;;  %1521 = vmatmul.f32.gmra.mxu0 %v8235_v3  ;;  %v6664_v5 = vpop.f32.mrf.mxu3  ;;  %v8244_v3 = vld [vmem:[#allocation6_spill] sm:$0xff]  ;;  %v6668_v0 = vpop.f32.mrf.mxu2 }
 0x210   : > { %8243 = vst [vmem:[#allocation71_spill] sm:$0xff] %v6664_v5  ;;  %v8250_v5 = vld [vmem:[#allocation13_spill] sm:$0xff] }
 0x211   : > { %8238 = vst [vmem:[#allocation7_spill] sm:$0xff] %v6651_v32  ;;  %1704 = vmatmul.f32.gmra.mxu1 %v8239_v60  ;;  %v8246_v32 = vld [vmem:[#allocation11_spill] sm:$0xff] }
 0x212   : > { %8245 = vst [vmem:[#allocation6_spill] sm:$0xff] %v6668_v0 }
 0x214   : > { %v1462_v56 = vpop.f32.mrf.mxu0 }
 0x215   : > { %v1463_v38 = vadd.f32 %v1462_v56, %v8241_v8 }
 0x216   : > { %v1645_v36 = vpop.f32.mrf.mxu1  ;;  %1960 = vmatmul.f32.vlgmr.msrb.gmra.mxu3 %v6567_v22  ;;  %1937 = vmatmul.f32.gmra.mxu2 %v6587_v44 }
 0x217   : > { %v6660_v37 = vadd.f32 %v1641_v48, %v1463_v38  ;;  %1525 = vmatmul.f32.gmra.mxu0 %v8239_v60  ;;  %v8247_v38 = vld [vmem:[#allocation8_spill] sm:$0xff]  ;;  %v6674_v48 = vpop.f32.mrf.mxu3 }
 0x218   : > { %8248 = vst [vmem:[#allocation11_spill] sm:$0xff] %v6674_v48 }
 0x219   : > { %8242 = vst [vmem:[#allocation9_spill] sm:$0xff] %v6660_v37  ;;  %1708 = vmatmul.f32.gmra.mxu1 %v8244_v3  ;;  %v6676_v37 = vpop.f32.mrf.mxu2 }
 0x21a   : > { %8249 = vst [vmem:[#allocation8_spill] sm:$0xff] %v6676_v37 }
 0x21c   : > { %v1466_v2 = vpop.f32.mrf.mxu0 }
 0x21d   : > { %v1467_v41 = vadd.f32 %v1466_v2, %v8246_v32 }
 0x21e   : > { %v1649_v39 = vpop.f32.mrf.mxu1  ;;  %1964 = vmatmul.f32.gmra.mxu3 %v6587_v44 }
 0x21f   : > { %v1646_v56 = vadd.f32 %v1645_v36, %v1467_v41  ;;  %1529 = vmatmul.f32.gmra.mxu0 %v8244_v3  ;;  %v8251_v36 = vld [vmem:[#allocation10_spill] sm:$0xff]  ;;  %v6681_v2 = vpop.f32.mrf.mxu3 }
 0x220   : > { %8252 = vst [vmem:[#allocation13_spill] sm:$0xff] %v6681_v2 }
 0x221   : > { %1712 = vmatmul.f32.gmra.mxu1 %v8247_v38  ;;  %v1984_v60 = vand.u32 4294901760, %v1646_v56  ;;  %v6683_v37 = vpop.f32.mrf.mxu2 }
 0x222   : > { %8253 = vst [vmem:[#allocation10_spill] sm:$0xff] %v6683_v37 }
 0x223   : > { %v2024_v46 = vsub.f32 %v1646_v56, %v1984_v60 }
 0x224   : > { %v1470_v8 = vpop.f32.mrf.mxu0 }
 0x225   : > { %v1471_v9 = vadd.f32 %v1470_v8, %v8250_v5  ;;  %v2025_v3 = vand.u32 4294901760, %v2024_v46  ;;  %v8254_v5 = vld [vmem:[#allocation15_spill] sm:$0xff] }
 0x226   : > { %v1653_v0 = vpop.f32.mrf.mxu1 }
 0x227   : > { %v1650_v57 = vadd.f32 %v1649_v39, %v1471_v9  ;;  %1533 = vmatmul.f32.gmra.mxu0 %v8247_v38  ;;  %v2026_v9 = vsub.f32 %v2024_v46, %v2025_v3  ;;  %v6690_v63 = vpop.f32.mrf.mxu3 }
 0x228   : > { %8257 = vst [vmem:[#allocation15_spill] sm:$0xff] %v6690_v63 }
 0x229   : > { %1716 = vmatmul.f32.gmra.mxu1 %v8251_v36  ;;  %v1982_v32 = vand.u32 4294901760, %v1650_v57  ;;  %v2027_v8 = vand.u32 4294901760, %v2026_v9  ;;  %v8259_v9 = vld [vmem:[#allocation16_spill] sm:$0xff] }
 0x22b   : > { %v2018_v41 = vsub.f32 %v1650_v57, %v1982_v32  ;;  %1983 = vmatpush.msra.mxu2 %v1982_v32  ;;  %v8255_v57 = vld [vmem:[#allocation12_spill] sm:$0xff] }
 0x22c   : > { %v1474_v48 = vpop.f32.mrf.mxu0 }
 0x22d   : > { %1985 = vmatpush.msra.mxu2 %v1984_v60  ;;  %v2019_v45 = vand.u32 4294901760, %v2018_v41  ;;  %v1475_v56 = vadd.f32 %v1474_v48, %v8254_v5  ;;  %v6697_v48 = vpop.f32.mrf.mxu2 }
 0x22e   : > { %v1657_v30 = vpop.f32.mrf.mxu1  ;;  %1991 = vmatmul.f32.vlgmr.msra.gmra.mxu2 %v6600_v59 }
 0x22f   : > { %2054 = vmatpush.msrb.mxu2 %v2018_v41  ;;  %1537 = vmatmul.f32.gmra.mxu0 %v8251_v36  ;;  %v2020_v39 = vsub.f32 %v2018_v41, %v2019_v45  ;;  %v1654_v2 = vadd.f32 %v1653_v0, %v1475_v56 }
 0x231   : > { %2057 = vmatpush.msrb.mxu2 %v2024_v46  ;;  %1720 = vmatmul.f32.gmra.mxu1 %v8255_v57  ;;  %v2021_v38 = vand.u32 4294901760, %v2020_v39  ;;  %v6694_v46 = vand.u32 4294901760, %v1654_v2 }
 0x233   : > { %2117 = vmatpush.msra.mxu2 %v2019_v45  ;;  %2022 = vmatpush.msra.mxu3 %v2021_v38  ;;  %v8258_v45 = vld [vmem:[#allocation14_spill] sm:$0xff] }
 0x234   : > { %v1478_v23 = vpop.f32.mrf.mxu0 }
 0x235   : > { %2121 = vmatpush.msra.mxu2 %v2025_v3  ;;  %v1479_v37 = vadd.f32 %v1478_v23, %v8256_v51  ;;  %2028 = vmatpush.msra.mxu3 %v2027_v8  ;;  %v6707_v23 = vsub.f32 %v1654_v2, %v6694_v46 }
 0x236   : > { %v1661_v36 = vpop.f32.mrf.mxu1  ;;  %2030 = vmatmul.f32.vlgmr.msra.gmra.mxu3 %v6567_v22  ;;  %1999 = vmatmul.f32.gmra.mxu2 %v6618_v55 }
 0x237   : > { %2084 = vmatpush.msrb.mxu3 %v1982_v32  ;;  %v1658_v41 = vadd.f32 %v1657_v30, %v1479_v37  ;;  %1541 = vmatmul.f32.gmra.mxu0 %v8255_v57  ;;  %v8103_v2 = vand.u32 4294901760, %v6707_v23 }
 0x239   : > { %2086 = vmatpush.msrb.mxu3 %v1984_v60  ;;  %1724 = vmatmul.f32.gmra.mxu1 %v8258_v45  ;;  %v6699_v0 = vand.u32 4294901760, %v1658_v41 }
 0x23b   : > { %2146 = vmatpush.msra.mxu3 %v1982_v32  ;;  %v6703_v51 = vsub.f32 %v1658_v41, %v6699_v0  ;;  %3172 = vmatpush.msra.mxu1 %v6699_v0 }
 0x23c   : > { %v1482_v30 = vpop.f32.mrf.mxu0 }
 0x23d   : > { %2148 = vmatpush.msra.mxu3 %v1984_v60  ;;  %v1483_v37 = vadd.f32 %v1482_v30, %v6339_v18  ;;  %3174 = vmatpush.msra.mxu1 %v6694_v46  ;;  %v8104_v3 = vand.u32 4294901760, %v6703_v51  ;;  %v6716_v60 = vpop.f32.mrf.mxu3  ;;  %v6725_v18 = vpop.f32.mrf.mxu2 }
 0x23e   : > { %v1665_v39 = vpop.f32.mrf.mxu1  ;;  %2034 = vmatmul.f32.gmra.mxu3 %v6587_v44  ;;  %2060 = vmatmul.f32.vlgmr.msrb.gmra.mxu2 %v6576_v20 }
 0x23f   : > { %v6712_v32 = vadd.f32 %v1661_v36, %v1483_v37  ;;  %1545 = vmatmul.f32.gmra.mxu0 %v8258_v45  ;;  %v836_v37 = vadd.f32 %v6363_v13, %v6372_v28 }
 0x240   : > { %3143 = vmatpush.msra.mxu0 %v8104_v3 }
 0x241   : > { %1728 = vmatmul.f32.gmra.mxu1 %v8259_v9 }
 0x242   : > { %3147 = vmatpush.msra.mxu0 %v8103_v2 }
 0x244   : > { %v1486_v5 = vpop.f32.mrf.mxu0 }
 0x245   : > { %v1487_v56 = vadd.f32 %v1486_v5, %v6348_v61  ;;  %v6734_v8 = vpop.f32.mrf.mxu3  ;;  %v6736_v41 = vpop.f32.mrf.mxu2 }
 0x246   : > { %v1669_v57 = vpop.f32.mrf.mxu1  ;;  %2090 = vmatmul.f32.vlgmr.msrb.gmra.mxu3 %v6584_v34  ;;  %2065 = vmatmul.f32.gmra.mxu2 %v6598_v54 }
 0x247   : > { %v6728_v38 = vadd.f32 %v1665_v39, %v1487_v56  ;;  %1549 = vmatmul.f32.gmra.mxu0 %v8259_v9  ;;  %v1034_v56 = vadd.f32 %v6491_v29, %v836_v37 }
 0x249   : > { %1732 = vmatmul.f32.gmra.mxu1 %v6332_v53  ;;  %v1270_v13 = vadd.f32 %v6498_v15, %v1034_v56 }
 0x24c   : > { %v1490_v36 = vpop.f32.mrf.mxu0 }
 0x24d   : > { %v1491_v45 = vadd.f32 %v1490_v36, %v6357_v42  ;;  %v6747_v39 = vpop.f32.mrf.mxu3 }
 0x24e   : > { %v1673_v30 = vpop.f32.mrf.mxu1  ;;  %2096 = vmatmul.f32.gmra.mxu3 %v6604_v7  ;;  %2123 = vmatmul.f32.vlgmr.msra.gmra.mxu2 %v6567_v22 }
 0x24f   : > { %v6739_v61 = vadd.f32 %v1669_v57, %v1491_v45  ;;  %1553 = vmatmul.f32.gmra.mxu0 %v6332_v53  ;;  %v6751_v57 = vpop.f32.mrf.mxu2 }
 0x251   : > { %8260 = vst [vmem:[#allocation12_spill] sm:$0xff] %v6739_v61  ;;  %1736 = vmatmul.f32.gmra.mxu1 %v6341_v43 }
 0x254   : > { %v1494_v9 = vpop.f32.mrf.mxu0 }
 0x255   : > { %v1495_v5 = vadd.f32 %v1494_v9, %v6368_v31  ;;  %v840_v31 = vadd.f32 %v6376_v25, %v6383_v52  ;;  %v6762_v45 = vpop.f32.mrf.mxu3 }
 0x256   : > { %v1677_v42 = vpop.f32.mrf.mxu1  ;;  %2150 = vmatmul.f32.vlgmr.msra.gmra.mxu3 %v6567_v22  ;;  %2127 = vmatmul.f32.gmra.mxu2 %v6587_v44 }
 0x257   : > { %v6753_v53 = vadd.f32 %v1673_v30, %v1495_v5  ;;  %1557 = vmatmul.f32.gmra.mxu0 %v6341_v43  ;;  %v1039_v30 = vadd.f32 %v6501_v62, %v840_v31  ;;  %v6768_v43 = vpop.f32.mrf.mxu2  ;;  %v844_v62 = vadd.f32 %v6387_v40, %v6394_v1  ;;  %v848_v31 = vadd.f32 %v6398_v50, %v6405_v14 }
 0x259   : > { %8261 = vst [vmem:[#allocation17_spill] sm:$0xff] %v6753_v53  ;;  %1740 = vmatmul.f32.gmra.mxu1 %v6350_v24  ;;  %v1276_v15 = vadd.f32 %v6509_v6, %v1039_v30  ;;  %v1049_v40 = vadd.f32 %v6525_v27, %v848_v31 }
 0x25c   : > { %v1498_v28 = vpop.f32.mrf.mxu0 }
 0x25d   : > { %v1499_v36 = vadd.f32 %v1498_v28, %v1270_v13 }
 0x25e   : > { %v1681_v29 = vpop.f32.mrf.mxu1  ;;  %2154 = vmatmul.f32.gmra.mxu3 %v6587_v44 }
 0x25f   : > { %v1678_v37 = vadd.f32 %v1677_v42, %v1499_v36  ;;  %1561 = vmatmul.f32.gmra.mxu0 %v6350_v24  ;;  %v6774_v24 = vpop.f32.mrf.mxu3  ;;  %v6779_v6 = vpop.f32.mrf.mxu2 }
 0x261   : > { %1744 = vmatmul.f32.gmra.mxu1 %v6359_v26  ;;  %v2174_v9 = vand.u32 4294901760, %v1678_v37 }
 0x263   : > { %v2214_v56 = vsub.f32 %v1678_v37, %v2174_v9 }
 0x264   : > { %v1502_v25 = vpop.f32.mrf.mxu0 }
 0x265   : > { %v1503_v52 = vadd.f32 %v1502_v25, %v1276_v15  ;;  %v2215_v36 = vand.u32 4294901760, %v2214_v56 }
 0x266   : > { %v1685_v5 = vpop.f32.mrf.mxu1 }
 0x267   : > { %v1682_v13 = vadd.f32 %v1681_v29, %v1503_v52  ;;  %1565 = vmatmul.f32.gmra.mxu0 %v6359_v26  ;;  %v1044_v29 = vadd.f32 %v6513_v12, %v844_v62  ;;  %v2216_v50 = vsub.f32 %v2214_v56, %v2215_v36  ;;  %v6787_v15 = vpop.f32.mrf.mxu3  ;;  %v1288_v52 = vadd.f32 %v6533_v16, %v1049_v40 }
 0x269   : > { %1748 = vmatmul.f32.gmra.mxu1 %v6370_v19  ;;  %v2172_v42 = vand.u32 4294901760, %v1682_v13  ;;  %v1282_v14 = vadd.f32 %v6519_v21, %v1044_v29  ;;  %v2217_v27 = vand.u32 4294901760, %v2216_v50 }
 0x26b   : > { %v2208_v28 = vsub.f32 %v1682_v13, %v2172_v42  ;;  %2173 = vmatpush.msrb.mxu2 %v2172_v42  ;;  %v6790_v13 = vpop.f32.mrf.mxu2 }
 0x26c   : > { %v1506_v30 = vpop.f32.mrf.mxu0  ;;  %8262 = vst [vmem:[#allocation14_spill] sm:$0xff] %v6790_v13 }
 0x26d   : > { %2175 = vmatpush.msrb.mxu2 %v2174_v9  ;;  %v2209_v26 = vand.u32 4294901760, %v2208_v28  ;;  %v1507_v25 = vadd.f32 %v1506_v30, %v1282_v14  ;;  %v868_v14 = vadd.f32 %v6440_v4, %v6443_v11 }
 0x26e   : > { %v1689_v37 = vpop.f32.mrf.mxu1  ;;  %2181 = vmatmul.f32.vlgmr.msrb.gmra.mxu2 %v6600_v59 }
 0x26f   : > { %2244 = vmatpush.msra.mxu2 %v2208_v28  ;;  %1569 = vmatmul.f32.gmra.mxu0 %v6370_v19  ;;  %v2210_v1 = vsub.f32 %v2208_v28, %v2209_v26  ;;  %v1686_v21 = vadd.f32 %v1685_v5, %v1507_v25  ;;  %v6806_v5 = vpop.f32.mrf.mxu3 }
 0x270   : > { %8263 = vst [vmem:[#allocation16_spill] sm:$0xff] %v6806_v5  ;;  %v8277_v5 = vld [vmem:[#allocation29_spill] sm:$0xff] }
 0x271   : > { %2247 = vmatpush.msra.mxu2 %v2214_v56  ;;  %1752 = vmatmul.f32.gmra.mxu1 %v6381_v17  ;;  %v2211_v12 = vand.u32 4294901760, %v2210_v1  ;;  %v6800_v28 = vand.u32 4294901760, %v1686_v21 }
 0x273   : > { %2307 = vmatpush.msrb.mxu2 %v2209_v26  ;;  %2212 = vmatpush.msrb.mxu3 %v2211_v12  ;;  %v6817_v30 = vpop.f32.mrf.mxu2 }
 0x274   : > { %v1510_v19 = vpop.f32.mrf.mxu0  ;;  %8264 = vst [vmem:[#allocation72_spill] sm:$0xff] %v6817_v30 }
 0x275   : > { %2311 = vmatpush.msrb.mxu2 %v2215_v36  ;;  %v1511_v62 = vadd.f32 %v1510_v19, %v1288_v52  ;;  %2218 = vmatpush.msrb.mxu3 %v2217_v27  ;;  %v1074_v52 = vadd.f32 %v6595_v33, %v868_v14  ;;  %v8272_v19 = vld [vmem:[#allocation27_spill] sm:$0xff]  ;;  %v8274_v14 = vld [vmem:[#allocation65_spill] sm:$0xff] }
 0x276   : > { %v6792_v31 = vpop.f32.mrf.mxu1  ;;  %2220 = vmatmul.f32.vlgmr.msrb.gmra.mxu3 %v6567_v22  ;;  %2189 = vmatmul.f32.gmra.mxu2 %v6618_v55 }
 0x277   : > { %2274 = vmatpush.msra.mxu3 %v2172_v42  ;;  %v1690_v56 = vadd.f32 %v1689_v37, %v1511_v62  ;;  %1573 = vmatmul.f32.gmra.mxu0 %v6381_v17  ;;  %v6828_v37 = vpop.f32.mrf.mxu3  ;;  %v1318_v27 = vadd.f32 %v6610_v49, %v1074_v52  ;;  %v8273_v62 = vld [vmem:[#allocation26_spill] sm:$0xff]  ;;  %v8276_v49 = vld [vmem:[#allocation67_spill] sm:$0xff] }
 0x278   : > { %8266 = vst [vmem:[#allocation74_spill] sm:$0xff] %v6828_v37  ;;  %v872_v4 = vadd.f32 %v8273_v62, %v8272_v19  ;;  %v8278_v19 = vld [vmem:[#allocation28_spill] sm:$0xff] }
 0x279   : > { %2276 = vmatpush.msra.mxu3 %v2174_v9  ;;  %1756 = vmatmul.f32.gmra.mxu1 %v6392_v10  ;;  %v6797_v16 = vand.u32 4294901760, %v1690_v56  ;;  %v876_v62 = vadd.f32 %v8278_v19, %v8277_v5 }
 0x27b   : > { %2336 = vmatpush.msrb.mxu3 %v2172_v42  ;;  %v6803_v36 = vsub.f32 %v1690_v56, %v6797_v16  ;;  %3300 = vmatpush.msrb.mxu1 %v6797_v16  ;;  %v6815_v42 = vsub.f32 %v1686_v21, %v6800_v28  ;;  %v6832_v40 = vpop.f32.mrf.mxu2 }
 0x27c   : > { %v6808_v17 = vpop.f32.mrf.mxu0 }
 0x27d   : > { %2338 = vmatpush.msrb.mxu3 %v2174_v9  ;;  %3270 = vmatpush.msrb.mxu0 %v6803_v36 }
 0x27e   : > { %3302 = vmatpush.msrb.mxu1 %v6800_v28  ;;  %v6812_v29 = vpop.f32.mrf.mxu1  ;;  %2224 = vmatmul.f32.gmra.mxu3 %v6587_v44 }
 0x27f   : > { %1577 = vmatmul.f32.gmra.mxu0 %v6392_v10  ;;  %2250 = vmatmul.f32.vlgmr.msra.gmra.mxu2 %v6576_v20  ;;  %v6840_v50 = vpop.f32.mrf.mxu3 }
 0x280   : > { %3273 = vmatpush.msrb.mxu0 %v6815_v42 }
 0x281   : > { %1760 = vmatmul.f32.gmra.mxu1 %v6403_v58 }
 0x284   : > { %v6824_v9 = vpop.f32.mrf.mxu0 }
 0x286   : > { %v6826_v26 = vpop.f32.mrf.mxu1  ;;  %2280 = vmatmul.f32.vlgmr.msra.gmra.mxu3 %v6584_v34 }
 0x287   : > { %8265 = vst [vmem:[#allocation73_spill] sm:$0xff] %v6826_v26  ;;  %1581 = vmatmul.f32.gmra.mxu0 %v6403_v58  ;;  %2255 = vmatmul.f32.gmra.mxu2 %v6598_v54  ;;  %v6846_v58 = vpop.f32.mrf.mxu2 }
 0x288   : > { %8269 = vst [vmem:[#allocation77_spill] sm:$0xff] %v6846_v58 }
 0x289   : > { %1764 = vmatmul.f32.gmra.mxu1 %v6414_v35 }
 0x28c   : > { %v6836_v10 = vpop.f32.mrf.mxu0 }
 0x28d   : > { %8267 = vst [vmem:[#allocation75_spill] sm:$0xff] %v6836_v10  ;;  %v8283_v10 = vld [vmem:[#allocation2_spill] sm:$0xff] }
 0x28e   : > { %v6838_v1 = vpop.f32.mrf.mxu1  ;;  %2286 = vmatmul.f32.gmra.mxu3 %v6604_v7 }
 0x28f   : > { %8268 = vst [vmem:[#allocation76_spill] sm:$0xff] %v6838_v1  ;;  %1585 = vmatmul.f32.gmra.mxu0 %v6414_v35  ;;  %2313 = vmatmul.f32.vlgmr.msrb.gmra.mxu2 %v6567_v22  ;;  %v6856_v35 = vpop.f32.mrf.mxu3  ;;  %v6862_v11 = vpop.f32.mrf.mxu2  ;;  %v8281_v1 = vld [vmem:[#allocation31_spill] sm:$0xff] }
 0x290   : > { %8271 = vst [vmem:[#allocation79_spill] sm:$0xff] %v6856_v35 }
 0x291   : > { %1768 = vmatmul.f32.gmra.mxu1 %v6425_v47 }
 0x294   : > { %v6850_v12 = vpop.f32.mrf.mxu0 }
 0x295   : > { %8270 = vst [vmem:[#allocation78_spill] sm:$0xff] %v6850_v12 }
 0x296   : > { %v1709_v25 = vpop.f32.mrf.mxu1  ;;  %2340 = vmatmul.f32.vlgmr.msrb.gmra.mxu3 %v6567_v22 }
 0x297   : > { %1589 = vmatmul.f32.gmra.mxu0 %v6425_v47  ;;  %2317 = vmatmul.f32.gmra.mxu2 %v6587_v44  ;;  %v1079_v47 = vadd.f32 %v8274_v14, %v872_v4  ;;  %v6868_v3 = vpop.f32.mrf.mxu3  ;;  %v6873_v30 = vpop.f32.mrf.mxu2 }
 0x298   : > { %8275 = vst [vmem:[#allocation27_spill] sm:$0xff] %v6868_v3 }
 0x299   : > { %3176 = vmatmul.f32.vlgmr.msra.gmra.mxu1 %v6567_v22  ;;  %v1324_v52 = vadd.f32 %v8276_v49, %v1079_v47  ;;  %8279 = vst [vmem:[#allocation26_spill] sm:$0xff] %v6873_v30  ;;  %v8282_v47 = vld [vmem:[#allocation30_spill] sm:$0xff] }
 0x29a   : > { %v880_v49 = vadd.f32 %v8282_v47, %v8281_v1 }
 0x29c   : > { %v1530_v21 = vpop.f32.mrf.mxu0 }
 0x29d   : > { %v1531_v56 = vadd.f32 %v1530_v21, %v1318_v27 }
 0x29e   : > { %v1713_v33 = vpop.f32.mrf.mxu1  ;;  %2344 = vmatmul.f32.gmra.mxu3 %v6587_v44 }
 0x29f   : > { %v1710_v2 = vadd.f32 %v1709_v25, %v1531_v56  ;;  %3149 = vmatmul.f32.vlgmr.msra.gmra.mxu0 %v6567_v22  ;;  %v8280_v25 = vld [vmem:[#allocation68_spill] sm:$0xff]  ;;  %v6881_v12 = vpop.f32.mrf.mxu3 }
 0x2a0   : > { %v1084_v4 = vadd.f32 %v8280_v25, %v876_v62  ;;  %8284 = vst [vmem:[#allocation65_spill] sm:$0xff] %v6881_v12  ;;  %v8285_v62 = vld [vmem:[#allocation5_spill] sm:$0xff] }
 0x2a1   : > { %3180 = vmatmul.f32.gmra.mxu1 %v6587_v44  ;;  %v2364_v37 = vand.u32 4294901760, %v1710_v2 }
 0x2a2   : > { %v1330_v5 = vadd.f32 %v8283_v10, %v1084_v4  ;;  %v6886_v10 = vpop.f32.mrf.mxu2 }
 0x2a3   : > { %v2404_v56 = vsub.f32 %v1710_v2, %v2364_v37  ;;  %8286 = vst [vmem:[#allocation67_spill] sm:$0xff] %v6886_v10 }
 0x2a4   : > { %v1534_v13 = vpop.f32.mrf.mxu0 }
 0x2a5   : > { %v1535_v27 = vadd.f32 %v1534_v13, %v1324_v52  ;;  %v2405_v13 = vand.u32 4294901760, %v2404_v56 }
 0x2a6   : > { %v1717_v21 = vpop.f32.mrf.mxu1 }
 0x2a7   : > { %v1714_v14 = vadd.f32 %v1713_v33, %v1535_v27  ;;  %3153 = vmatmul.f32.gmra.mxu0 %v6587_v44  ;;  %v1089_v27 = vadd.f32 %v8285_v62, %v880_v49  ;;  %v2406_v1 = vsub.f32 %v2404_v56, %v2405_v13 }
 0x2a9   : > { %3306 = vmatmul.f32.vlgmr.msrb.gmra.mxu1 %v6584_v34  ;;  %v2362_v26 = vand.u32 4294901760, %v1714_v14 }
 0x2ab   : > { %v2398_v19 = vsub.f32 %v1714_v14, %v2362_v26  ;;  %2363 = vmatpush.msra.mxu2 %v2362_v26  ;;  %v8287_v14 = vld [vmem:[#allocation3_spill] sm:$0xff] }
 0x2ac   : > { %v1538_v52 = vpop.f32.mrf.mxu0  ;;  %v1336_v47 = vadd.f32 %v8287_v14, %v1089_v27 }
 0x2ad   : > { %v1539_v63 = vadd.f32 %v1538_v52, %v1330_v5  ;;  %2365 = vmatpush.msra.mxu2 %v2364_v37  ;;  %v2399_v2 = vand.u32 4294901760, %v2398_v19  ;;  %v6894_v52 = vpop.f32.mrf.mxu3 }
 0x2ae   : > { %v1721_v33 = vpop.f32.mrf.mxu1  ;;  %2371 = vmatmul.f32.vlgmr.msra.gmra.mxu2 %v6600_v59  ;;  %8289 = vst [vmem:[#allocation28_spill] sm:$0xff] %v6894_v52 }
 0x2af   : > { %2434 = vmatpush.msrb.mxu2 %v2398_v19  ;;  %v1718_v25 = vadd.f32 %v1717_v21, %v1539_v63  ;;  %v2400_v61 = vsub.f32 %v2398_v19, %v2399_v2  ;;  %3276 = vmatmul.f32.vlgmr.msrb.gmra.mxu0 %v6576_v20  ;;  %v2407_v63 = vand.u32 4294901760, %v2406_v1 }
 0x2b1   : > { %2437 = vmatpush.msrb.mxu2 %v2404_v56  ;;  %3312 = vmatmul.f32.gmra.mxu1 %v6604_v7  ;;  %v2401_v4 = vand.u32 4294901760, %v2400_v61  ;;  %v6890_v5 = vand.u32 4294901760, %v1718_v25 }
 0x2b3   : > { %2497 = vmatpush.msra.mxu2 %v2399_v2  ;;  %8288 = vst [vmem:[#allocation29_spill] sm:$0xff] %v6890_v5  ;;  %2402 = vmatpush.msra.mxu3 %v2401_v4  ;;  %v6897_v56 = vsub.f32 %v1718_v25, %v6890_v5 }
 0x2b4   : > { %v1542_v21 = vpop.f32.mrf.mxu0 }
 0x2b5   : > { %2501 = vmatpush.msra.mxu2 %v2405_v13  ;;  %v1543_v49 = vadd.f32 %v1542_v21, %v1336_v47  ;;  %2408 = vmatpush.msra.mxu3 %v2407_v63  ;;  %8290 = vst [vmem:[#allocation68_spill] sm:$0xff] %v6897_v56  ;;  %v6904_v13 = vpop.f32.mrf.mxu2 }
 0x2b6   : > { %v6892_v19 = vpop.f32.mrf.mxu1  ;;  %2410 = vmatmul.f32.vlgmr.msra.gmra.mxu3 %v6567_v22  ;;  %2379 = vmatmul.f32.gmra.mxu2 %v6618_v55  ;;  %8292 = vst [vmem:[#allocation30_spill] sm:$0xff] %v6904_v13 }
 0x2b7   : > { %2464 = vmatpush.msrb.mxu3 %v2362_v26  ;;  %v1722_v2 = vadd.f32 %v1721_v33, %v1543_v49  ;;  %3281 = vmatmul.f32.gmra.mxu0 %v6598_v54  ;;  %v3431_v33 = vand.u32 4294901760, %v6897_v56 }
 0x2b9   : > { %2466 = vmatpush.msrb.mxu3 %v2364_v37  ;;  %v6902_v61 = vand.u32 4294901760, %v1722_v2  ;;  %v3432_v4 = vsub.f32 %v6897_v56, %v3431_v33 }
 0x2bb   : > { %8291 = vst [vmem:[#allocation31_spill] sm:$0xff] %v6902_v61  ;;  %2526 = vmatpush.msra.mxu3 %v2362_v26  ;;  %v6907_v62 = vsub.f32 %v1722_v2, %v6902_v61  ;;  %3389 = vmatpush.msra.mxu0 %v6902_v61  ;;  %v3433_v47 = vand.u32 4294901760, %v3432_v4  ;;  %v8298_v4 = vld [vmem:[#allocation41_spill] sm:$0xff] }
 0x2bc   : > { %v6911_v27 = vpop.f32.mrf.mxu0 }
 0x2bd   : > { %8293 = vst [vmem:[#allocation2_spill] sm:$0xff] %v6907_v62  ;;  %2528 = vmatpush.msra.mxu3 %v2364_v37  ;;  %3391 = vmatpush.msra.mxu0 %v6890_v5  ;;  %v3425_v25 = vand.u32 4294901760, %v6907_v62  ;;  %v6922_v37 = vpop.f32.mrf.mxu3  ;;  %v6924_v63 = vpop.f32.mrf.mxu2 }
 0x2be   : > { %v6915_v1 = vpop.f32.mrf.mxu1  ;;  %2414 = vmatmul.f32.gmra.mxu3 %v6587_v44  ;;  %2440 = vmatmul.f32.vlgmr.msrb.gmra.mxu2 %v6576_v20  ;;  %8294 = vst [vmem:[#allocation5_spill] sm:$0xff] %v6922_v37 }
 0x2bf   : > { %3523 = vmatpush.msrb.mxu0 %v3425_v25  ;;  %v3426_v26 = vsub.f32 %v6907_v62, %v3425_v25 }
 0x2c0   : > { %3397 = vmatmul.f32.vlgmr.msra.gmra.mxu0 %v6600_v59 }
 0x2c1   : > { %3527 = vmatpush.msrb.mxu0 %v3431_v33  ;;  %v3427_v14 = vand.u32 4294901760, %v3426_v26 }
 0x2c3   : > { %3428 = vmatpush.msra.mxu1 %v3427_v14  ;;  %v8299_v14 = vld [vmem:[#allocation40_spill] sm:$0xff] }
 0x2c4   : > { %v6926_v21 = vpop.f32.mrf.mxu0 }
 0x2c5   : > { %3434 = vmatpush.msra.mxu1 %v3433_v47  ;;  %v6936_v2 = vpop.f32.mrf.mxu3  ;;  %v6942_v26 = vpop.f32.mrf.mxu2  ;;  %v900_v47 = vadd.f32 %v8299_v14, %v8298_v4  ;;  %v8301_v4 = vld [vmem:[#allocation43_spill] sm:$0xff]  ;;  %v8302_v14 = vld [vmem:[#allocation42_spill] sm:$0xff] }
 0x2c6   : > { %v6928_v49 = vpop.f32.mrf.mxu1  ;;  %2470 = vmatmul.f32.vlgmr.msrb.gmra.mxu3 %v6584_v34  ;;  %3436 = vmatmul.f32.vlgmr.msra.gmra.mxu1 %v6567_v22 }
 0x2c7   : > { %8295 = vst [vmem:[#allocation3_spill] sm:$0xff] %v6928_v49  ;;  %3552 = vmatpush.msrb.mxu1 %v6902_v61  ;;  %2445 = vmatmul.f32.gmra.mxu2 %v6598_v54 }
 0x2c8   : > { %3405 = vmatmul.f32.gmra.mxu0 %v6618_v55 }
 0x2c9   : > { %3554 = vmatpush.msrb.mxu1 %v6890_v5 }
 0x2cc   : > { %v6938_v33 = vpop.f32.mrf.mxu0 }
 0x2cd   : > { %8296 = vst [vmem:[#allocation80_spill] sm:$0xff] %v6938_v33  ;;  %v6952_v5 = vpop.f32.mrf.mxu3  ;;  %v6957_v61 = vpop.f32.mrf.mxu2 }
 0x2ce   : > { %v6940_v25 = vpop.f32.mrf.mxu1  ;;  %2476 = vmatmul.f32.gmra.mxu3 %v6604_v7  ;;  %3440 = vmatmul.f32.gmra.mxu1 %v6587_v44 }
 0x2cf   : > { %8297 = vst [vmem:[#allocation81_spill] sm:$0xff] %v6940_v25  ;;  %2503 = vmatmul.f32.vlgmr.msra.gmra.mxu2 %v6567_v22  ;;  %v1114_v25 = vadd.f32 %v6697_v48, %v900_v47 }
 0x2d0   : > { %3529 = vmatmul.f32.vlgmr.msrb.gmra.mxu0 %v6567_v22 }
 0x2d1   : > { %v1366_v37 = vadd.f32 %v6716_v60, %v1114_v25 }
 0x2d4   : > { %v6950_v49 = vpop.f32.mrf.mxu0 }
 0x2d5   : > { %8300 = vst [vmem:[#allocation41_spill] sm:$0xff] %v6950_v49  ;;  %v904_v49 = vadd.f32 %v8302_v14, %v8301_v4  ;;  %v6964_v62 = vpop.f32.mrf.mxu3  ;;  %v6969_v52 = vpop.f32.mrf.mxu2 }
 0x2d6   : > { %v1741_v33 = vpop.f32.mrf.mxu1  ;;  %2530 = vmatmul.f32.vlgmr.msra.gmra.mxu3 %v6567_v22  ;;  %3556 = vmatmul.f32.vlgmr.msrb.gmra.mxu1 %v6567_v22  ;;  %8303 = vst [vmem:[#allocation40_spill] sm:$0xff] %v6964_v62 }
 0x2d7   : > { %2507 = vmatmul.f32.gmra.mxu2 %v6587_v44  ;;  %v1119_v48 = vadd.f32 %v6725_v18, %v904_v49  ;;  %8304 = vst [vmem:[#allocation43_spill] sm:$0xff] %v6969_v52  ;;  %v8308_v49 = vld [vmem:[#allocation47_spill] sm:$0xff] }
 0x2d8   : > { %3533 = vmatmul.f32.gmra.mxu0 %v6587_v44 }
 0x2d9   : > { %v1372_v53 = vadd.f32 %v6734_v8, %v1119_v48 }
 0x2dc   : > { %v1562_v13 = vpop.f32.mrf.mxu0 }
 0x2dd   : > { %v1563_v56 = vadd.f32 %v1562_v13, %v1366_v37  ;;  %v8305_v13 = vld [vmem:[#allocation45_spill] sm:$0xff]  ;;  %v8306_v37 = vld [vmem:[#allocation44_spill] sm:$0xff]  ;;  %v6974_v35 = vpop.f32.mrf.mxu3  ;;  %v6978_v62 = vpop.f32.mrf.mxu2 }
 0x2de   : > { %2534 = vmatmul.f32.gmra.mxu3 %v6587_v44  ;;  %3560 = vmatmul.f32.gmra.mxu1 %v6587_v44  ;;  %v1745_v12 = vpop.f32.mrf.mxu1  ;;  %v908_v10 = vadd.f32 %v8306_v37, %v8305_v13  ;;  %8307 = vst [vmem:[#allocation42_spill] sm:$0xff] %v6974_v35  ;;  %v8312_v37 = vld [vmem:[#allocation69_spill] sm:$0xff] }
 0x2df   : > { %v1742_v47 = vadd.f32 %v1741_v33, %v1563_v56  ;;  %v8309_v33 = vld [vmem:[#allocation46_spill] sm:$0xff] }
 0x2e0   : > { %v912_v58 = vadd.f32 %v8309_v33, %v8308_v49  ;;  %v1124_v8 = vadd.f32 %v6736_v41, %v908_v10  ;;  %v6988_v49 = vand.u32 4294901760, %v8312_v37 }
 0x2e1   : > { %v2554_v60 = vand.u32 4294901760, %v1742_v47 }
 0x2e2   : > { %8313 = vst [vmem:[#allocation44_spill] sm:$0xff] %v6988_v49 }
 0x2e3   : > { %v2594_v4 = vsub.f32 %v1742_v47, %v2554_v60  ;;  %v1129_v47 = vadd.f32 %v6751_v57, %v912_v58 }
 0x2e4   : > { %v1566_v25 = vpop.f32.mrf.mxu0 }
 0x2e5   : > { %v1567_v30 = vadd.f32 %v1566_v25, %v1372_v53  ;;  %v2595_v52 = vand.u32 4294901760, %v2594_v4  ;;  %v6994_v35 = vpop.f32.mrf.mxu3  ;;  %v1384_v57 = vadd.f32 %v6762_v45, %v1129_v47  ;;  %v8318_v45 = vld [vmem:[#allocation64_spill] sm:$0xff] }
 0x2e6   : > { %v1749_v56 = vpop.f32.mrf.mxu1  ;;  %v7010_v47 = vand.u32 4294901760, %v8318_v45 }
 0x2e7   : > { %v1746_v14 = vadd.f32 %v1745_v12, %v1567_v30  ;;  %v8310_v12 = vld [vmem:[#allocation70_spill] sm:$0xff]  ;;  %v2596_v13 = vsub.f32 %v2594_v4, %v2595_v52 }
 0x2e8   : > { %v6982_v48 = vand.u32 4294901760, %v8310_v12 }
 0x2e9   : > { %v2552_v18 = vand.u32 4294901760, %v1746_v14 }
 0x2ea   : > { %8311 = vst [vmem:[#allocation45_spill] sm:$0xff] %v6982_v48  ;;  %v6992_v10 = vsub.f32 %v8310_v12, %v6982_v48 }
 0x2eb   : > { %v2588_v3 = vsub.f32 %v1746_v14, %v2552_v18  ;;  %2553 = vmatpush.msrb.mxu2 %v2552_v18  ;;  %v1378_v14 = vadd.f32 %v6747_v39, %v1124_v8  ;;  %v6999_v39 = vsub.f32 %v8312_v37, %v6988_v49  ;;  %v8316_v8 = vld [vmem:[#allocation66_spill] sm:$0xff] }
 0x2ec   : > { %v1570_v53 = vpop.f32.mrf.mxu0  ;;  %8314 = vst [vmem:[#allocation47_spill] sm:$0xff] %v6992_v10 }
 0x2ed   : > { %2555 = vmatpush.msrb.mxu2 %v2554_v60  ;;  %v2589_v30 = vand.u32 4294901760, %v2588_v3  ;;  %v1571_v33 = vadd.f32 %v1570_v53, %v1378_v14  ;;  %8315 = vst [vmem:[#allocation46_spill] sm:$0xff] %v6999_v39  ;;  %v7004_v53 = vpop.f32.mrf.mxu2 }
 0x2ee   : > { %2561 = vmatmul.f32.vlgmr.msrb.gmra.mxu2 %v6600_v59  ;;  %8317 = vst [vmem:[#allocation70_spill] sm:$0xff] %v7004_v53 }
 0x2ef   : > { %2624 = vmatpush.msra.mxu2 %v2588_v3  ;;  %v2590_v25 = vsub.f32 %v2588_v3, %v2589_v30  ;;  %v2597_v3 = vand.u32 4294901760, %v2596_v13  ;;  %v1750_v14 = vadd.f32 %v1749_v56, %v1571_v33  ;;  %v3887_v13 = vand.u32 4294901760, %v6999_v39 }
 0x2f0   : > { %v7024_v33 = vsub.f32 %v8318_v45, %v7010_v47 }
 0x2f1   : > { %2627 = vmatpush.msra.mxu2 %v2594_v4  ;;  %v2591_v41 = vand.u32 4294901760, %v2590_v25  ;;  %v1753_v4 = vpop.f32.mrf.mxu1  ;;  %v7002_v25 = vand.u32 4294901760, %v8316_v8 }
 0x2f3   : > { %2687 = vmatpush.msrb.mxu2 %v2589_v30  ;;  %2592 = vmatpush.msrb.mxu3 %v2591_v41  ;;  %v3881_v30 = vand.u32 4294901760, %v6992_v10  ;;  %v7015_v37 = vsub.f32 %v8316_v8, %v7002_v25  ;;  %v8323_v8 = vld [vmem:[#allocation21_spill] sm:$0xff] }
 0x2f4   : > { %v1574_v58 = vpop.f32.mrf.mxu0 }
 0x2f5   : > { %2691 = vmatpush.msrb.mxu2 %v2595_v52  ;;  %v1575_v12 = vadd.f32 %v1574_v58, %v1384_v57  ;;  %2598 = vmatpush.msrb.mxu3 %v2597_v3  ;;  %v7019_v57 = vand.u32 4294901760, %v1750_v14  ;;  %v3882_v56 = vsub.f32 %v6992_v10, %v3881_v30  ;;  %v3888_v58 = vsub.f32 %v6999_v39, %v3887_v13  ;;  %v7038_v45 = vpop.f32.mrf.mxu2  ;;  %v8326_v39 = vld [vmem:[#allocation19_spill] sm:$0xff]  ;;  %v8327_v10 = vld [vmem:[#allocation18_spill] sm:$0xff] }
 0x2f6   : > { %2569 = vmatmul.f32.gmra.mxu2 %v6618_v55  ;;  %2600 = vmatmul.f32.vlgmr.msrb.gmra.mxu3 %v6567_v22 }
 0x2f7   : > { %v1754_v52 = vadd.f32 %v1753_v4, %v1575_v12  ;;  %2654 = vmatpush.msra.mxu3 %v2552_v18  ;;  %8320 = vst [vmem:[#allocation66_spill] sm:$0xff] %v7019_v57  ;;  %v7031_v4 = vpop.f32.mrf.mxu3  ;;  %v8324_v12 = vld [vmem:[#allocation20_spill] sm:$0xff] }
 0x2f8   : > { %8322 = vst [vmem:[#allocation82_spill] sm:$0xff] %v7031_v4  ;;  %v856_v53 = vadd.f32 %v8324_v12, %v8323_v8  ;;  %v8117_v8 = vand.u32 4294901760, %v7024_v33  ;;  %v3889_v12 = vand.u32 4294901760, %v3888_v58 }
 0x2f9   : > { %v7017_v41 = vand.u32 4294901760, %v1754_v52  ;;  %2656 = vmatpush.msra.mxu3 %v2554_v60 }
 0x2fa   : > { %v2862_v58 = vsub.f32 %v7024_v33, %v8117_v8 }
 0x2fb   : > { %8319 = vst [vmem:[#allocation69_spill] sm:$0xff] %v7017_v41  ;;  %2716 = vmatpush.msrb.mxu3 %v2552_v18  ;;  %v7027_v3 = vsub.f32 %v1754_v52, %v7017_v41  ;;  %3680 = vmatpush.msra.mxu1 %v7017_v41  ;;  %v7041_v52 = vsub.f32 %v1750_v14, %v7019_v57  ;;  %v8328_v14 = vld [vmem:[#allocation55_spill] sm:$0xff] }
 0x2fc   : > { %v852_v41 = vadd.f32 %v8327_v10, %v8326_v39  ;;  %v1059_v18 = vadd.f32 %v8328_v14, %v856_v53  ;;  %v8330_v39 = vld [vmem:[#allocation51_spill] sm:$0xff]  ;;  %v2863_v8 = vand.u32 4294901760, %v2862_v58 }
 0x2fd   : > { %8321 = vst [vmem:[#allocation64_spill] sm:$0xff] %v7027_v3  ;;  %2718 = vmatpush.msrb.mxu3 %v2554_v60  ;;  %3650 = vmatpush.msra.mxu0 %v7027_v3  ;;  %v3883_v60 = vand.u32 4294901760, %v3882_v56  ;;  %v8329_v56 = vand.u32 4294901760, %v7015_v37  ;;  %v8350_v3 = vld [vmem:[#allocation48_spill] sm:$0xff] }
 0x2fe   : > { %3682 = vmatpush.msra.mxu1 %v7019_v57  ;;  %8325 = vst [vmem:[#allocation21_spill] sm:$0xff] %v7041_v52  ;;  %2604 = vmatmul.f32.gmra.mxu3 %v6587_v44  ;;  %v1054_v57 = vadd.f32 %v8330_v39, %v852_v41  ;;  %v8332_v41 = vld [vmem:[#allocation54_spill] sm:$0xff] }
 0x2ff   : > { %2630 = vmatmul.f32.vlgmr.msra.gmra.mxu2 %v6576_v20  ;;  %3686 = vmatmul.f32.vlgmr.msra.gmra.mxu1 %v6584_v34  ;;  %v2856_v10 = vsub.f32 %v7015_v37, %v8329_v56  ;;  %v7064_v53 = vpop.f32.mrf.mxu3 }
 0x300   : > { %2819 = vmatpush.msra.mxu2 %v7002_v25  ;;  %3884 = vmatpush.msrb.mxu1 %v3883_v60  ;;  %v8331_v60 = vld [vmem:[#allocation58_spill] sm:$0xff] }
 0x301   : > { %3653 = vmatpush.msra.mxu0 %v7041_v52  ;;  %v1300_v14 = vadd.f32 %v8331_v60, %v1059_v18  ;;  %v2857_v56 = vand.u32 4294901760, %v2856_v10  ;;  %v7079_v10 = vand.u32 4294901760, %v6728_v38  ;;  %v8349_v52 = vld [vmem:[#allocation49_spill] sm:$0xff] }
 0x302   : > { %2821 = vmatpush.msra.mxu2 %v7010_v47  ;;  %3656 = vmatmul.f32.vlgmr.msra.gmra.mxu0 %v6576_v20  ;;  %v916_v4 = vadd.f32 %v8350_v3, %v8349_v52  ;;  %v8354_v3 = vld [vmem:[#allocation11_spill] sm:$0xff] }
 0x303   : > { %3845 = vmatpush.msrb.mxu0 %v6982_v48  ;;  %3890 = vmatpush.msrb.mxu1 %v3889_v12  ;;  %v1294_v12 = vadd.f32 %v8332_v41, %v1054_v57  ;;  %v1519_v39 = vadd.f32 %v6824_v9, %v1300_v14  ;;  %8333 = vst [vmem:[#allocation20_spill] sm:$0xff] %v7079_v10 }
 0x305   : > { %4008 = vmatpush.msra.mxu1 %v6982_v48  ;;  %3847 = vmatpush.msrb.mxu0 %v6988_v49  ;;  %v7072_v48 = vpop.f32.mrf.mxu2  ;;  %v1698_v18 = vadd.f32 %v6812_v29, %v1519_v39  ;;  %v7095_v29 = vsub.f32 %v6728_v38, %v7079_v10 }
 0x306   : > { %2660 = vmatmul.f32.vlgmr.msra.gmra.mxu3 %v6584_v34 }
 0x307   : > { %3979 = vmatpush.msra.mxu0 %v3881_v30  ;;  %4010 = vmatpush.msra.mxu1 %v6988_v49  ;;  %v1515_v30 = vadd.f32 %v6808_v17, %v1294_v12  ;;  %v7084_v9 = vpop.f32.mrf.mxu3  ;;  %v7089_v17 = vand.u32 4294901760, %v1698_v18  ;;  %8336 = vst [vmem:[#allocation55_spill] sm:$0xff] %v7095_v29  ;;  %v1757_v49 = vpop.f32.mrf.mxu1 }
 0x308   : > { %2635 = vmatmul.f32.gmra.mxu2 %v6598_v54  ;;  %2858 = vmatpush.msra.mxu3 %v2857_v56 }
 0x309   : > { %3983 = vmatpush.msra.mxu0 %v3887_v13  ;;  %3692 = vmatmul.f32.gmra.mxu1 %v6604_v7  ;;  %v1694_v57 = vadd.f32 %v6792_v31, %v1515_v30  ;;  %v7087_v13 = vand.u32 4294901760, %v6712_v32  ;;  %8335 = vst [vmem:[#allocation18_spill] sm:$0xff] %v7089_v17  ;;  %v7109_v60 = vsub.f32 %v1698_v18, %v7089_v17  ;;  %v8340_v30 = vand.u32 4294901760, %v7015_v37 }
 0x30a   : > { %2864 = vmatpush.msra.mxu3 %v2863_v8  ;;  %3661 = vmatmul.f32.gmra.mxu0 %v6598_v54 }
 0x30b   : > { %8334 = vst [vmem:[#allocation19_spill] sm:$0xff] %v7087_v13  ;;  %v7097_v31 = vand.u32 4294901760, %v1694_v57  ;;  %v7106_v58 = vsub.f32 %v6712_v32, %v7087_v13  ;;  %v4261_v14 = vand.u32 4294901760, %v7109_v60 }
 0x30c   : > { %8338 = vst [vmem:[#allocation58_spill] sm:$0xff] %v7109_v60 }
 0x30d   : > { %v7101_v8 = vpop.f32.mrf.mxu2  ;;  %8337 = vst [vmem:[#allocation51_spill] sm:$0xff] %v7106_v58  ;;  %v7114_v38 = vsub.f32 %v1694_v57, %v7097_v31  ;;  %v4262_v41 = vsub.f32 %v7109_v60, %v4261_v14  ;;  %v8341_v57 = vand.u32 4294901760, %v7024_v33 }
 0x30e   : > { %2666 = vmatmul.f32.gmra.mxu3 %v6604_v7 }
 0x30f   : > { %8339 = vst [vmem:[#allocation54_spill] sm:$0xff] %v7114_v38  ;;  %v7122_v32 = vpop.f32.mrf.mxu3  ;;  %v4267_v56 = vand.u32 4294901760, %v7114_v38  ;;  %v4263_v18 = vand.u32 4294901760, %v4262_v41  ;;  %v8343_v41 = vld [vmem:[#allocation34_spill] sm:$0xff] }
 0x310   : > { %2693 = vmatmul.f32.vlgmr.msrb.gmra.mxu2 %v6567_v22 }
 0x311   : > { %2890 = vmatpush.msrb.mxu2 %v7015_v37  ;;  %3892 = vmatmul.f32.vlgmr.msrb.gmra.mxu1 %v6567_v22  ;;  %v4268_v39 = vsub.f32 %v7114_v38, %v4267_v56  ;;  %v1578_v37 = vpop.f32.mrf.mxu0 }
 0x312   : > { %4136 = vmatpush.msrb.mxu1 %v7079_v10  ;;  %3853 = vmatmul.f32.vlgmr.msrb.gmra.mxu0 %v6600_v59  ;;  %v8347_v10 = vld [vmem:[#allocation50_spill] sm:$0xff] }
 0x313   : > { %2893 = vmatpush.msrb.mxu2 %v7024_v33  ;;  %4106 = vmatpush.msrb.mxu0 %v7095_v29  ;;  %v8342_v33 = vld [vmem:[#allocation35_spill] sm:$0xff] }
 0x314   : > { %4138 = vmatpush.msrb.mxu1 %v7087_v13  ;;  %v4269_v13 = vand.u32 4294901760, %v4268_v39 }
 0x315   : > { %4109 = vmatpush.msrb.mxu0 %v7106_v58  ;;  %v7128_v12 = vpop.f32.mrf.mxu2  ;;  %v8346_v58 = vld [vmem:[#allocation52_spill] sm:$0xff] }
 0x316   : > { %2720 = vmatmul.f32.vlgmr.msrb.gmra.mxu3 %v6567_v22  ;;  %v920_v29 = vadd.f32 %v8347_v10, %v8346_v58  ;;  %v8353_v58 = vand.u32 4294901760, %v6703_v51 }
 0x317   : > { %2920 = vmatpush.msrb.mxu3 %v7002_v25  ;;  %v7139_v60 = vpop.f32.mrf.mxu3 }
 0x318   : > { %2697 = vmatmul.f32.gmra.mxu2 %v6587_v44  ;;  %v1139_v10 = vadd.f32 %v6779_v6, %v920_v29 }
 0x319   : > { %3896 = vmatmul.f32.gmra.mxu1 %v6587_v44  ;;  %2922 = vmatpush.msrb.mxu3 %v7010_v47  ;;  %v1582_v29 = vpop.f32.mrf.mxu0 }
 0x31a   : > { %3861 = vmatmul.f32.gmra.mxu0 %v6618_v55 }
 0x31d   : > { %v7143_v38 = vpop.f32.mrf.mxu2 }
 0x31e   : > { %2724 = vmatmul.f32.gmra.mxu3 %v6587_v44 }
 0x31f   : > { %v7153_v39 = vpop.f32.mrf.mxu3 }
 0x320   : > { %2827 = vmatmul.f32.vlgmr.msra.gmra.mxu2 %v6600_v59 }
 0x321   : > { %2953 = vmatpush.msra.mxu2 %v8340_v30  ;;  %4012 = vmatmul.f32.vlgmr.msra.gmra.mxu1 %v6567_v22  ;;  %v8344_v30 = vld [vmem:[#allocation33_spill] sm:$0xff] }
 0x322   : > { %4264 = vmatpush.msra.mxu1 %v4263_v18  ;;  %3985 = vmatmul.f32.vlgmr.msra.gmra.mxu0 %v6567_v22  ;;  %v8345_v18 = vld [vmem:[#allocation32_spill] sm:$0xff] }
 0x323   : > { %2957 = vmatpush.msra.mxu2 %v8341_v57  ;;  %4225 = vmatpush.msra.mxu0 %v7089_v17  ;;  %v884_v57 = vadd.f32 %v8345_v18, %v8344_v30  ;;  %v1134_v18 = vadd.f32 %v6768_v43, %v916_v4 }
 0x324   : > { %4270 = vmatpush.msra.mxu1 %v4269_v13  ;;  %v888_v13 = vadd.f32 %v8343_v41, %v8342_v33  ;;  %v8352_v41 = vld [vmem:[#allocation4_spill] sm:$0xff] }
 0x325   : > { %4227 = vmatpush.msra.mxu0 %v7097_v31  ;;  %v7165_v33 = vpop.f32.mrf.mxu2  ;;  %v1094_v30 = vadd.f32 %v8352_v41, %v884_v57  ;;  %v8355_v57 = vand.u32 4294901760, %v6707_v23  ;;  %v1390_v4 = vadd.f32 %v6774_v24, %v1134_v18 }
 0x326   : > { %2866 = vmatmul.f32.vlgmr.msra.gmra.mxu3 %v6567_v22  ;;  %8351 = vst [vmem:[#allocation35_spill] sm:$0xff] %v7165_v33 }
 0x327   : > { %2982 = vmatpush.msra.mxu3 %v7002_v25  ;;  %v8348_v25 = vld [vmem:[#allocation6_spill] sm:$0xff]  ;;  %v3052_v6 = vsub.f32 %v6707_v23, %v8355_v57  ;;  %v7187_v43 = vpop.f32.mrf.mxu3 }
 0x328   : > { %2835 = vmatmul.f32.gmra.mxu2 %v6618_v55 }
 0x329   : > { %4016 = vmatmul.f32.gmra.mxu1 %v6587_v44  ;;  %2984 = vmatpush.msra.mxu3 %v7010_v47  ;;  %v1099_v47 = vadd.f32 %v8348_v25, %v888_v13  ;;  %v3046_v13 = vsub.f32 %v6703_v51, %v8353_v58  ;;  %v8356_v25 = vld [vmem:[#allocation71_spill] sm:$0xff] }
 0x32a   : > { %3989 = vmatmul.f32.gmra.mxu0 %v6587_v44  ;;  %v1342_v41 = vadd.f32 %v8356_v25, %v1094_v30 }
 0x32b   : > { %v1348_v52 = vadd.f32 %v8354_v3, %v1099_v47  ;;  %v3047_v33 = vand.u32 4294901760, %v3046_v13  ;;  %v3053_v3 = vand.u32 4294901760, %v3052_v6 }
 0x32d   : > { %v1551_v58 = vadd.f32 %v6926_v21, %v1348_v52 }
 0x32e   : > { %2870 = vmatmul.f32.gmra.mxu3 %v6587_v44 }
 0x32f   : > { %v1730_v21 = vadd.f32 %v6915_v1, %v1551_v58  ;;  %v3235_v58 = vand.u32 4294901760, %v6803_v36 }
 0x330   : > { %2896 = vmatmul.f32.vlgmr.msrb.gmra.mxu2 %v6576_v20 }
 0x331   : > { %3009 = vmatpush.msrb.mxu2 %v6699_v0  ;;  %4142 = vmatmul.f32.vlgmr.msrb.gmra.mxu1 %v6584_v34  ;;  %v7191_v30 = vpop.f32.mrf.mxu2  ;;  %v7197_v24 = vand.u32 4294901760, %v1730_v21 }
 0x332   : > { %4388 = vmatpush.msrb.mxu1 %v7089_v17  ;;  %4112 = vmatmul.f32.vlgmr.msrb.gmra.mxu0 %v6576_v20  ;;  %v1396_v17 = vadd.f32 %v6787_v15, %v1139_v10  ;;  %v1761_v15 = vpop.f32.mrf.mxu1 }
 0x333   : > { %3011 = vmatpush.msrb.mxu2 %v6694_v46  ;;  %4359 = vmatpush.msrb.mxu0 %v4261_v14  ;;  %v1547_v14 = vadd.f32 %v6911_v27, %v1342_v41 }
 0x334   : > { %4390 = vmatpush.msrb.mxu1 %v7097_v31  ;;  %v1583_v47 = vadd.f32 %v1582_v29, %v1396_v17 }
 0x335   : > { %4363 = vmatpush.msrb.mxu0 %v4267_v56  ;;  %v1579_v56 = vadd.f32 %v1578_v37, %v1390_v4  ;;  %v1726_v10 = vadd.f32 %v6892_v19, %v1547_v14  ;;  %v7210_v19 = vsub.f32 %v1730_v21, %v7197_v24  ;;  %v3241_v14 = vand.u32 4294901760, %v6815_v42 }
 0x336   : > { %2926 = vmatmul.f32.vlgmr.msrb.gmra.mxu3 %v6584_v34  ;;  %v1762_v13 = vadd.f32 %v1761_v15, %v1583_v47 }
 0x337   : > { %3048 = vmatpush.msrb.mxu3 %v3047_v33  ;;  %v1758_v27 = vadd.f32 %v1757_v49, %v1579_v56  ;;  %v7203_v33 = vand.u32 4294901760, %v1726_v10  ;;  %v3242_v56 = vsub.f32 %v6815_v42, %v3241_v14  ;;  %v2032_v42 = vadd.f32 %v6936_v2, %v6924_v63  ;;  %v8361_v2 = vld [vmem:[#allocation40_spill] sm:$0xff] }
 0x338   : > { %2901 = vmatmul.f32.gmra.mxu2 %v6598_v54  ;;  %v7205_v52 = vand.u32 4294901760, %v1762_v13 }
 0x339   : > { %4148 = vmatmul.f32.gmra.mxu1 %v6604_v7  ;;  %3054 = vmatpush.msrb.mxu3 %v3053_v3  ;;  %v7201_v17 = vpop.f32.mrf.mxu3  ;;  %v7212_v1 = vand.u32 4294901760, %v1758_v27  ;;  %v7216_v49 = vpop.f32.mrf.mxu2  ;;  %v7220_v37 = vsub.f32 %v1726_v10, %v7203_v33  ;;  %v3236_v3 = vsub.f32 %v6803_v36, %v3235_v58  ;;  %v3243_v36 = vand.u32 4294901760, %v3242_v56 }
 0x33a   : > { %4117 = vmatmul.f32.gmra.mxu0 %v6598_v54  ;;  %8357 = vst [vmem:[#allocation34_spill] sm:$0xff] %v7205_v52  ;;  %v7238_v6 = vpop.f32.mrf.mxu1  ;;  %v2222_v56 = vadd.f32 %v7064_v53, %v7038_v45 }
 0x33b   : > { %8358 = vst [vmem:[#allocation33_spill] sm:$0xff] %v7212_v1  ;;  %v7228_v18 = vsub.f32 %v1758_v27, %v7212_v1  ;;  %v3237_v10 = vand.u32 4294901760, %v3236_v3  ;;  %v2062_v3 = vadd.f32 %v6957_v61, %v2032_v42  ;;  %v2036_v61 = vadd.f32 %v6952_v5, %v6942_v26  ;;  %v8366_v26 = vld [vmem:[#allocation43_spill] sm:$0xff] }
 0x33c   : > { %v2252_v53 = vadd.f32 %v7101_v8, %v2222_v56  ;;  %v8367_v56 = vld [vmem:[#allocation67_spill] sm:$0xff] }
 0x33d   : > { %8360 = vst [vmem:[#allocation52_spill] sm:$0xff] %v7228_v18  ;;  %v4647_v29 = vand.u32 4294901760, %v7228_v18  ;;  %v2092_v45 = vadd.f32 %v8361_v2, %v2062_v3 }
 0x33e   : > { %2932 = vmatmul.f32.gmra.mxu3 %v6604_v7  ;;  %v2282_v42 = vadd.f32 %v7122_v32, %v2252_v53 }
 0x33f   : > { %v4648_v4 = vsub.f32 %v7228_v18, %v4647_v29  ;;  %v2125_v8 = vadd.f32 %v6978_v62, %v2092_v45 }
 0x340   : > { %2959 = vmatmul.f32.vlgmr.msra.gmra.mxu2 %v6567_v22  ;;  %v2315_v45 = vadd.f32 %v7143_v38, %v2282_v42 }
 0x341   : > { %3080 = vmatpush.msra.mxu2 %v6703_v51  ;;  %4272 = vmatmul.f32.vlgmr.msra.gmra.mxu1 %v6567_v22  ;;  %v7223_v51 = vsub.f32 %v1762_v13, %v7205_v52  ;;  %v7236_v57 = vpop.f32.mrf.mxu3  ;;  %v2441_v41 = vpop.f32.mrf.mxu2  ;;  %v4649_v47 = vand.u32 4294901760, %v4648_v4 }
 0x342   : > { %4516 = vmatpush.msra.mxu1 %v7197_v24  ;;  %4233 = vmatmul.f32.vlgmr.msra.gmra.mxu0 %v6600_v59  ;;  %v7256_v21 = vpop.f32.mrf.mxu1  ;;  %v2416_v62 = vadd.f32 %v7236_v57, %v7216_v49  ;;  %v8375_v49 = vld [vmem:[#allocation17_spill] sm:$0xff] }
 0x343   : > { %3083 = vmatpush.msra.mxu2 %v6707_v23  ;;  %8359 = vst [vmem:[#allocation32_spill] sm:$0xff] %v7223_v51  ;;  %4486 = vmatpush.msra.mxu0 %v7210_v19  ;;  %v4641_v23 = vand.u32 4294901760, %v7223_v51  ;;  %v7332_v57 = vand.u32 4294901760, %v8375_v49 }
 0x344   : > { %4518 = vmatpush.msra.mxu1 %v7203_v33 }
 0x345   : > { %4489 = vmatpush.msra.mxu0 %v7220_v37  ;;  %v4642_v25 = vsub.f32 %v7223_v51, %v4641_v23  ;;  %8376 = vst [vmem:[#allocation4_spill] sm:$0xff] %v7332_v57 }
 0x346   : > { %2986 = vmatmul.f32.vlgmr.msra.gmra.mxu3 %v6567_v22 }
 0x347   : > { %3110 = vmatpush.msra.mxu3 %v6699_v0  ;;  %v7248_v0 = vpop.f32.mrf.mxu0 }
 0x348   : > { %2963 = vmatmul.f32.gmra.mxu2 %v6587_v44 }
 0x349   : > { %4276 = vmatmul.f32.gmra.mxu1 %v6587_v44  ;;  %3112 = vmatpush.msra.mxu3 %v6694_v46  ;;  %v4643_v46 = vand.u32 4294901760, %v4642_v25  ;;  %v2471_v15 = vpop.f32.mrf.mxu3 }
 0x34a   : > { %4241 = vmatmul.f32.gmra.mxu0 %v6618_v55  ;;  %v7261_v13 = vpop.f32.mrf.mxu2  ;;  %v7269_v25 = vpop.f32.mrf.mxu1 }
 0x34b   : > { %v2447_v38 = vadd.f32 %v7261_v13, %v2416_v62  ;;  %v2342_v13 = vadd.f32 %v7153_v39, %v2315_v45 }
 0x34e   : > { %2990 = vmatmul.f32.gmra.mxu3 %v6587_v44 }
 0x34f   : > { %v7266_v27 = vpop.f32.mrf.mxu0 }
 0x350   : > { %3017 = vmatmul.f32.vlgmr.msrb.gmra.mxu2 %v6600_v59 }
 0x351   : > { %3199 = vmatpush.msrb.mxu2 %v6797_v16  ;;  %4392 = vmatmul.f32.vlgmr.msrb.gmra.mxu1 %v6567_v22  ;;  %v7273_v4 = vpop.f32.mrf.mxu3 }
 0x352   : > { %4644 = vmatpush.msrb.mxu1 %v4643_v46  ;;  %4365 = vmatmul.f32.vlgmr.msrb.gmra.mxu0 %v6567_v22  ;;  %v1842_v46 = vadd.f32 %v6840_v50, %v6832_v40  ;;  %v2412_v50 = vadd.f32 %v7201_v17, %v7191_v30  ;;  %v2067_v17 = vadd.f32 %v8366_v26, %v2036_v61  ;;  %v8369_v61 = vld [vmem:[#allocation9_spill] sm:$0xff]  ;;  %v8381_v26 = vld [vmem:[#allocation12_spill] sm:$0xff] }
 0x353   : > { %3201 = vmatpush.msrb.mxu2 %v6800_v28  ;;  %4605 = vmatpush.msrb.mxu0 %v7205_v52  ;;  %v7318_v2 = vand.u32 4294901760, %v8369_v61 }
 0x354   : > { %4650 = vmatpush.msrb.mxu1 %v4649_v47  ;;  %v2504_v47 = vpop.f32.mrf.mxu2  ;;  %v1872_v40 = vadd.f32 %v6862_v11, %v1842_v46  ;;  %v2442_v5 = vadd.f32 %v2441_v41, %v2412_v50 }
 0x355   : > { %4607 = vmatpush.msrb.mxu0 %v7212_v1  ;;  %8370 = vst [vmem:[#allocation6_spill] sm:$0xff] %v7318_v2 }
 0x356   : > { %3056 = vmatmul.f32.vlgmr.msrb.gmra.mxu3 %v6567_v22  ;;  %v2472_v50 = vadd.f32 %v2471_v15, %v2442_v5  ;;  %v8377_v15 = vld [vmem:[#allocation28_spill] sm:$0xff]  ;;  %v7344_v5 = vsub.f32 %v8369_v61, %v7318_v2 }
 0x357   : > { %3238 = vmatpush.msrb.mxu3 %v3237_v10  ;;  %v7284_v63 = vpop.f32.mrf.mxu0  ;;  %v8364_v10 = vld [vmem:[#allocation77_spill] sm:$0xff] }
 0x358   : > { %3025 = vmatmul.f32.gmra.mxu2 %v6618_v55  ;;  %v2505_v53 = vadd.f32 %v2504_v47, %v2472_v50  ;;  %8380 = vst [vmem:[#allocation11_spill] sm:$0xff] %v7344_v5 }
 0x359   : > { %4396 = vmatmul.f32.gmra.mxu1 %v6587_v44  ;;  %3244 = vmatpush.msrb.mxu3 %v3243_v36  ;;  %v8365_v36 = vld [vmem:[#allocation79_spill] sm:$0xff] }
 0x35a   : > { %4369 = vmatmul.f32.gmra.mxu0 %v6587_v44  ;;  %v1846_v30 = vadd.f32 %v8365_v36, %v8364_v10 }
 0x35c   : > { %v2508_v3 = vpop.f32.mrf.mxu2 }
 0x35e   : > { %3060 = vmatmul.f32.gmra.mxu3 %v6587_v44 }
 0x35f   : > { %v7310_v46 = vpop.f32.mrf.mxu0 }
 0x360   : > { %3086 = vmatmul.f32.vlgmr.msra.gmra.mxu2 %v6576_v20 }
 0x361   : > { %3333 = vmatpush.msra.mxu2 %v3235_v58  ;;  %4522 = vmatmul.f32.vlgmr.msra.gmra.mxu1 %v6584_v34  ;;  %v7295_v58 = vpop.f32.mrf.mxu1 }
 0x362   : > { %4768 = vmatpush.msra.mxu1 %v7205_v52  ;;  %4492 = vmatmul.f32.vlgmr.msra.gmra.mxu0 %v6576_v20  ;;  %8362 = vst [vmem:[#allocation50_spill] sm:$0xff] %v7295_v58  ;;  %v8416_v58 = vld [vmem:[#allocation78_spill] sm:$0xff] }
 0x363   : > { %3337 = vmatpush.msra.mxu2 %v3241_v14  ;;  %4739 = vmatpush.msra.mxu0 %v4641_v23  ;;  %v8363_v14 = vld [vmem:[#allocation27_spill] sm:$0xff]  ;;  %v2531_v23 = vpop.f32.mrf.mxu3 }
 0x364   : > { %4770 = vmatpush.msra.mxu1 %v7212_v1  ;;  %v1902_v11 = vadd.f32 %v8363_v14, %v1872_v40  ;;  %v2532_v47 = vadd.f32 %v2531_v23, %v2505_v53  ;;  %v8383_v23 = vld [vmem:[#allocation68_spill] sm:$0xff] }
 0x365   : > { %4743 = vmatpush.msra.mxu0 %v4647_v29  ;;  %v2226_v29 = vadd.f32 %v7084_v9, %v7072_v48  ;;  %v8371_v48 = vld [vmem:[#allocation42_spill] sm:$0xff]  ;;  %v8408_v1 = vld [vmem:[#allocation36_spill] sm:$0xff] }
 0x366   : > { %3116 = vmatmul.f32.vlgmr.msra.gmra.mxu3 %v6584_v34  ;;  %v1935_v40 = vadd.f32 %v8367_v56, %v1902_v11  ;;  %v2098_v9 = vadd.f32 %v8371_v48, %v2067_v17  ;;  %v8373_v11 = vld [vmem:[#allocation7_spill] sm:$0xff]  ;;  %v7347_v17 = vand.u32 4294901760, %v8381_v26  ;;  %v8386_v48 = vld [vmem:[#allocation30_spill] sm:$0xff] }
 0x367   : > { %3362 = vmatpush.msra.mxu3 %v6797_v16  ;;  %v8368_v16 = vld [vmem:[#allocation26_spill] sm:$0xff]  ;;  %v2257_v32 = vadd.f32 %v7128_v12, %v2226_v29  ;;  %v7329_v10 = vand.u32 4294901760, %v8373_v11 }
 0x368   : > { %3091 = vmatmul.f32.gmra.mxu2 %v6598_v54  ;;  %v1877_v41 = vadd.f32 %v8368_v16, %v1846_v30  ;;  %v7335_v36 = vadd.f32 %v8377_v15, %v1935_v40  ;;  %v8379_v30 = vld [vmem:[#allocation2_spill] sm:$0xff]  ;;  %v7384_v53 = vsub.f32 %v8381_v26, %v7347_v17 }
 0x369   : > { %4528 = vmatmul.f32.gmra.mxu1 %v6604_v7  ;;  %3364 = vmatpush.msra.mxu3 %v6800_v28  ;;  %v7322_v28 = vadd.f32 %v6994_v35, %v2125_v8  ;;  %v7326_v14 = vpop.f32.mrf.mxu1  ;;  %8374 = vst [vmem:[#allocation48_spill] sm:$0xff] %v7329_v10  ;;  %v8378_v35 = vld [vmem:[#allocation65_spill] sm:$0xff]  ;;  %v8382_v29 = vld [vmem:[#allocation70_spill] sm:$0xff]  ;;  %v2288_v40 = vadd.f32 %v7139_v60, %v2257_v32 }
 0x36a   : > { %4497 = vmatmul.f32.gmra.mxu0 %v6598_v54  ;;  %8372 = vst [vmem:[#allocation49_spill] sm:$0xff] %v7326_v14  ;;  %v1908_v12 = vadd.f32 %v8378_v35, %v1877_v41  ;;  %v2129_v42 = vadd.f32 %v8382_v29, %v2098_v9  ;;  %v7360_v41 = vpop.f32.mrf.mxu0  ;;  %v7366_v50 = vsub.f32 %v8373_v11, %v7329_v10  ;;  %v7376_v61 = vadd.f32 0.5, %v7335_v36 }
 0x36b   : > { %v7350_v8 = vadd.f32 0.5, %v7322_v28  ;;  %v2535_v56 = vpop.f32.mrf.mxu3  ;;  %v2732_v16 = vmul.f32 %v7322_v28, %v7322_v28  ;;  %8384 = vst [vmem:[#allocation71_spill] sm:$0xff] %v7360_v41  ;;  %v7370_v60 = vsub.f32 %v8375_v49, %v7332_v57  ;;  %v2728_v39 = vmul.f32 %v7335_v36, %v7335_v36  ;;  %v8387_v49 = vld [vmem:[#allocation82_spill] sm:$0xff] }
 0x36c   : > { %8385 = vst [vmem:[#allocation40_spill] sm:$0xff] %v7366_v50  ;;  %v1939_v9 = vadd.f32 %v8386_v48, %v1908_v12  ;;  %v2478_v32 = vadd.f32 %v7273_v4, %v2447_v38  ;;  %v7389_v15 = vadd.f32 %v8387_v49, %v2129_v42  ;;  %v2756_v38 = vmul.f32 %v7376_v61, %v7376_v61  ;;  %v8391_v42 = vld [vmem:[#allocation31_spill] sm:$0xff] }
 0x36d   : > { %v2734_v45 = vsub.f32 %v2532_v47, %v2732_v16  ;;  %v2758_v11 = vmul.f32 %v7350_v8, %v7350_v8  ;;  %v2730_v35 = vsub.f32 %v2342_v13, %v2728_v39  ;;  %v8135_v4 = vand.u32 4294901760, %v7370_v60  ;;  %v8390_v47 = vld [vmem:[#allocation5_spill] sm:$0xff] }
 0x36e   : > { %3122 = vmatmul.f32.gmra.mxu3 %v6604_v7  ;;  %v2509_v29 = vadd.f32 %v2508_v3, %v2478_v32  ;;  %v7401_v26 = vadd.f32 %v8390_v47, %v1939_v9  ;;  %v8136_v3 = vand.u32 4294901760, %v7384_v53  ;;  %v7407_v39 = vadd.f32 0.5, %v7389_v15  ;;  %v8392_v32 = vld [vmem:[#allocation29_spill] sm:$0xff] }
 0x36f   : > { %v2760_v16 = vadd.f32 %v2758_v11, %v2756_v38  ;;  %v2733_v9 = vmul.f32 %v7389_v15, %v7389_v15  ;;  %v8394_v38 = vld [vmem:[#allocation64_spill] sm:$0xff]  ;;  %v8413_v18 = vand.u32 4294901760, %v7370_v60 }
 0x370   : > { %3207 = vmatmul.f32.vlgmr.msrb.gmra.mxu2 %v6600_v59  ;;  %v2536_v13 = vadd.f32 %v2535_v56, %v2509_v29  ;;  %v5098_v56 = vsub.f32 %v7370_v60, %v8135_v4  ;;  %v7424_v11 = vadd.f32 0.5, %v7401_v26  ;;  %v5104_v29 = vsub.f32 %v7384_v53, %v8136_v3 }
 0x371   : > { %3460 = vmatpush.msrb.mxu2 %v8379_v30  ;;  %4652 = vmatmul.f32.vlgmr.msrb.gmra.mxu1 %v6567_v22  ;;  %v7362_v62 = vpop.f32.mrf.mxu2  ;;  %v8388_v30 = vld [vmem:[#allocation35_spill] sm:$0xff]  ;;  %v3615_v47 = vand.u32 4294901760, %v8394_v38  ;;  %v2762_v4 = vadd.f32 0.0001, %v2760_v16  ;;  %v8397_v16 = vld [vmem:[#allocation66_spill] sm:$0xff] }
 0x372   : > { %4972 = vmatpush.msrb.mxu1 %v7318_v2  ;;  %4613 = vmatmul.f32.vlgmr.msrb.gmra.mxu0 %v6600_v59  ;;  %v2319_v12 = vadd.f32 %v8388_v30, %v2288_v40  ;;  %v2764_v40 = vadd.f32 %v2734_v45, %v2730_v35  ;;  %v7413_v49 = vpop.f32.mrf.mxu0 }
 0x373   : > { %3463 = vmatpush.msrb.mxu2 %v8383_v23  ;;  %4942 = vmatpush.msrb.mxu0 %v7344_v5  ;;  %v7393_v23 = vpop.f32.mrf.mxu1  ;;  %8393 = vst [vmem:[#allocation77_spill] sm:$0xff] %v7413_v49 }
 0x374   : > { %4974 = vmatpush.msrb.mxu1 %v7329_v10  ;;  %8389 = vst [vmem:[#allocation27_spill] sm:$0xff] %v7393_v23  ;;  %v2346_v48 = vadd.f32 %v7187_v43, %v2319_v12  ;;  %v2729_v43 = vmul.f32 %v7401_v26, %v7401_v26  ;;  %v2766_v35 = vadd.f32 0.0009, %v2764_v40  ;;  %v2735_v12 = vsub.f32 %v2536_v13, %v2733_v9  ;;  %v8395_v13 = vld [vmem:[#allocation69_spill] sm:$0xff] }
 0x375   : > { %4945 = vmatpush.msrb.mxu0 %v7366_v50  ;;  %v5099_v23 = vand.u32 4294901760, %v5098_v56  ;;  %v2757_v40 = vmul.f32 %v7424_v11, %v7424_v11  ;;  %v8396_v9 = vld [vmem:[#allocation21_spill] sm:$0xff] }
 0x376   : > { %3246 = vmatmul.f32.vlgmr.msrb.gmra.mxu3 %v6567_v22  ;;  %v3621_v3 = vand.u32 4294901760, %v8396_v9  ;;  %v2768_v14 = vmul.f32 %v2766_v35, %v2762_v4 }
 0x377   : > { %3490 = vmatpush.msrb.mxu3 %v8391_v42  ;;  %v2759_v42 = vmul.f32 %v7407_v39, %v7407_v39 }
 0x378   : > { %3215 = vmatmul.f32.gmra.mxu2 %v6618_v55  ;;  %v3622_v4 = vsub.f32 %v8396_v9, %v3621_v3  ;;  %v7450_v35 = vadd.f32 1e-12, %v2768_v14  ;;  %v8401_v9 = vld [vmem:[#allocation24_spill] sm:$0xff] }
 0x379   : > { %4656 = vmatmul.f32.gmra.mxu1 %v6587_v44  ;;  %3492 = vmatpush.msrb.mxu3 %v8392_v32  ;;  %v7415_v30 = vpop.f32.mrf.mxu3  ;;  %v7421_v45 = vpop.f32.mrf.mxu2  ;;  %v2731_v32 = vsub.f32 %v2346_v48, %v2729_v43  ;;  %v2761_v10 = vadd.f32 %v2759_v42, %v2757_v40  ;;  %v5105_v48 = vand.u32 4294901760, %v5104_v29  ;;  %v3616_v43 = vsub.f32 %v8394_v38, %v3615_v47  ;;  %v8400_v40 = vld [vmem:[#allocation25_spill] sm:$0xff] }
 0x37a   : > { %4621 = vmatmul.f32.gmra.mxu0 %v6618_v55  ;;  %v3398_v56 = vpop.f32.mrf.mxu0  ;;  %5987 = vrcp.f32 %v7450_v35  ;;  %vm2777_vm2 = vweird.f32 %v7450_v35 }
 0x37b   : > { %v3437_v49 = vpop.f32.mrf.mxu1  ;;  %v2765_v41 = vadd.f32 %v2735_v12, %v2731_v32  ;;  %v3617_v12 = vand.u32 4294901760, %v3616_v43  ;;  %v2763_v29 = vadd.f32 0.0001, %v2761_v10 }
 0x37c   : > { %v7446_v2 = vadd.f32 %v3437_v49, %v3398_v56  ;;  %v3623_v49 = vand.u32 4294901760, %v3622_v4  ;;  %v8402_v4 = vld [vmem:[#allocation23_spill] sm:$0xff] }
 0x37e   : > { %3250 = vmatmul.f32.gmra.mxu3 %v6587_v44  ;;  %8398 = vst [vmem:[#allocation79_spill] sm:$0xff] %v7446_v2  ;;  %v8405_v2 = vld [vmem:[#allocation38_spill] sm:$0xff] }
 0x380   : > { %3339 = vmatmul.f32.vlgmr.msra.gmra.mxu2 %v6567_v22  ;;  %v7464_v56 = vpop.eup %5987 }
 0x381   : > { %3579 = vmatpush.msra.mxu2 %v8395_v13  ;;  %4772 = vmatmul.f32.vlgmr.msra.gmra.mxu1 %v6567_v22  ;;  %v7443_v50 = vpop.f32.mrf.mxu3  ;;  %vm2778_vm1 = vweird.f32 %v7464_v56 }
 0x382   : > { %5100 = vmatpush.msra.mxu1 %v5099_v23  ;;  %4745 = vmatmul.f32.vlgmr.msra.gmra.mxu0 %v6567_v22  ;;  %v2631_v5 = vpop.f32.mrf.mxu2  ;;  %v2767_v23 = vadd.f32 0.0009, %v2765_v41  ;;  %v3406_v14 = vpop.f32.mrf.mxu0  ;;  %vm7538_vm3 = vmor %vm2777_vm2, %vm2778_vm1 }
 0x383   : > { %3581 = vmatpush.msra.mxu2 %v8397_v16  ;;  %5061 = vmatpush.msra.mxu0 %v7332_v57  ;;  %v3441_v42 = vpop.f32.mrf.mxu1 }
 0x384   : > { %5106 = vmatpush.msra.mxu1 %v5105_v48  ;;  %v2769_v38 = vmul.f32 %v2767_v23, %v2763_v29  ;;  %v7458_v41 = vadd.f32 %v3441_v42, %v3406_v14  ;;  %v864_v48 = vadd.f32 %v8401_v9, %v8400_v40  ;;  %v8403_v23 = vld [vmem:[#allocation22_spill] sm:$0xff]  ;;  %v8404_v29 = vld [vmem:[#allocation39_spill] sm:$0xff]  ;;  %v8409_v40 = vld [vmem:[#allocation60_spill] sm:$0xff] }
 0x385   : > { %5063 = vmatpush.msra.mxu0 %v7347_v17  ;;  %v8406_v42 = vld [vmem:[#allocation62_spill] sm:$0xff] }
 0x386   : > { %3366 = vmatmul.f32.vlgmr.msra.gmra.mxu3 %v6567_v22  ;;  %8399 = vst [vmem:[#allocation43_spill] sm:$0xff] %v7458_v41  ;;  %v7462_v43 = vadd.f32 1e-12, %v2769_v38  ;;  %v1069_v14 = vadd.f32 %v8406_v42, %v864_v48  ;;  %v8407_v41 = vld [vmem:[#allocation37_spill] sm:$0xff]  ;;  %v2773_v38 = vmul.f32 %v7464_v56, %v7450_v35 }
 0x387   : > { %3618 = vmatpush.msra.mxu3 %v3617_v12  ;;  %v860_v12 = vadd.f32 %v8403_v23, %v8402_v4  ;;  %v892_v52 = vadd.f32 %v8408_v1, %v8407_v41  ;;  %v2602_v1 = vadd.f32 %v7415_v30, %v7362_v62  ;;  %v8411_v41 = vld [vmem:[#allocation63_spill] sm:$0xff]  ;;  %v8417_v30 = vand.u32 4294901760, %v7384_v53 }
 0x388   : > { %3343 = vmatmul.f32.gmra.mxu2 %v6587_v44  ;;  %5989 = vrcp.f32 %v7462_v43  ;;  %v1312_v48 = vadd.f32 %v8411_v41, %v1069_v14  ;;  %vm2791_vm6 = vweird.f32 %v7462_v43 }
 0x389   : > { %4776 = vmatmul.f32.gmra.mxu1 %v6587_v44  ;;  %3624 = vmatpush.msra.mxu3 %v3623_v49  ;;  %v2661_v32 = vpop.f32.mrf.mxu3  ;;  %v896_v49 = vadd.f32 %v8405_v2, %v8404_v29  ;;  %v1064_v9 = vadd.f32 %v8409_v40, %v860_v12  ;;  %v8410_v2 = vld [vmem:[#allocation10_spill] sm:$0xff]  ;;  %v8412_v29 = vld [vmem:[#allocation8_spill] sm:$0xff]  ;;  %v2632_v12 = vadd.f32 %v2631_v5, %v2602_v1  ;;  %v8419_v5 = vld [vmem:[#allocation75_spill] sm:$0xff] }
 0x38a   : > { %4749 = vmatmul.f32.gmra.mxu0 %v6587_v44  ;;  %v1104_v42 = vadd.f32 %v8412_v29, %v892_v52  ;;  %v1527_v62 = vadd.f32 %v8416_v58, %v1312_v48  ;;  %v8420_v1 = vld [vmem:[#allocation41_spill] sm:$0xff]  ;;  %v8422_v29 = vld [vmem:[#allocation80_spill] sm:$0xff] }
 0x38b   : > { %v2636_v10 = vpop.f32.mrf.mxu2  ;;  %v1109_v4 = vadd.f32 %v8410_v2, %v896_v49  ;;  %v2774_v49 = vsub.f32 1.0, %v2773_v38  ;;  %v2662_v52 = vadd.f32 %v2661_v32, %v2632_v12  ;;  %v8421_v32 = vld [vmem:[#allocation76_spill] sm:$0xff]  ;;  %v8423_v12 = vld [vmem:[#allocation73_spill] sm:$0xff] }
 0x38c   : > { %v1706_v48 = vadd.f32 %v8421_v32, %v1527_v62 }
 0x38e   : > { %3370 = vmatmul.f32.gmra.mxu3 %v6587_v44  ;;  %v7490_v40 = vpop.eup %5989 }
 0x38f   : > { %vm2792_vm5 = vweird.f32 %v7490_v40 }
 0x390   : > { %3466 = vmatmul.f32.vlgmr.msrb.gmra.mxu2 %v6576_v20  ;;  %vm7588_vm7 = vmor %vm2791_vm6, %vm2792_vm5 }
 0x391   : > { %3713 = vmatpush.msrb.mxu2 %v3615_v47  ;;  %4978 = vmatmul.f32.vlgmr.msrb.gmra.mxu1 %v6584_v34  ;;  %v2667_v23 = vpop.f32.mrf.mxu3 }
 0x392   : > { %5224 = vmatpush.msrb.mxu1 %v7332_v57  ;;  %4948 = vmatmul.f32.vlgmr.msrb.gmra.mxu0 %v6576_v20  ;;  %v8415_v57 = vld [vmem:[#allocation15_spill] sm:$0xff] }
 0x393   : > { %3717 = vmatpush.msrb.mxu2 %v3621_v3  ;;  %v2694_v47 = vpop.f32.mrf.mxu2  ;;  %5195 = vmatpush.msrb.mxu0 %v8413_v18  ;;  %v8414_v3 = vld [vmem:[#allocation61_spill] sm:$0xff]  ;;  %v1360_v51 = vadd.f32 %v8415_v57, %v1109_v4  ;;  %v2775_v57 = vmul.f32 %v7464_v56, %v2774_v49  ;;  %v2787_v4 = vmul.f32 %v7490_v40, %v7462_v43 }
 0x394   : > { %5226 = vmatpush.msrb.mxu1 %v7347_v17  ;;  %v1306_v2 = vadd.f32 %v8414_v3, %v1064_v9  ;;  %v8418_v18 = vld [vmem:[#allocation13_spill] sm:$0xff]  ;;  %v2744_v9 = vmul.f32 %v7350_v8, %v7376_v61  ;;  %v2695_v58 = vadd.f32 %v2694_v47, %v2662_v52  ;;  %v2606_v8 = vadd.f32 %v7443_v50, %v7421_v45  ;;  %v8425_v50 = vld [vmem:[#allocation3_spill] sm:$0xff] }
 0x395   : > { %5199 = vmatpush.msrb.mxu0 %v8417_v30  ;;  %v1354_v14 = vadd.f32 %v8418_v18, %v1104_v42  ;;  %v1559_v41 = vadd.f32 %v8420_v1, %v1360_v51  ;;  %v8424_v3 = vld [vmem:[#allocation81_spill] sm:$0xff]  ;;  %v2776_v52 = vadd.f32 %v7464_v56, %v2775_v57  ;;  %v2788_v18 = vsub.f32 1.0, %v2787_v4 }
 0x396   : > { %3496 = vmatmul.f32.vlgmr.msrb.gmra.mxu3 %v6584_v34  ;;  %v1523_v38 = vadd.f32 %v8419_v5, %v1306_v2  ;;  %v2746_v62 = vmul.f32 2.0, %v2744_v9  ;;  %v2637_v30 = vadd.f32 %v2636_v10, %v2606_v8  ;;  %v2783_v5 = vand.u32 2147483648, %v7450_v35  ;;  %v8427_v9 = vld [vmem:[#allocation47_spill] sm:$0xff] }
 0x397   : > { %3742 = vmatpush.msrb.mxu3 %v8395_v13  ;;  %v1555_v42 = vadd.f32 %v8422_v29, %v1354_v14  ;;  %v2736_v13 = vmul.f32 %v7322_v28, %v7335_v36  ;;  %v1738_v2 = vadd.f32 %v8424_v3, %v1559_v41  ;;  %v7521_v14 = vand.u32 4294901760, %v1706_v48  ;;  %v8431_v29 = vld [vmem:[#allocation46_spill] sm:$0xff] }
 0x398   : > { %3471 = vmatmul.f32.gmra.mxu2 %v6598_v54  ;;  %v1702_v49 = vadd.f32 %v8423_v12, %v1523_v38  ;;  %v2668_v28 = vadd.f32 %v2667_v23, %v2637_v30  ;;  %v2781_v10 = vand.u32 2147483647, %v7450_v35  ;;  %v2745_v41 = vmul.f32 %v7407_v39, %v7424_v11  ;;  %v7580_v30 = vpop.f32.mrf.mxu1 }
 0x399   : > { %4984 = vmatmul.f32.gmra.mxu1 %v6604_v7  ;;  %3744 = vmatpush.msrb.mxu3 %v8397_v16  ;;  %v2721_v51 = vpop.f32.mrf.mxu3  ;;  %v1734_v45 = vadd.f32 %v8425_v50, %v1555_v42  ;;  %v7531_v1 = vand.u32 4294901760, %v1738_v2  ;;  %v2780_v35 = vsel %vm7538_vm3, %v7464_v56, %v2776_v52  ;;  %v2789_v32 = vmul.f32 %v7490_v40, %v2788_v18  ;;  %v8434_v50 = vld [vmem:[#allocation45_spill] sm:$0xff] }
 0x39a   : > { %4953 = vmatmul.f32.gmra.mxu0 %v6598_v54  ;;  %v2722_v61 = vadd.f32 %v2721_v51, %v2695_v58  ;;  %v7529_v38 = vand.u32 4294901760, %v1702_v49  ;;  %v2748_v58 = vadd.f32 0.0001, %v2746_v62  ;;  %v7548_v39 = vsub.f32 %v1706_v48, %v7521_v14 }
 0x39b   : > { %v2698_v47 = vpop.f32.mrf.mxu2  ;;  %8426 = vst [vmem:[#allocation67_spill] sm:$0xff] %v7531_v1  ;;  %v7550_v11 = vand.u32 4294901760, %v1734_v45  ;;  %v2784_v42 = vor.u32 1.1754944e-38, %v2783_v5  ;;  %vm2782_vm4 = vcmp.eq.f32.partialorder %v2781_v10, 8.507059e+37  ;;  %v2747_v12 = vmul.f32 2.0, %v2745_v41  ;;  %v7593_v5 = vpop.f32.mrf.mxu0  ;;  %v8437_v41 = vld [vmem:[#allocation44_spill] sm:$0xff] }
 0x39c   : > { %v2738_v16 = vsub.f32 %v2722_v61, %v2736_v13  ;;  %v2699_v4 = vadd.f32 %v2698_v47, %v2668_v28  ;;  %v2737_v61 = vmul.f32 %v7389_v15, %v7401_v26  ;;  %v7558_v48 = vsub.f32 %v1702_v49, %v7529_v38 }
 0x39d   : > { %8430 = vst [vmem:[#allocation26_spill] sm:$0xff] %v7550_v11  ;;  %v7561_v47 = vsub.f32 %v1738_v2, %v7531_v1  ;;  %v2785_v3 = vsel %vm2782_vm4, %v2784_v42, %v2780_v35  ;;  %v2790_v49 = vadd.f32 %v7490_v40, %v2789_v32  ;;  %v7574_v2 = vsub.f32 %v1734_v45, %v7550_v11 }
 0x39e   : > { %3502 = vmatmul.f32.gmra.mxu3 %v6604_v7  ;;  %v2750_v36 = vmul.f32 2.0, %v2738_v16  ;;  %v2797_v62 = vand.u32 2147483648, %v7462_v43  ;;  %v2795_v52 = vand.u32 2147483647, %v7462_v43  ;;  %v2749_v28 = vadd.f32 0.0001, %v2747_v12 }
 0x39f   : > { %8432 = vst [vmem:[#allocation9_spill] sm:$0xff] %v7561_v47  ;;  %v5477_v18 = vand.u32 4294901760, %v7561_v47  ;;  %v2794_v10 = vsel %vm7588_vm7, %v7490_v40, %v2790_v49  ;;  %v5483_v43 = vand.u32 4294901760, %v7574_v2  ;;  %v8438_v40 = vld [vmem:[#allocation55_spill] sm:$0xff] }
 0x3a0   : > { %3587 = vmatmul.f32.vlgmr.msra.gmra.mxu2 %v6600_v59  ;;  %v2752_v23 = vadd.f32 0.0009, %v2750_v36  ;;  %8433 = vst [vmem:[#allocation42_spill] sm:$0xff] %v7574_v2  ;;  %vm2796_vm8 = vcmp.eq.f32.partialorder %v2795_v52, 8.507059e+37  ;;  %v4071_v42 = vand.u32 4294901760, %v8438_v40  ;;  %v7615_v12 = vpop.f32.mrf.mxu1 }
 0x3a1   : > { %3916 = vmatpush.msra.mxu2 %v8427_v9  ;;  %5108 = vmatmul.f32.vlgmr.msra.gmra.mxu1 %v6567_v22  ;;  %v2725_v51 = vpop.f32.mrf.mxu3  ;;  %v2798_v9 = vor.u32 1.1754944e-38, %v2797_v62 }
 0x3a2   : > { %5352 = vmatpush.msra.mxu1 %v7521_v14  ;;  %5069 = vmatmul.f32.vlgmr.msra.gmra.mxu0 %v6600_v59  ;;  %v2754_v8 = vmul.f32 %v2752_v23, %v2748_v58  ;;  %v2726_v56 = vadd.f32 %v2725_v51, %v2699_v4  ;;  %v5478_v4 = vsub.f32 %v7561_v47, %v5477_v18 }
 0x3a3   : > { %3919 = vmatpush.msra.mxu2 %v8431_v29  ;;  %v2828_v13 = vpop.f32.mrf.mxu2  ;;  %5322 = vmatpush.msra.mxu0 %v7548_v39  ;;  %v2799_v32 = vsel %vm2796_vm8, %v2798_v9, %v2794_v10  ;;  %v5484_v51 = vsub.f32 %v7574_v2, %v5483_v43  ;;  %v7620_v62 = vpop.f32.mrf.mxu0 }
 0x3a4   : > { %5354 = vmatpush.msra.mxu1 %v7529_v38  ;;  %v2800_v15 = vmul.f32 %v2785_v3, %v2754_v8  ;;  %v2739_v26 = vsub.f32 %v2726_v56, %v2737_v61  ;;  %v8439_v8 = vld [vmem:[#allocation20_spill] sm:$0xff]  ;;  %v5479_v56 = vand.u32 4294901760, %v5478_v4  ;;  %v8440_v61 = vld [vmem:[#allocation51_spill] sm:$0xff] }
 0x3a5   : > { %5325 = vmatpush.msra.mxu0 %v7558_v48  ;;  %v8441_v3 = vld [vmem:[#allocation19_spill] sm:$0xff] }
 0x3a6   : > { %3626 = vmatmul.f32.vlgmr.msra.gmra.mxu3 %v6567_v22  ;;  %2802 = vst.msk [vmem:[%s7569_s9] sm:$0xff] %vm283_vm0, %v2800_v15  ;;  %v2751_v16 = vmul.f32 2.0, %v2739_v26  ;;  %v5485_v15 = vand.u32 4294901760, %v5484_v51  ;;  %v4072_v26 = vsub.f32 %v8438_v40, %v4071_v42  ;;  %v8445_v40 = vld [vmem:[#allocation53_spill] sm:$0xff] }
 0x3a7   : > { %3946 = vmatpush.msra.mxu3 %v8434_v50 }
 0x3a8   : > { %3595 = vmatmul.f32.gmra.mxu2 %v6618_v55  ;;  %v2753_v36 = vadd.f32 0.0009, %v2751_v16 }
 0x3a9   : > { %5112 = vmatmul.f32.gmra.mxu1 %v6587_v44  ;;  %3948 = vmatpush.msra.mxu3 %v8437_v41  ;;  %v2867_v58 = vpop.f32.mrf.mxu3  ;;  %v7629_v41 = vpop.f32.mrf.mxu1 }
 0x3aa   : > { %5077 = vmatmul.f32.gmra.mxu0 %v6618_v55  ;;  %v2755_v57 = vmul.f32 %v2753_v36, %v2749_v28  ;;  %v2868_v35 = vadd.f32 %v2867_v58, %v2828_v13  ;;  %v4077_v13 = vand.u32 4294901760, %v8440_v61  ;;  %v4073_v28 = vand.u32 4294901760, %v4072_v26 }
 0x3ab   : > { %v2836_v23 = vpop.f32.mrf.mxu2 }
 0x3ac   : > { %v2801_v29 = vmul.f32 %v2799_v32, %v2755_v57  ;;  %v4078_v50 = vsub.f32 %v8440_v61, %v4077_v13  ;;  %v8442_v57 = vld [vmem:[#allocation59_spill] sm:$0xff]  ;;  %v7633_v32 = vpop.f32.mrf.mxu0 }
 0x3ae   : > { %3630 = vmatmul.f32.gmra.mxu3 %v6587_v44  ;;  %2803 = vst.msk [vmem:[%s7569_s9 + $0x8] sm:$0xff] %vm283_vm0, %v2801_v29  ;;  %v4079_v36 = vand.u32 4294901760, %v4078_v50  ;;  %v8444_v29 = vld [vmem:[#allocation56_spill] sm:$0xff]  ;;  %v8448_v50 = vld [vmem:[#allocation74_spill] sm:$0xff] }
 0x3af   : > { %v924_v51 = vadd.f32 %v8445_v40, %v8444_v29 }
 0x3b0   : > { %3719 = vmatmul.f32.vlgmr.msrb.gmra.mxu2 %v6567_v22 }
 0x3b1   : > { %4035 = vmatpush.msrb.mxu2 %v8439_v8  ;;  %5228 = vmatmul.f32.vlgmr.msrb.gmra.mxu1 %v6567_v22  ;;  %v2871_v49 = vpop.f32.mrf.mxu3 }
 0x3b2   : > { %5480 = vmatpush.msrb.mxu1 %v5479_v56  ;;  %5201 = vmatmul.f32.vlgmr.msrb.gmra.mxu0 %v6567_v22  ;;  %v2872_v16 = vadd.f32 %v2871_v49, %v2836_v23  ;;  %v8443_v23 = vld [vmem:[#allocation57_spill] sm:$0xff]  ;;  %v8446_v56 = vld [vmem:[#allocation72_spill] sm:$0xff] }
 0x3b3   : > { %4037 = vmatpush.msrb.mxu2 %v8441_v3  ;;  %v2897_v52 = vpop.f32.mrf.mxu2  ;;  %5441 = vmatpush.msrb.mxu0 %v7531_v1 }
 0x3b4   : > { %5486 = vmatpush.msrb.mxu1 %v5485_v15  ;;  %v2898_v45 = vadd.f32 %v2897_v52, %v2868_v35  ;;  %v928_v35 = vadd.f32 %v8443_v23, %v8442_v57  ;;  %v8447_v15 = vld [vmem:[#allocation14_spill] sm:$0xff] }
 0x3b5   : > { %5443 = vmatpush.msrb.mxu0 %v7550_v11  ;;  %v1144_v26 = vadd.f32 %v8447_v15, %v924_v51  ;;  %v8456_v15 = vld [vmem:[#allocation18_spill] sm:$0xff] }
 0x3b6   : > { %3746 = vmatmul.f32.vlgmr.msrb.gmra.mxu3 %v6567_v22  ;;  %v1149_v61 = vadd.f32 %v8446_v56, %v928_v35 }
 0x3b7   : > { %4074 = vmatpush.msrb.mxu3 %v4073_v28  ;;  %v7648_v28 = vpop.f32.mrf.mxu1 }
 0x3b8   : > { %3723 = vmatmul.f32.gmra.mxu2 %v6587_v44 }
 0x3b9   : > { %5232 = vmatmul.f32.gmra.mxu1 %v6587_v44  ;;  %4080 = vmatpush.msrb.mxu3 %v4079_v36  ;;  %v2927_v10 = vpop.f32.mrf.mxu3  ;;  %v8449_v36 = vld [vmem:[#allocation16_spill] sm:$0xff] }
 0x3ba   : > { %5205 = vmatmul.f32.gmra.mxu0 %v6587_v44  ;;  %v2928_v58 = vadd.f32 %v2927_v10, %v2898_v45  ;;  %v1408_v45 = vadd.f32 %v8448_v50, %v1149_v61  ;;  %v1402_v10 = vadd.f32 %v8449_v36, %v1144_v26  ;;  %v4457_v50 = vand.u32 4294901760, %v7220_v37 }
 0x3bb   : > { %v2902_v9 = vpop.f32.mrf.mxu2 }
 0x3bc   : > { %v2903_v4 = vadd.f32 %v2902_v9, %v2872_v16  ;;  %v1591_v9 = vadd.f32 %v7266_v27, %v1408_v45 }
 0x3be   : > { %3750 = vmatmul.f32.gmra.mxu3 %v6587_v44 }
 0x3c0   : > { %3922 = vmatmul.f32.vlgmr.msra.gmra.mxu2 %v6576_v20 }
 0x3c1   : > { %4169 = vmatpush.msra.mxu2 %v4071_v42  ;;  %5358 = vmatmul.f32.vlgmr.msra.gmra.mxu1 %v6584_v34  ;;  %v2933_v49 = vpop.f32.mrf.mxu3 }
 0x3c2   : > { %5604 = vmatpush.msra.mxu1 %v7531_v1  ;;  %5328 = vmatmul.f32.vlgmr.msra.gmra.mxu0 %v6576_v20  ;;  %v2934_v16 = vadd.f32 %v2933_v49, %v2903_v4 }
 0x3c3   : > { %4173 = vmatpush.msra.mxu2 %v4077_v13  ;;  %v2960_v52 = vpop.f32.mrf.mxu2  ;;  %5575 = vmatpush.msra.mxu0 %v5477_v18  ;;  %v7656_v13 = vpop.f32.mrf.mxu0  ;;  %v1587_v18 = vadd.f32 %v7248_v0, %v1402_v10  ;;  %v4458_v10 = vsub.f32 %v7220_v37, %v4457_v50 }
 0x3c4   : > { %5606 = vmatpush.msra.mxu1 %v7550_v11  ;;  %v2961_v42 = vadd.f32 %v2960_v52, %v2928_v58  ;;  %v1770_v58 = vadd.f32 %v7256_v21, %v1591_v9  ;;  %v7669_v0 = vpop.f32.mrf.mxu1  ;;  %v4451_v52 = vand.u32 4294901760, %v7210_v19 }
 0x3c5   : > { %5579 = vmatpush.msra.mxu0 %v5483_v43  ;;  %v1766_v23 = vadd.f32 %v7238_v6, %v1587_v18  ;;  %v8454_v6 = vld [vmem:[#allocation54_spill] sm:$0xff]  ;;  %v4459_v18 = vand.u32 4294901760, %v4458_v10 }
 0x3c6   : > { %3952 = vmatmul.f32.vlgmr.msra.gmra.mxu3 %v6584_v34  ;;  %v7667_v4 = vand.u32 4294901760, %v1770_v58  ;;  %v4452_v45 = vsub.f32 %v7210_v19, %v4451_v52 }
 0x3c7   : > { %4198 = vmatpush.msra.mxu3 %v8439_v8  ;;  %v7673_v21 = vand.u32 4294901760, %v1766_v23  ;;  %v8452_v8 = vld [vmem:[#allocation58_spill] sm:$0xff] }
 0x3c8   : > { %3927 = vmatmul.f32.gmra.mxu2 %v6598_v54  ;;  %8450 = vst [vmem:[#allocation7_spill] sm:$0xff] %v7667_v4  ;;  %v7680_v29 = vsub.f32 %v1770_v58, %v7667_v4  ;;  %v4453_v9 = vand.u32 4294901760, %v4452_v45 }
 0x3c9   : > { %5364 = vmatmul.f32.gmra.mxu1 %v6604_v7  ;;  %4200 = vmatpush.msra.mxu3 %v8441_v3  ;;  %v2987_v27 = vpop.f32.mrf.mxu3  ;;  %8451 = vst [vmem:[#allocation17_spill] sm:$0xff] %v7673_v21  ;;  %v7688_v61 = vsub.f32 %v1766_v23, %v7673_v21 }
 0x3ca   : > { %5333 = vmatmul.f32.gmra.mxu0 %v6598_v54  ;;  %v7664_v57 = vadd.f32 %v2987_v27, %v2961_v42  ;;  %8453 = vst [vmem:[#allocation28_spill] sm:$0xff] %v7680_v29 }
 0x3cb   : > { %v2964_v43 = vpop.f32.mrf.mxu2  ;;  %v7677_v3 = vpop.f32.mrf.mxu0  ;;  %8455 = vst [vmem:[#allocation65_spill] sm:$0xff] %v7688_v61 }
 0x3cc   : > { %v2965_v35 = vadd.f32 %v2964_v43, %v2934_v16  ;;  %v3766_v19 = vadd.f32 0.5, %v7664_v57 }
 0x3ce   : > { %3958 = vmatmul.f32.gmra.mxu3 %v6604_v7 }
 0x3d0   : > { %4043 = vmatmul.f32.vlgmr.msrb.gmra.mxu2 %v6600_v59 }
 0x3d1   : > { %4296 = vmatpush.msrb.mxu2 %v8452_v8  ;;  %5488 = vmatmul.f32.vlgmr.msrb.gmra.mxu1 %v6567_v22  ;;  %v2991_v40 = vpop.f32.mrf.mxu3 }
 0x3d2   : > { %5732 = vmatpush.msrb.mxu1 %v7667_v4  ;;  %5449 = vmatmul.f32.vlgmr.msrb.gmra.mxu0 %v6600_v59  ;;  %v7685_v51 = vadd.f32 %v2991_v40, %v2965_v35  ;;  %v8467_v4 = vld [vmem:[#allocation49_spill] sm:$0xff] }
 0x3d3   : > { %4299 = vmatpush.msrb.mxu2 %v8454_v6  ;;  %v3018_v56 = vpop.f32.mrf.mxu2  ;;  %5702 = vmatpush.msrb.mxu0 %v7680_v29 }
 0x3d4   : > { %5734 = vmatpush.msrb.mxu1 %v7673_v21 }
 0x3d5   : > { %5705 = vmatpush.msrb.mxu0 %v7688_v61 }
 0x3d6   : > { %4082 = vmatmul.f32.vlgmr.msrb.gmra.mxu3 %v6567_v22 }
 0x3d7   : > { %4326 = vmatpush.msrb.mxu3 %v8456_v15 }
 0x3d8   : > { %4051 = vmatmul.f32.gmra.mxu2 %v6618_v55 }
 0x3d9   : > { %4328 = vmatpush.msrb.mxu3 %v7097_v31  ;;  %v3057_v26 = vpop.f32.mrf.mxu3 }
 0x3da   : > { %v3058_v16 = vadd.f32 %v3057_v26, %v3018_v56 }
 0x3db   : > { %v3026_v49 = vpop.f32.mrf.mxu2 }
 0x3de   : > { %4086 = vmatmul.f32.gmra.mxu3 %v6587_v44 }
 0x3e0   : > { %4175 = vmatmul.f32.vlgmr.msra.gmra.mxu2 %v6567_v22 }
 0x3e1   : > { %4415 = vmatpush.msra.mxu2 %v7197_v24  ;;  %v3061_v42 = vpop.f32.mrf.mxu3 }
 0x3e2   : > { %v3062_v36 = vadd.f32 %v3061_v42, %v3026_v49  ;;  %v8457_v42 = vld [vmem:[#allocation50_spill] sm:$0xff] }
 0x3e3   : > { %4417 = vmatpush.msra.mxu2 %v7203_v33  ;;  %v3087_v31 = vpop.f32.mrf.mxu2 }
 0x3e4   : > { %v3088_v58 = vadd.f32 %v3087_v31, %v3058_v16 }
 0x3e6   : > { %4202 = vmatmul.f32.vlgmr.msra.gmra.mxu3 %v6567_v22 }
 0x3e7   : > { %4454 = vmatpush.msra.mxu3 %v4453_v9 }
 0x3e8   : > { %4179 = vmatmul.f32.gmra.mxu2 %v6587_v44 }
 0x3e9   : > { %4460 = vmatpush.msra.mxu3 %v4459_v18  ;;  %v3117_v27 = vpop.f32.mrf.mxu3 }
 0x3ea   : > { %v3118_v23 = vadd.f32 %v3117_v27, %v3088_v58 }
 0x3eb   : > { %v3092_v43 = vpop.f32.mrf.mxu2 }
 0x3ec   : > { %v3151_v35 = vadd.f32 %v7284_v63, %v3118_v23  ;;  %v3093_v8 = vadd.f32 %v3092_v43, %v3062_v36  ;;  %v3782_v63 = vmul.f32 %v3766_v19, %v3766_v19  ;;  %v8459_v43 = vld [vmem:[#allocation52_spill] sm:$0xff] }
 0x3ee   : > { %4206 = vmatmul.f32.gmra.mxu3 %v6587_v44  ;;  %v7712_v37 = vadd.f32 %v7269_v25, %v3151_v35 }
 0x3f0   : > { %4302 = vmatmul.f32.vlgmr.msrb.gmra.mxu2 %v6576_v20  ;;  %v3768_v6 = vadd.f32 0.5, %v7712_v37  ;;  %v7717_v40 = vmul.f32 %v7712_v37, %v7664_v57 }
 0x3f1   : > { %4549 = vmatpush.msrb.mxu2 %v4451_v52  ;;  %v3123_v56 = vpop.f32.mrf.mxu3  ;;  %v3767_v52 = vadd.f32 0.5, %v7685_v51 }
 0x3f2   : > { %v3784_v15 = vmul.f32 %v3768_v6, %v3768_v6  ;;  %v3124_v26 = vadd.f32 %v3123_v56, %v3093_v8  ;;  %v7719_v16 = vmul.f32 %v3768_v6, %v3766_v19  ;;  %v8461_v19 = vld [vmem:[#allocation33_spill] sm:$0xff]  ;;  %v8462_v56 = vld [vmem:[#allocation11_spill] sm:$0xff] }
 0x3f3   : > { %4553 = vmatpush.msrb.mxu2 %v4457_v50  ;;  %v3208_v49 = vpop.f32.mrf.mxu2  ;;  %v3783_v10 = vmul.f32 %v3767_v52, %v3767_v52 }
 0x3f4   : > { %v7721_v45 = vadd.f32 %v3784_v15, %v3782_v63  ;;  %v3155_v25 = vadd.f32 %v7310_v46, %v3124_v26  ;;  %v4907_v63 = vand.u32 4294901760, %v8462_v56  ;;  %v8463_v15 = vld [vmem:[#allocation6_spill] sm:$0xff]  ;;  %v8464_v26 = vld [vmem:[#allocation40_spill] sm:$0xff] }
 0x3f6   : > { %4332 = vmatmul.f32.vlgmr.msrb.gmra.mxu3 %v6584_v34  ;;  %v7728_v36 = vadd.f32 %v8457_v42, %v3155_v25  ;;  %v4913_v25 = vand.u32 4294901760, %v8464_v26  ;;  %v8465_v42 = vld [vmem:[#allocation48_spill] sm:$0xff] }
 0x3f7   : > { %4578 = vmatpush.msrb.mxu3 %v7197_v24  ;;  %v8458_v24 = vld [vmem:[#allocation32_spill] sm:$0xff] }
 0x3f8   : > { %4307 = vmatmul.f32.gmra.mxu2 %v6598_v54  ;;  %v3769_v50 = vadd.f32 0.5, %v7728_v36  ;;  %v7734_v31 = vmul.f32 %v7728_v36, %v7685_v51 }
 0x3f9   : > { %4580 = vmatpush.msrb.mxu3 %v7203_v33  ;;  %v3247_v46 = vpop.f32.mrf.mxu3  ;;  %v8460_v33 = vld [vmem:[#allocation34_spill] sm:$0xff] }
 0x3fa   : > { %v3785_v9 = vmul.f32 %v3769_v50, %v3769_v50  ;;  %v7737_v58 = vmul.f32 %v3769_v50, %v3767_v52  ;;  %v3248_v52 = vadd.f32 %v3247_v46, %v3208_v49  ;;  %v4908_v50 = vsub.f32 %v8462_v56, %v4907_v63  ;;  %v8468_v46 = vld [vmem:[#allocation79_spill] sm:$0xff] }
 0x3fb   : > { %v3216_v18 = vpop.f32.mrf.mxu2 }
 0x3fc   : > { %v7739_v27 = vadd.f32 %v3785_v9, %v3783_v10 }
 0x3fe   : > { %4338 = vmatmul.f32.gmra.mxu3 %v6604_v7 }
 0x400   : > { %4423 = vmatmul.f32.vlgmr.msra.gmra.mxu2 %v6600_v59 }
 0x401   : > { %4676 = vmatpush.msra.mxu2 %v8458_v24  ;;  %v3251_v23 = vpop.f32.mrf.mxu3  ;;  %v4914_v24 = vsub.f32 %v8464_v26, %v4913_v25  ;;  %v8469_v26 = vld [vmem:[#allocation77_spill] sm:$0xff] }
 0x402   : > { %v3252_v61 = vadd.f32 %v3251_v23, %v3216_v18  ;;  %v3754_v18 = vmul.f32 %v7664_v57, %v7664_v57  ;;  %v8470_v23 = vld [vmem:[#allocation27_spill] sm:$0xff]  ;;  %v3788_v57 = vadd.f32 0.0001, %v7721_v45 }
 0x403   : > { %4679 = vmatpush.msra.mxu2 %v8459_v43  ;;  %v3340_v35 = vpop.f32.mrf.mxu2  ;;  %v8466_v43 = vld [vmem:[#allocation71_spill] sm:$0xff]  ;;  %v4915_v21 = vand.u32 4294901760, %v4914_v24 }
 0x404   : > { %v3283_v47 = vadd.f32 %v8469_v26, %v3252_v61  ;;  %v8471_v61 = vld [vmem:[#allocation43_spill] sm:$0xff] }
 0x406   : > { %4462 = vmatmul.f32.vlgmr.msra.gmra.mxu3 %v6567_v22 }
 0x407   : > { %4706 = vmatpush.msra.mxu3 %v8460_v33  ;;  %v3278_v33 = vadd.f32 %v8466_v43, %v3248_v52 }
 0x408   : > { %4431 = vmatmul.f32.gmra.mxu2 %v6618_v55 }
 0x409   : > { %4708 = vmatpush.msra.mxu3 %v8461_v19  ;;  %v3367_v8 = vpop.f32.mrf.mxu3  ;;  %v4909_v19 = vand.u32 4294901760, %v4908_v50  ;;  %v3308_v49 = vadd.f32 %v8467_v4, %v3278_v33 }
 0x40b   : > { %v3344_v6 = vpop.f32.mrf.mxu2  ;;  %v3341_v11 = vadd.f32 %v3340_v35, %v3308_v49 }
 0x40d   : > { %v3368_v52 = vadd.f32 %v3367_v8, %v3341_v11 }
 0x40e   : > { %4466 = vmatmul.f32.gmra.mxu3 %v6587_v44 }
 0x40f   : > { %v3756_v35 = vsub.f32 %v3368_v52, %v3754_v18 }
 0x410   : > { %4555 = vmatmul.f32.vlgmr.msrb.gmra.mxu2 %v6567_v22 }
 0x411   : > { %4871 = vmatpush.msrb.mxu2 %v8463_v15  ;;  %v3371_v10 = vpop.f32.mrf.mxu3 }
 0x413   : > { %4873 = vmatpush.msrb.mxu2 %v8465_v42  ;;  %v3467_v9 = vpop.f32.mrf.mxu2 }
 0x414   : > { %v3468_v29 = vadd.f32 %v3467_v9, %v8468_v46 }
 0x416   : > { %4582 = vmatmul.f32.vlgmr.msrb.gmra.mxu3 %v6567_v22 }
 0x417   : > { %4910 = vmatpush.msrb.mxu3 %v4909_v19 }
 0x418   : > { %4559 = vmatmul.f32.gmra.mxu2 %v6587_v44 }
 0x419   : > { %4916 = vmatpush.msrb.mxu3 %v4915_v21  ;;  %v3497_v56 = vpop.f32.mrf.mxu3  ;;  %v3758_v21 = vmul.f32 %v7712_v37, %v7712_v37  ;;  %v3755_v37 = vmul.f32 %v7685_v51, %v7685_v51  ;;  %v3897_v51 = vpop.f32.mrf.mxu1  ;;  %5492 = vmatmul.f32.gmra.mxu1 %v6587_v44 }
 0x41a   : > { %v3498_v2 = vadd.f32 %v3497_v56, %v3468_v29  ;;  %v3314_v29 = vadd.f32 %v8470_v23, %v3283_v47 }
 0x41b   : > { %v3472_v1 = vpop.f32.mrf.mxu2 }
 0x41c   : > { %v3531_v50 = vadd.f32 %v7593_v5, %v3498_v2  ;;  %v3473_v11 = vadd.f32 %v3472_v1, %v8471_v61  ;;  %v3345_v5 = vadd.f32 %v3344_v6, %v3314_v29  ;;  %v3759_v6 = vmul.f32 %v7728_v36, %v7728_v36 }
 0x41d   : > { %v3789_v36 = vadd.f32 0.0001, %v7739_v27 }
 0x41e   : > { %4586 = vmatmul.f32.gmra.mxu3 %v6587_v44  ;;  %v3558_v4 = vadd.f32 %v7580_v30, %v3531_v50  ;;  %v3372_v33 = vadd.f32 %v3371_v10, %v3345_v5 }
 0x420   : > { %4682 = vmatmul.f32.vlgmr.msra.gmra.mxu2 %v6576_v20  ;;  %v3760_v8 = vsub.f32 %v3558_v4, %v3758_v21  ;;  %v3757_v45 = vsub.f32 %v3372_v33, %v3755_v37  ;;  %v3772_v33 = vmul.f32 2.0, %v7719_v16  ;;  %v5287_v37 = vand.u32 4294901760, %v7548_v39 }
 0x421   : > { %5005 = vmatpush.msra.mxu2 %v4907_v63  ;;  %v3503_v2 = vpop.f32.mrf.mxu3  ;;  %v3862_v63 = vpop.f32.mrf.mxu0  ;;  %5457 = vmatmul.f32.gmra.mxu0 %v6618_v55 }
 0x422   : > { %v3790_v9 = vadd.f32 %v3760_v8, %v3756_v35  ;;  %v3504_v24 = vadd.f32 %v3503_v2, %v3473_v11  ;;  %v7795_v52 = vadd.f32 %v3897_v51, %v3862_v63  ;;  %v7802_v27 = vpop.f32.mrf.mxu1  ;;  %5608 = vmatmul.f32.vlgmr.msra.gmra.mxu1 %v6567_v22 }
 0x423   : > { %5009 = vmatpush.msra.mxu2 %v4913_v25  ;;  %v3588_v43 = vpop.f32.mrf.mxu2 }
 0x424   : > { %v3792_v30 = vadd.f32 0.0009, %v3790_v9  ;;  %v3535_v19 = vadd.f32 %v7620_v62, %v3504_v24 }
 0x426   : > { %4712 = vmatmul.f32.vlgmr.msra.gmra.mxu3 %v6584_v34  ;;  %v3794_v1 = vmul.f32 %v3792_v30, %v3788_v57  ;;  %v3562_v47 = vadd.f32 %v7615_v12, %v3535_v19 }
 0x427   : > { %5034 = vmatpush.msra.mxu3 %v8463_v15 }
 0x428   : > { %4687 = vmatmul.f32.gmra.mxu2 %v6598_v54  ;;  %v7784_v62 = vadd.f32 1e-12, %v3794_v1  ;;  %v3761_v25 = vsub.f32 %v3562_v47, %v3759_v6  ;;  %v5293_v47 = vand.u32 4294901760, %v7558_v48  ;;  %v3774_v6 = vadd.f32 0.0001, %v3772_v33 }
 0x429   : > { %5036 = vmatpush.msra.mxu3 %v8465_v42  ;;  %v3627_v10 = vpop.f32.mrf.mxu3  ;;  %v7792_v26 = vpop.f32.mrf.mxu0  ;;  %5581 = vmatmul.f32.vlgmr.msra.gmra.mxu0 %v6567_v22 }
 0x42a   : > { %5991 = vrcp.f32 %v7784_v62  ;;  %v3791_v12 = vadd.f32 %v3761_v25, %v3757_v45  ;;  %v3628_v56 = vadd.f32 %v3627_v10, %v3588_v43  ;;  %v7820_v2 = vpop.f32.mrf.mxu1  ;;  %5612 = vmatmul.f32.gmra.mxu1 %v6587_v44  ;;  %vm3803_vm10 = vweird.f32 %v7784_v62 }
 0x42b   : > { %v3596_v49 = vpop.f32.mrf.mxu2  ;;  %v5288_v10 = vsub.f32 %v7548_v39, %v5287_v37 }
 0x42c   : > { %v3793_v46 = vadd.f32 0.0009, %v3791_v12 }
 0x42e   : > { %4718 = vmatmul.f32.gmra.mxu3 %v6604_v7  ;;  %v3795_v15 = vmul.f32 %v3793_v46, %v3789_v36 }
 0x430   : > { %4879 = vmatmul.f32.vlgmr.msrb.gmra.mxu2 %v6600_v59  ;;  %v7798_v42 = vpop.eup %5991  ;;  %v7800_v50 = vadd.f32 1e-12, %v3795_v15 }
 0x431   : > { %5132 = vmatpush.msrb.mxu2 %v7370_v60  ;;  %v3631_v18 = vpop.f32.mrf.mxu3  ;;  %v3799_v4 = vmul.f32 %v7798_v42, %v7784_v62  ;;  %v3658_v60 = vadd.f32 %v7633_v32, %v3628_v56  ;;  %v7813_v61 = vpop.f32.mrf.mxu0  ;;  %5585 = vmatmul.f32.gmra.mxu0 %v6587_v44  ;;  %vm3804_vm9 = vweird.f32 %v7798_v42  ;;  %v3894_v56 = vadd.f32 %v7669_v0, %v7677_v3 }
 0x432   : > { %5993 = vrcp.f32 %v7800_v50  ;;  %v3632_v29 = vadd.f32 %v3631_v18, %v3596_v49  ;;  %vm7842_vm11 = vmor %vm3803_vm10, %vm3804_vm9  ;;  %v7851_v51 = vpop.f32.mrf.mxu1  ;;  %5738 = vmatmul.f32.vlgmr.msrb.gmra.mxu1 %v6584_v34  ;;  %vm3817_vm14 = vweird.f32 %v7800_v50  ;;  %v3821_v0 = vand.u32 2147483647, %v7800_v50 }
 0x433   : > { %5135 = vmatpush.msrb.mxu2 %v7384_v53  ;;  %v3720_v21 = vpop.f32.mrf.mxu2  ;;  %v3800_v23 = vsub.f32 1.0, %v3799_v4  ;;  %v3688_v35 = vadd.f32 %v7629_v41, %v3658_v60  ;;  %v8472_v53 = vld [vmem:[#allocation4_spill] sm:$0xff]  ;;  %v3773_v4 = vmul.f32 2.0, %v7737_v58  ;;  %v8482_v58 = vld [vmem:[#allocation7_spill] sm:$0xff] }
 0x434   : > { %v3663_v9 = vadd.f32 %v7656_v13, %v3632_v29  ;;  %v5289_v29 = vand.u32 4294901760, %v5288_v10  ;;  %vm3822_vm1 = vcmp.eq.f32.partialorder %v3821_v0, 8.507059e+37 }
 0x435   : > { %v3721_v8 = vadd.f32 %v3720_v21, %v3688_v35  ;;  %v3801_v32 = vmul.f32 %v7798_v42, %v3800_v23  ;;  %v3823_v35 = vand.u32 2147483648, %v7800_v50 }
 0x436   : > { %4918 = vmatmul.f32.vlgmr.msrb.gmra.mxu3 %v6567_v22  ;;  %v3694_v13 = vadd.f32 %v7648_v28, %v3663_v9 }
 0x437   : > { %5162 = vmatpush.msrb.mxu3 %v8472_v53  ;;  %v3802_v30 = vadd.f32 %v7798_v42, %v3801_v32  ;;  %v3775_v53 = vadd.f32 0.0001, %v3773_v4 }
 0x438   : > { %4887 = vmatmul.f32.gmra.mxu2 %v6618_v55  ;;  %v7817_v11 = vpop.eup %5993 }
 0x439   : > { %5164 = vmatpush.msrb.mxu3 %v7347_v17  ;;  %v3747_v5 = vpop.f32.mrf.mxu3  ;;  %v3813_v41 = vmul.f32 %v7817_v11, %v7800_v50  ;;  %v3809_v17 = vand.u32 2147483648, %v7784_v62  ;;  %v7838_v16 = vpop.f32.mrf.mxu0  ;;  %5708 = vmatmul.f32.vlgmr.msrb.gmra.mxu0 %v6576_v20  ;;  %v3806_v25 = vsel %vm7842_vm11, %v7798_v42, %v3802_v30  ;;  %v5294_v42 = vsub.f32 %v7558_v48, %v5293_v47 }
 0x43a   : > { %v3748_v43 = vadd.f32 %v3747_v5, %v3721_v8  ;;  %vm3818_vm13 = vweird.f32 %v7817_v11  ;;  %v3824_v50 = vor.u32 1.1754944e-38, %v3823_v35 }
 0x43b   : > { %v3724_v24 = vpop.f32.mrf.mxu2  ;;  %v3814_v19 = vsub.f32 1.0, %v3813_v41  ;;  %v3810_v12 = vor.u32 1.1754944e-38, %v3809_v17  ;;  %vm7872_vm15 = vmor %vm3817_vm14, %vm3818_vm13  ;;  %v4149_v41 = vpop.f32.mrf.mxu1  ;;  %5744 = vmatmul.f32.gmra.mxu1 %v6604_v7 }
 0x43c   : > { %v3764_v57 = vsub.f32 %v3748_v43, %v7717_v40  ;;  %v3807_v40 = vand.u32 2147483647, %v7784_v62  ;;  %v3725_v45 = vadd.f32 %v3724_v24, %v3694_v13 }
 0x43d   : > { %v3815_v62 = vmul.f32 %v7817_v11, %v3814_v19 }
 0x43e   : > { %4922 = vmatmul.f32.gmra.mxu3 %v6587_v44  ;;  %v3776_v1 = vmul.f32 2.0, %v3764_v57  ;;  %vm3808_vm12 = vcmp.eq.f32.partialorder %v3807_v40, 8.507059e+37 }
 0x43f   : > { %v3811_v18 = vsel %vm3808_vm12, %v3810_v12, %v3806_v25  ;;  %v3816_v23 = vadd.f32 %v7817_v11, %v3815_v62  ;;  %v8477_v25 = vld [vmem:[#allocation9_spill] sm:$0xff]  ;;  %v8478_v62 = vld [vmem:[#allocation42_spill] sm:$0xff] }
 0x440   : > { %5011 = vmatmul.f32.vlgmr.msra.gmra.mxu2 %v6567_v22  ;;  %v3778_v28 = vadd.f32 0.0009, %v3776_v1 }
 0x441   : > { %5251 = vmatpush.msra.mxu2 %v7521_v14  ;;  %v3751_v49 = vpop.f32.mrf.mxu3  ;;  %v4118_v3 = vpop.f32.mrf.mxu0  ;;  %5713 = vmatmul.f32.gmra.mxu0 %v6598_v54  ;;  %v3820_v32 = vsel %vm7872_vm15, %v7817_v11, %v3816_v23 }
 0x442   : > { %v3780_v36 = vmul.f32 %v3778_v28, %v3774_v6  ;;  %v3752_v46 = vadd.f32 %v3751_v49, %v3725_v45  ;;  %v3825_v57 = vsel %vm3822_vm1, %v3824_v50, %v3820_v32  ;;  %v8484_v50 = vld [vmem:[#allocation17_spill] sm:$0xff] }
 0x443   : > { %5253 = vmatpush.msra.mxu2 %v7529_v38  ;;  %v3923_v15 = vpop.f32.mrf.mxu2  ;;  %v7894_v1 = vpop.f32.mrf.mxu1 }
 0x444   : > { %v3826_v60 = vmul.f32 %v3811_v18, %v3780_v36  ;;  %v3765_v21 = vsub.f32 %v3752_v46, %v7734_v31  ;;  %v5295_v31 = vand.u32 4294901760, %v5294_v42  ;;  %v3924_v5 = vadd.f32 %v3923_v15, %v3894_v56  ;;  %v8480_v56 = vld [vmem:[#allocation26_spill] sm:$0xff] }
 0x446   : > { %5038 = vmatmul.f32.vlgmr.msra.gmra.mxu3 %v6567_v22  ;;  %3828 = vst.msk [vmem:[%s7569_s9 + $0x10] sm:$0xff] %vm283_vm0, %v3826_v60  ;;  %v3777_v48 = vmul.f32 2.0, %v3765_v21 }
 0x447   : > { %5290 = vmatpush.msra.mxu3 %v5289_v29  ;;  %v8481_v29 = vld [vmem:[#allocation28_spill] sm:$0xff] }
 0x448   : > { %5015 = vmatmul.f32.gmra.mxu2 %v6587_v44  ;;  %v3779_v8 = vadd.f32 0.0009, %v3777_v48  ;;  %v5667_v35 = vand.u32 4294901760, %v8481_v29 }
 0x449   : > { %5296 = vmatpush.msra.mxu3 %v5295_v31  ;;  %v3953_v9 = vpop.f32.mrf.mxu3  ;;  %v7890_v13 = vpop.f32.mrf.mxu0 }
 0x44a   : > { %v3781_v24 = vmul.f32 %v3779_v8, %v3775_v53  ;;  %v3954_v43 = vadd.f32 %v3953_v9, %v3924_v5  ;;  %v8483_v53 = vld [vmem:[#allocation65_spill] sm:$0xff]  ;;  %v5668_v9 = vsub.f32 %v8481_v29, %v5667_v35 }
 0x44b   : > { %v3928_v33 = vpop.f32.mrf.mxu2  ;;  %v7905_v39 = vpop.f32.mrf.mxu1  ;;  %v5673_v8 = vand.u32 4294901760, %v8483_v53 }
 0x44c   : > { %v3929_v30 = vadd.f32 %v3928_v33, %v7795_v52  ;;  %v3827_v19 = vmul.f32 %v3825_v57, %v3781_v24  ;;  %v3987_v17 = vadd.f32 %v7792_v26, %v3954_v43 }
 0x44e   : > { %5042 = vmatmul.f32.gmra.mxu3 %v6587_v44  ;;  %3829 = vst.msk [vmem:[%s7569_s9 + $0x18] sm:$0xff] %vm283_vm0, %v3827_v19  ;;  %v7888_v11 = vadd.f32 %v7802_v27, %v3987_v17 }
 0x450   : > { %5138 = vmatmul.f32.vlgmr.msrb.gmra.mxu2 %v6576_v20  ;;  %v4792_v18 = vadd.f32 0.5, %v7888_v11 }
 0x451   : > { %5385 = vmatpush.msrb.mxu2 %v5287_v37  ;;  %v3959_v52 = vpop.f32.mrf.mxu3  ;;  %v7902_v63 = vpop.f32.mrf.mxu0 }
 0x452   : > { %v3960_v40 = vadd.f32 %v3959_v52, %v3929_v30  ;;  %v4808_v48 = vmul.f32 %v4792_v18, %v4792_v18  ;;  %v5674_v30 = vsub.f32 %v8483_v53, %v5673_v8  ;;  %v5669_v52 = vand.u32 4294901760, %v5668_v9 }
 0x453   : > { %5389 = vmatpush.msrb.mxu2 %v5293_v47  ;;  %v4044_v26 = vpop.f32.mrf.mxu2 }
 0x454   : > { %v3991_v6 = vadd.f32 %v7813_v61, %v3960_v40 }
 0x456   : > { %5168 = vmatmul.f32.vlgmr.msrb.gmra.mxu3 %v6584_v34  ;;  %v7900_v27 = vadd.f32 %v7820_v2, %v3991_v6 }
 0x457   : > { %5414 = vmatpush.msrb.mxu3 %v7521_v14  ;;  %v7915_v14 = vpop.f32.mrf.mxu1 }
 0x458   : > { %5143 = vmatmul.f32.gmra.mxu2 %v6598_v54  ;;  %v4793_v43 = vadd.f32 0.5, %v7900_v27 }
 0x459   : > { %5416 = vmatpush.msrb.mxu3 %v7529_v38  ;;  %v4083_v37 = vpop.f32.mrf.mxu3  ;;  %v7912_v28 = vpop.f32.mrf.mxu0 }
 0x45a   : > { %v4084_v47 = vadd.f32 %v4083_v37, %v4044_v26  ;;  %v4809_v40 = vmul.f32 %v4793_v43, %v4793_v43 }
 0x45b   : > { %v4052_v45 = vpop.f32.mrf.mxu2 }
 0x45c   : > { %v4114_v61 = vadd.f32 %v7838_v16, %v4084_v47  ;;  %v5675_v47 = vand.u32 4294901760, %v5674_v30 }
 0x45e   : > { %5174 = vmatmul.f32.gmra.mxu3 %v6604_v7  ;;  %v4144_v2 = vadd.f32 %v7851_v51, %v4114_v61  ;;  %v8479_v51 = vld [vmem:[#allocation67_spill] sm:$0xff] }
 0x45f   : > { %v7923_v15 = vpop.f32.mrf.mxu1 }
 0x460   : > { %5259 = vmatmul.f32.vlgmr.msra.gmra.mxu2 %v6600_v59 }
 0x461   : > { %5512 = vmatpush.msra.mxu2 %v8477_v25  ;;  %v4087_v38 = vpop.f32.mrf.mxu3  ;;  %v7920_v36 = vpop.f32.mrf.mxu0 }
 0x462   : > { %v4088_v10 = vadd.f32 %v4087_v38, %v4052_v45 }
 0x463   : > { %5515 = vmatpush.msra.mxu2 %v8478_v62  ;;  %v4176_v12 = vpop.f32.mrf.mxu2 }
 0x464   : > { %v4119_v49 = vadd.f32 %v4118_v3, %v4088_v10  ;;  %v4177_v46 = vadd.f32 %v4176_v12, %v4144_v2 }
 0x466   : > { %5298 = vmatmul.f32.vlgmr.msra.gmra.mxu3 %v6567_v22  ;;  %v4150_v16 = vadd.f32 %v4149_v41, %v4119_v49 }
 0x467   : > { %5542 = vmatpush.msra.mxu3 %v8479_v51  ;;  %v4523_v5 = vpop.f32.mrf.mxu1  ;;  %v4274_v51 = vadd.f32 %v7894_v1, %v7890_v13 }
 0x468   : > { %5267 = vmatmul.f32.gmra.mxu2 %v6618_v55 }
 0x469   : > { %5544 = vmatpush.msra.mxu3 %v8480_v56  ;;  %v4203_v42 = vpop.f32.mrf.mxu3  ;;  %v4493_v31 = vpop.f32.mrf.mxu0 }
 0x46a   : > { %v7927_v4 = vadd.f32 %v4203_v42, %v4177_v46 }
 0x46b   : > { %v4180_v60 = vpop.f32.mrf.mxu2 }
 0x46c   : > { %v4794_v21 = vadd.f32 0.5, %v7927_v4  ;;  %v7932_v23 = vmul.f32 %v7927_v4, %v7888_v11  ;;  %v4181_v32 = vadd.f32 %v4180_v60, %v4150_v16 }
 0x46e   : > { %5302 = vmatmul.f32.gmra.mxu3 %v6587_v44  ;;  %v7937_v0 = vmul.f32 %v4794_v21, %v4792_v18  ;;  %v4810_v3 = vmul.f32 %v4794_v21, %v4794_v21  ;;  %v4278_v21 = vadd.f32 %v7905_v39, %v7902_v63  ;;  %v4780_v63 = vmul.f32 %v7888_v11, %v7888_v11 }
 0x46f   : > { %v4529_v45 = vpop.f32.mrf.mxu1 }
 0x470   : > { %5391 = vmatmul.f32.vlgmr.msrb.gmra.mxu2 %v6567_v22  ;;  %v7941_v41 = vadd.f32 %v4810_v3, %v4808_v48 }
 0x471   : > { %5631 = vmatpush.msrb.mxu2 %v8482_v58  ;;  %v4207_v24 = vpop.f32.mrf.mxu3  ;;  %v4498_v37 = vpop.f32.mrf.mxu0 }
 0x472   : > { %v7946_v33 = vadd.f32 %v4207_v24, %v4181_v32 }
 0x473   : > { %5633 = vmatpush.msrb.mxu2 %v8484_v50  ;;  %v4303_v57 = vpop.f32.mrf.mxu2 }
 0x474   : > { %v4795_v19 = vadd.f32 0.5, %v7946_v33  ;;  %v7952_v17 = vmul.f32 %v7946_v33, %v7900_v27  ;;  %v4304_v56 = vadd.f32 %v4303_v57, %v4274_v51 }
 0x476   : > { %5418 = vmatmul.f32.vlgmr.msrb.gmra.mxu3 %v6567_v22  ;;  %v7956_v26 = vmul.f32 %v4795_v19, %v4793_v43  ;;  %v4811_v6 = vmul.f32 %v4795_v19, %v4795_v19  ;;  %v4814_v43 = vadd.f32 0.0001, %v7941_v41  ;;  %v4781_v19 = vmul.f32 %v7900_v27, %v7900_v27 }
 0x477   : > { %5670 = vmatpush.msrb.mxu3 %v5669_v52  ;;  %v4653_v38 = vpop.f32.mrf.mxu1 }
 0x478   : > { %5395 = vmatmul.f32.gmra.mxu2 %v6587_v44  ;;  %v7958_v61 = vadd.f32 %v4811_v6, %v4809_v40 }
 0x479   : > { %5676 = vmatpush.msrb.mxu3 %v5675_v47  ;;  %v4333_v2 = vpop.f32.mrf.mxu3  ;;  %v7962_v62 = vpop.f32.mrf.mxu0 }
 0x47a   : > { %v4815_v27 = vadd.f32 0.0001, %v7958_v61 }
 0x47b   : > { %v4308_v25 = vpop.f32.mrf.mxu2 }
 0x47c   : > { %v4309_v13 = vadd.f32 %v4308_v25, %v4278_v21 }
 0x47e   : > { %5422 = vmatmul.f32.gmra.mxu3 %v6587_v44 }
 0x47f   : > { %v7969_v16 = vpop.f32.mrf.mxu1 }
 0x480   : > { %5518 = vmatmul.f32.vlgmr.msra.gmra.mxu2 %v6576_v20 }
 0x481   : > { %5765 = vmatpush.msra.mxu2 %v5667_v35  ;;  %v4339_v10 = vpop.f32.mrf.mxu3  ;;  %v7966_v49 = vpop.f32.mrf.mxu0 }
 0x483   : > { %5769 = vmatpush.msra.mxu2 %v5673_v8  ;;  %v4424_v12 = vpop.f32.mrf.mxu2 }
 0x486   : > { %5548 = vmatmul.f32.vlgmr.msra.gmra.mxu3 %v6584_v34  ;;  %v4334_v34 = vadd.f32 %v4333_v2, %v4304_v56 }
 0x487   : > { %5794 = vmatpush.msra.mxu3 %v8482_v58  ;;  %v7976_v60 = vpop.f32.mrf.mxu1 }
 0x488   : > { %5523 = vmatmul.f32.gmra.mxu2 %v6598_v54  ;;  %v4367_v48 = vadd.f32 %v7912_v28, %v4334_v34  ;;  %v4784_v28 = vmul.f32 %v7927_v4, %v7927_v4 }
 0x489   : > { %5796 = vmatpush.msra.mxu3 %v8484_v50  ;;  %v4463_v20 = vpop.f32.mrf.mxu3  ;;  %v4746_v54 = vpop.f32.mrf.mxu0 }
 0x48a   : > { %v4464_v42 = vadd.f32 %v4463_v20, %v4424_v12 }
 0x48b   : > { %v4432_v46 = vpop.f32.mrf.mxu2 }
 0x48c   : > { %v4494_v29 = vadd.f32 %v4493_v31, %v4464_v42 }
 0x48e   : > { %5554 = vmatmul.f32.gmra.mxu3 %v6604_v7  ;;  %v4524_v3 = vadd.f32 %v4523_v5, %v4494_v29  ;;  %v4340_v7 = vadd.f32 %v4339_v10, %v4309_v13 }
 0x48f   : > { %v7990_v5 = vpop.f32.mrf.mxu1 }
 0x490   : > { %5639 = vmatmul.f32.vlgmr.msrb.gmra.mxu2 %v6600_v59  ;;  %v4394_v59 = vadd.f32 %v7915_v14, %v4367_v48  ;;  %v4798_v48 = vmul.f32 2.0, %v7937_v0 }
 0x491   : > { %v4467_v18 = vpop.f32.mrf.mxu3  ;;  %v7984_v8 = vpop.f32.mrf.mxu0 }
 0x492   : > { %v4468_v1 = vadd.f32 %v4467_v18, %v4432_v46  ;;  %v4782_v50 = vsub.f32 %v4394_v59, %v4780_v63 }
 0x493   : > { %v4556_v35 = vpop.f32.mrf.mxu2 }
 0x494   : > { %v4557_v58 = vadd.f32 %v4556_v35, %v4524_v3  ;;  %v4499_v31 = vadd.f32 %v4498_v37, %v4468_v1 }
 0x496   : > { %5678 = vmatmul.f32.vlgmr.msrb.gmra.mxu3 %v6567_v22  ;;  %v4530_v24 = vadd.f32 %v4529_v45, %v4499_v31 }
 0x497   : > { %v8004_v41 = vpop.f32.mrf.mxu1 }
 0x498   : > { %5647 = vmatmul.f32.gmra.mxu2 %v6618_v55  ;;  %v4371_v55 = vadd.f32 %v7920_v36, %v4340_v7  ;;  %v4785_v36 = vmul.f32 %v7946_v33, %v7946_v33 }
 0x499   : > { %v4583_v53 = vpop.f32.mrf.mxu3  ;;  %v8001_v37 = vpop.f32.mrf.mxu0 }
 0x49a   : > { %v4584_v39 = vadd.f32 %v4583_v53, %v4557_v58  ;;  %v4398_v11 = vadd.f32 %v7923_v15, %v4371_v55  ;;  %v4654_v15 = vadd.f32 %v4653_v38, %v7962_v62  ;;  %v4658_v62 = vadd.f32 %v7969_v16, %v7966_v49 }
 0x49b   : > { %v4560_v32 = vpop.f32.mrf.mxu2  ;;  %v4800_v58 = vadd.f32 0.0001, %v4798_v48 }
 0x49c   : > { %v4786_v9 = vsub.f32 %v4584_v39, %v4784_v28  ;;  %v4561_v4 = vadd.f32 %v4560_v32, %v4530_v24  ;;  %v4783_v47 = vsub.f32 %v4398_v11, %v4781_v19 }
 0x49e   : > { %v4816_v14 = vadd.f32 %v4786_v9, %v4782_v50  ;;  %5682 = vmatmul.f32.gmra.mxu3 %v6587_v44 }
 0x49f   : > { %v4985_v21 = vpop.f32.mrf.mxu1 }
 0x4a0   : > { %5771 = vmatmul.f32.vlgmr.msra.gmra.mxu2 %v6567_v22  ;;  %v4818_v57 = vadd.f32 0.0009, %v4816_v14  ;;  %v4799_v14 = vmul.f32 2.0, %v7956_v26 }
 0x4a1   : > { %v4587_v30 = vpop.f32.mrf.mxu3  ;;  %v8011_v18 = vpop.f32.mrf.mxu0 }
 0x4a2   : > { %v4820_v52 = vmul.f32 %v4818_v57, %v4814_v43  ;;  %v4588_v40 = vadd.f32 %v4587_v30, %v4561_v4 }
 0x4a3   : > { %v4683_v6 = vpop.f32.mrf.mxu2 }
 0x4a4   : > { %v4822_v45 = vadd.f32 1e-12, %v4820_v52  ;;  %v4787_v2 = vsub.f32 %v4588_v40, %v4785_v36  ;;  %v4684_v33 = vadd.f32 %v4683_v6, %v4654_v15  ;;  %v4801_v52 = vadd.f32 0.0001, %v4799_v14 }
 0x4a6   : > { %5995 = vrcp.f32 %v4822_v45  ;;  %v4817_v25 = vadd.f32 %v4787_v2, %v4783_v47  ;;  %5798 = vmatmul.f32.vlgmr.msra.gmra.mxu3 %v6567_v22  ;;  %v4835_v13 = vand.u32 2147483648, %v4822_v45  ;;  %v4833_v49 = vand.u32 2147483647, %v4822_v45 }
 0x4a7   : > { %vm4829_vm3 = vweird.f32 %v4822_v45  ;;  %v5109_v57 = vpop.f32.mrf.mxu1 }
 0x4a8   : > { %5775 = vmatmul.f32.gmra.mxu2 %v6587_v44  ;;  %v4819_v10 = vadd.f32 0.0009, %v4817_v25  ;;  %v4836_v53 = vor.u32 1.1754944e-38, %v4835_v13  ;;  %vm4834_vm5 = vcmp.eq.f32.partialorder %v4833_v49, 8.507059e+37 }
 0x4a9   : > { %v4713_v12 = vpop.f32.mrf.mxu3  ;;  %v5070_v50 = vpop.f32.mrf.mxu0 }
 0x4aa   : > { %v4821_v20 = vmul.f32 %v4819_v10, %v4815_v27  ;;  %v4714_v51 = vadd.f32 %v4713_v12, %v4684_v33 }
 0x4ab   : > { %v4688_v46 = vpop.f32.mrf.mxu2 }
 0x4ac   : > { %v5996_v56 = vpop.eup %5995  ;;  %v4823_v42 = vadd.f32 1e-12, %v4821_v20  ;;  %v4747_v38 = vadd.f32 %v4746_v54, %v4714_v51  ;;  %v4689_v29 = vadd.f32 %v4688_v46, %v4658_v62 }
 0x4ad   : > { %v4825_v34 = vmul.f32 %v5996_v56, %v4822_v45  ;;  %vm4830_vm2 = vweird.f32 %v5996_v56 }
 0x4ae   : > { %5997 = vrcp.f32 %v4823_v42  ;;  %5802 = vmatmul.f32.gmra.mxu3 %v6587_v44  ;;  %v4774_v22 = vadd.f32 %v7976_v60, %v4747_v38  ;;  %vm4831_vm4 = vmor %vm4829_vm3, %vm4830_vm2  ;;  %v4849_v24 = vand.u32 2147483648, %v4823_v42  ;;  %vm4843_vm7 = vweird.f32 %v4823_v42 }
 0x4af   : > { %v4826_v61 = vsub.f32 1.0, %v4825_v34  ;;  %v5113_v12 = vpop.f32.mrf.mxu1 }
 0x4b0   : > { %v4790_v35 = vsub.f32 %v4774_v22, %v7932_v23 }
 0x4b1   : > { %v4719_v1 = vpop.f32.mrf.mxu3  ;;  %v4827_v3 = vmul.f32 %v5996_v56, %v4826_v61  ;;  %v5078_v25 = vpop.f32.mrf.mxu0 }
 0x4b2   : > { %v4720_v16 = vadd.f32 %v4719_v1, %v4689_v29  ;;  %v4802_v54 = vmul.f32 2.0, %v4790_v35 }
 0x4b3   : > { %v4880_v7 = vpop.f32.mrf.mxu2  ;;  %v4828_v59 = vadd.f32 %v5996_v56, %v4827_v3 }
 0x4b4   : > { %v5998_v44 = vpop.eup %5997  ;;  %v4804_v60 = vadd.f32 0.0009, %v4802_v54  ;;  %v4751_v63 = vadd.f32 %v7984_v8, %v4720_v16  ;;  %v4847_v8 = vand.u32 2147483647, %v4823_v42 }
 0x4b5   : > { %v4832_v23 = vsel %vm4831_vm4, %v5996_v56, %v4828_v59  ;;  %v4839_v0 = vmul.f32 %v5998_v44, %v4823_v42  ;;  %vm4844_vm6 = vweird.f32 %v5998_v44 }
 0x4b6   : > { %v4806_v39 = vmul.f32 %v4804_v60, %v4800_v58  ;;  %v4837_v28 = vsel %vm4834_vm5, %v4836_v53, %v4832_v23  ;;  %v4778_v31 = vadd.f32 %v7990_v5, %v4751_v63  ;;  %vm4845_vm8 = vmor %vm4843_vm7, %vm4844_vm6  ;;  %vm4848_vm9 = vcmp.eq.f32.partialorder %v4847_v8, 8.507059e+37 }
 0x4b7   : > { %v4840_v32 = vsub.f32 1.0, %v4839_v0  ;;  %v5229_v38 = vpop.f32.mrf.mxu1  ;;  %v5110_v58 = vadd.f32 %v5109_v57, %v5070_v50 }
 0x4b8   : > { %v4852_v55 = vmul.f32 %v4837_v28, %v4806_v39  ;;  %v4791_v9 = vsub.f32 %v4778_v31, %v7952_v17  ;;  %v4850_v17 = vor.u32 1.1754944e-38, %v4849_v24  ;;  %v5114_v39 = vadd.f32 %v5113_v12, %v5078_v25 }
 0x4b9   : > { %v4919_v11 = vpop.f32.mrf.mxu3  ;;  %v4841_v43 = vmul.f32 %v5998_v44, %v4840_v32  ;;  %v5202_v62 = vpop.f32.mrf.mxu0 }
 0x4ba   : > { %4854 = vst.msk [vmem:[%s7569_s9 + $0x20] sm:$0xff] %vm283_vm0, %v4852_v55  ;;  %v4920_v4 = vadd.f32 %v4919_v11, %v4880_v7  ;;  %v4803_v30 = vmul.f32 2.0, %v4791_v9 }
 0x4bb   : > { %v4888_v19 = vpop.f32.mrf.mxu2  ;;  %v4842_v5 = vadd.f32 %v5998_v44, %v4841_v43 }
 0x4bc   : > { %v4805_v40 = vadd.f32 0.0009, %v4803_v30  ;;  %v4950_v26 = vadd.f32 %v8001_v37, %v4920_v4 }
 0x4bd   : > { %v4846_v36 = vsel %vm4845_vm8, %v5998_v44, %v4842_v5 }
 0x4be   : > { %v4807_v6 = vmul.f32 %v4805_v40, %v4801_v52  ;;  %v4851_v47 = vsel %vm4848_vm9, %v4850_v17, %v4846_v36  ;;  %v4980_v45 = vadd.f32 %v8004_v41, %v4950_v26 }
 0x4bf   : > { %v5233_v29 = vpop.f32.mrf.mxu1 }
 0x4c0   : > { %v4853_v2 = vmul.f32 %v4851_v47, %v4807_v6 }
 0x4c1   : > { %v4923_v15 = vpop.f32.mrf.mxu3  ;;  %v5206_v61 = vpop.f32.mrf.mxu0 }
 0x4c2   : > { %4855 = vst.msk [vmem:[%s7569_s9 + $0x28] sm:$0xff] %vm283_vm0, %v4853_v2  ;;  %v4924_v27 = vadd.f32 %v4923_v15, %v4888_v19 }
 0x4c3   : > { %v5012_v10 = vpop.f32.mrf.mxu2 }
 0x4c4   : > { %v5013_v33 = vadd.f32 %v5012_v10, %v4980_v45  ;;  %v4955_v20 = vadd.f32 %v8011_v18, %v4924_v27 }
 0x4c6   : > { %v4986_v51 = vadd.f32 %v4985_v21, %v4955_v20 }
 0x4c7   : > { %v5359_v3 = vpop.f32.mrf.mxu1 }
 0x4c9   : > { %v5039_v46 = vpop.f32.mrf.mxu3  ;;  %v5329_v13 = vpop.f32.mrf.mxu0 }
 0x4ca   : > { %v8028_v37 = vadd.f32 %v5039_v46, %v5013_v33 }
 0x4cb   : > { %v5016_v56 = vpop.f32.mrf.mxu2 }
 0x4cc   : > { %v5017_v42 = vadd.f32 %v5016_v56, %v4986_v51  ;;  %v8038_v40 = vadd.f32 0.5, %v8028_v37  ;;  %v5806_v12 = vmul.f32 %v8028_v37, %v8028_v37 }
 0x4ce   : > { %v5834_v33 = vmul.f32 %v8038_v40, %v8038_v40 }
 0x4cf   : > { %v5365_v54 = vpop.f32.mrf.mxu1 }
 0x4d1   : > { %v5043_v41 = vpop.f32.mrf.mxu3  ;;  %v5334_v49 = vpop.f32.mrf.mxu0 }
 0x4d2   : > { %v8030_v34 = vadd.f32 %v5043_v41, %v5017_v42 }
 0x4d3   : > { %v5139_v22 = vpop.f32.mrf.mxu2 }
 0x4d4   : > { %v5140_v53 = vadd.f32 %v5139_v22, %v5110_v58 }
 0x4d7   : > { %v5489_v60 = vpop.f32.mrf.mxu1 }
 0x4d9   : > { %v5169_v35 = vpop.f32.mrf.mxu3  ;;  %v5450_v44 = vpop.f32.mrf.mxu0 }
 0x4da   : > { %v5170_v0 = vadd.f32 %v5169_v35, %v5140_v53  ;;  %v5490_v4 = vadd.f32 %v5489_v60, %v5450_v44 }
 0x4db   : > { %v5144_v48 = vpop.f32.mrf.mxu2 }
 0x4dc   : > { %v5203_v31 = vadd.f32 %v5202_v62, %v5170_v0  ;;  %v5145_v9 = vadd.f32 %v5144_v48, %v5114_v39 }
 0x4de   : > { %v8032_v43 = vadd.f32 %v5229_v38, %v5203_v31 }
 0x4df   : > { %v5493_v32 = vpop.f32.mrf.mxu1 }
 0x4e0   : > { %v8035_v50 = vadd.f32 0.5, %v8032_v43  ;;  %v5810_v51 = vmul.f32 %v8032_v43, %v8032_v43 }
 0x4e1   : > { %v5175_v1 = vpop.f32.mrf.mxu3  ;;  %v5458_v28 = vpop.f32.mrf.mxu0 }
 0x4e2   : > { %v5176_v11 = vadd.f32 %v5175_v1, %v5145_v9  ;;  %v5836_v45 = vmul.f32 %v8035_v50, %v8035_v50  ;;  %v5494_v27 = vadd.f32 %v5493_v32, %v5458_v28 }
 0x4e3   : > { %v5260_v18 = vpop.f32.mrf.mxu2 }
 0x4e4   : > { %v5207_v57 = vadd.f32 %v5206_v61, %v5176_v11  ;;  %v5838_v46 = vadd.f32 %v5836_v45, %v5834_v33  ;;  %v5814_v33 = vmul.f32 %v8032_v43, %v8028_v37 }
 0x4e6   : > { %v8042_v2 = vadd.f32 %v5233_v29, %v5207_v57  ;;  %v5819_v29 = vadd.f32 0.5, %v8030_v34 }
 0x4e7   : > { %v5609_v26 = vpop.f32.mrf.mxu1 }
 0x4e8   : > { %v8051_v56 = vadd.f32 0.5, %v8042_v2  ;;  %v5811_v60 = vmul.f32 %v8042_v2, %v8042_v2 }
 0x4e9   : > { %v5299_v21 = vpop.f32.mrf.mxu3  ;;  %v5582_v30 = vpop.f32.mrf.mxu0 }
 0x4ea   : > { %v5300_v55 = vadd.f32 %v5299_v21, %v5260_v18  ;;  %v5837_v21 = vmul.f32 %v8051_v56, %v8051_v56 }
 0x4eb   : > { %v5268_v16 = vpop.f32.mrf.mxu2 }
 0x4ec   : > { %v5330_v8 = vadd.f32 %v5329_v13, %v5300_v55 }
 0x4ee   : > { %v5360_v5 = vadd.f32 %v5359_v3, %v5330_v8  ;;  %v5840_v3 = vadd.f32 0.0001, %v5838_v46 }
 0x4ef   : > { %v5613_v18 = vpop.f32.mrf.mxu1 }
 0x4f1   : > { %v5303_v7 = vpop.f32.mrf.mxu3  ;;  %v5586_v61 = vpop.f32.mrf.mxu0 }
 0x4f2   : > { %v5304_v19 = vadd.f32 %v5303_v7, %v5268_v16 }
 0x4f3   : > { %v5392_v59 = vpop.f32.mrf.mxu2 }
 0x4f4   : > { %v5393_v36 = vadd.f32 %v5392_v59, %v5360_v5  ;;  %v5335_v25 = vadd.f32 %v5334_v49, %v5304_v19  ;;  %v5835_v59 = vmul.f32 %v5819_v29, %v5819_v29 }
 0x4f6   : > { %v5366_v62 = vadd.f32 %v5365_v54, %v5335_v25  ;;  %v5807_v54 = vmul.f32 %v8030_v34, %v8030_v34  ;;  %v5839_v53 = vadd.f32 %v5837_v21, %v5835_v59 }
 0x4f7   : > { %v5739_v57 = vpop.f32.mrf.mxu1 }
 0x4f8   : > { %v5841_v32 = vadd.f32 0.0001, %v5839_v53 }
 0x4f9   : > { %v5419_v63 = vpop.f32.mrf.mxu3  ;;  %v5709_v9 = vpop.f32.mrf.mxu0 }
 0x4fa   : > { %v5420_v15 = vadd.f32 %v5419_v63, %v5393_v36  ;;  %v5822_v36 = vmul.f32 %v8035_v50, %v8038_v40 }
 0x4fb   : > { %v5396_v23 = vpop.f32.mrf.mxu2 }
 0x4fc   : > { %v5808_v42 = vsub.f32 %v5420_v15, %v5806_v12  ;;  %v5397_v35 = vadd.f32 %v5396_v23, %v5366_v62 }
 0x501   : > { %v5423_v14 = vpop.f32.mrf.mxu3 }
 0x502   : > { %v5424_v49 = vadd.f32 %v5423_v14, %v5397_v35 }
 0x503   : > { %v5519_v24 = vpop.f32.mrf.mxu2 }
 0x504   : > { %v5520_v52 = vadd.f32 %v5519_v24, %v5490_v4  ;;  %v5809_v63 = vsub.f32 %v5424_v49, %v5807_v54  ;;  %v5815_v49 = vmul.f32 %v8042_v2, %v8030_v34 }
 0x509   : > { %v5549_v17 = vpop.f32.mrf.mxu3 }
 0x50a   : > { %v5550_v6 = vadd.f32 %v5549_v17, %v5520_v52 }
 0x50b   : > { %v5524_v47 = vpop.f32.mrf.mxu2 }
 0x50c   : > { %v5583_v10 = vadd.f32 %v5582_v30, %v5550_v6  ;;  %v5525_v38 = vadd.f32 %v5524_v47, %v5494_v27  ;;  %v5714_v6 = vpop.f32.mrf.mxu0 }
 0x50e   : > { %v5610_v20 = vadd.f32 %v5609_v26, %v5583_v10 }
 0x510   : > { %v5812_v41 = vsub.f32 %v5610_v20, %v5810_v51  ;;  %v5824_v20 = vmul.f32 2.0, %v5822_v36  ;;  %v5745_v51 = vpop.f32.mrf.mxu1 }
 0x511   : > { %v5555_v22 = vpop.f32.mrf.mxu3 }
 0x512   : > { %v5556_v48 = vadd.f32 %v5555_v22, %v5525_v38  ;;  %v5842_v13 = vadd.f32 %v5812_v41, %v5808_v42  ;;  %v5826_v35 = vadd.f32 0.0001, %v5824_v20 }
 0x513   : > { %v5640_v1 = vpop.f32.mrf.mxu2 }
 0x514   : > { %v5844_v16 = vadd.f32 0.0009, %v5842_v13  ;;  %v5587_v7 = vadd.f32 %v5586_v61, %v5556_v48  ;;  %v5823_v61 = vmul.f32 %v8051_v56, %v5819_v29 }
 0x516   : > { %v5846_v44 = vmul.f32 %v5844_v16, %v5840_v3  ;;  %v5614_v58 = vadd.f32 %v5613_v18, %v5587_v7  ;;  %v5825_v16 = vmul.f32 2.0, %v5823_v61 }
 0x518   : > { %v5848_v23 = vadd.f32 1e-12, %v5846_v44  ;;  %v5813_v0 = vsub.f32 %v5614_v58, %v5811_v60  ;;  %v5827_v60 = vadd.f32 0.0001, %v5825_v16 }
 0x519   : > { %v5679_v39 = vpop.f32.mrf.mxu3 }
 0x51a   : > { %5999 = vrcp.f32 %v5848_v23  ;;  %v5843_v28 = vadd.f32 %v5813_v0, %v5809_v63  ;;  %v5680_v14 = vadd.f32 %v5679_v39, %v5640_v1  ;;  %v5861_v38 = vand.u32 2147483648, %v5848_v23 }
 0x51b   : > { %v5648_v31 = vpop.f32.mrf.mxu2  ;;  %vm5855_vm11 = vweird.f32 %v5848_v23  ;;  %v5859_v40 = vand.u32 2147483647, %v5848_v23 }
 0x51c   : > { %v5845_v55 = vadd.f32 0.0009, %v5843_v28  ;;  %v5710_v19 = vadd.f32 %v5709_v9, %v5680_v14  ;;  %v5862_v1 = vor.u32 1.1754944e-38, %v5861_v38 }
 0x51d   : > { %vm5860_vm13 = vcmp.eq.f32.partialorder %v5859_v40, 8.507059e+37 }
 0x51e   : > { %v5847_v24 = vmul.f32 %v5845_v55, %v5841_v32  ;;  %v5740_v26 = vadd.f32 %v5739_v57, %v5710_v19 }
 0x520   : > { %v6000_v11 = vpop.eup %5999  ;;  %v5849_v8 = vadd.f32 1e-12, %v5847_v24 }
 0x521   : > { %v5683_v4 = vpop.f32.mrf.mxu3  ;;  %v5851_v30 = vmul.f32 %v6000_v11, %v5848_v23  ;;  %vm5856_vm10 = vweird.f32 %v6000_v11 }
 0x522   : > { %6001 = vrcp.f32 %v5849_v8  ;;  %v5684_v17 = vadd.f32 %v5683_v4, %v5648_v31  ;;  %vm5857_vm12 = vmor %vm5855_vm11, %vm5856_vm10  ;;  %v5875_v29 = vand.u32 2147483648, %v5849_v8  ;;  %vm5869_vm15 = vweird.f32 %v5849_v8 }
 0x523   : > { %v5772_v5 = vpop.f32.mrf.mxu2  ;;  %v5852_v52 = vsub.f32 1.0, %v5851_v30  ;;  %v5873_v58 = vand.u32 2147483647, %v5849_v8 }
 0x524   : > { %v5773_v45 = vadd.f32 %v5772_v5, %v5740_v26  ;;  %v5715_v12 = vadd.f32 %v5714_v6, %v5684_v17  ;;  %v5876_v23 = vor.u32 1.1754944e-38, %v5875_v29 }
 0x525   : > { %v5853_v15 = vmul.f32 %v6000_v11, %v5852_v52  ;;  %vm5874_vm2 = vcmp.eq.f32.partialorder %v5873_v58, 8.507059e+37 }
 0x526   : > { %v5746_v22 = vadd.f32 %v5745_v51, %v5715_v12 }
 0x527   : > { %v5854_v42 = vadd.f32 %v6000_v11, %v5853_v15 }
 0x528   : > { %v6002_v47 = vpop.eup %6001 }
 0x529   : > { %v5799_v25 = vpop.f32.mrf.mxu3  ;;  %v5865_v27 = vmul.f32 %v6002_v47, %v5849_v8  ;;  %v5858_v13 = vsel %vm5857_vm12, %v6000_v11, %v5854_v42  ;;  %vm5870_vm14 = vweird.f32 %v6002_v47 }
 0x52a   : > { %v5800_v10 = vadd.f32 %v5799_v25, %v5773_v45  ;;  %v5863_v7 = vsel %vm5860_vm13, %v5862_v1, %v5858_v13  ;;  %vm5871_vm1 = vmor %vm5869_vm15, %vm5870_vm14 }
 0x52b   : > { %v5866_v62 = vsub.f32 1.0, %v5865_v27  ;;  %v5776_v41 = vpop.f32.mrf.mxu2 }
 0x52c   : > { %v5816_v46 = vsub.f32 %v5800_v10, %v5814_v33  ;;  %v5777_v37 = vadd.f32 %v5776_v41, %v5746_v22 }
 0x52d   : > { %v5867_v43 = vmul.f32 %v6002_v47, %v5866_v62 }
 0x52e   : > { %v5828_v50 = vmul.f32 2.0, %v5816_v46 }
 0x52f   : > { %v5868_v56 = vadd.f32 %v6002_v47, %v5867_v43 }
 0x530   : > { %v5830_v48 = vadd.f32 0.0009, %v5828_v50 }
 0x531   : > { %v5803_v3 = vpop.f32.mrf.mxu3  ;;  %v5872_v63 = vsel %vm5871_vm1, %v6002_v47, %v5868_v56 }
 0x532   : > { %v5832_v18 = vmul.f32 %v5830_v48, %v5826_v35  ;;  %v5804_v21 = vadd.f32 %v5803_v3, %v5777_v37  ;;  %v5877_v34 = vsel %vm5874_vm2, %v5876_v23, %v5872_v63 }
 0x534   : > { %v5878_v54 = vmul.f32 %v5863_v7, %v5832_v18  ;;  %v5817_v59 = vsub.f32 %v5804_v21, %v5815_v49 }
 0x536   : > { %5880 = vst.msk [vmem:[%s7569_s9 + $0x30] sm:$0xff] %vm283_vm0, %v5878_v54  ;;  %v5829_v44 = vmul.f32 2.0, %v5817_v59 }
 0x538   : > { %v5831_v53 = vadd.f32 0.0009, %v5829_v44 }
 0x53a   : > { %v5833_v0 = vmul.f32 %v5831_v53, %v5827_v60 }
 0x53c   : > { %v5879_v2 = vmul.f32 %v5877_v34, %v5833_v0 }
 0x53e   : > { %5881 = vst.msk [vmem:[%s7569_s9 + $0x38] sm:$0xff] %vm283_vm0, %v5879_v2 }
 0x53f PF: > { %s14_s15 = sadd.s32 1, %s6009_s15  }
 0x540   : > { %p11_p4 = scmp.ge.s32.totalorder %s14_s15, 4  }
 0x542   :  { %13 = sbr.rel (!%p11_p4) target bundleno = 1 (0x1), region = 69 }

</bundles_post_ra>
